<compile_context>
chip_gen: v7x
topology: tpu7x:2x2x1
jax: 0.10.0
libtpu: 0.0.40
codegen_flags: <defaults>
</compile_context>

<pallas_src>
import functools
import math

import jax
import jax.numpy as jnp
from jax import lax
from jax.experimental import pallas as pl
from jax.experimental.pallas import tpu as pltpu

_INV_SQRT2 = 1.0 / math.sqrt(2.0)
_LN_EPS = 1e-5
_VMEM_LIMIT = 64 * 1024 * 1024          # explicit scoped-VMEM cap (<= physical everywhere)


def _cparams(*dims):
    return pltpu.CompilerParams(dimension_semantics=dims,
                                vmem_limit_bytes=_VMEM_LIMIT)


# ----------------------------------------------------------------------------
# tiling helpers
# ----------------------------------------------------------------------------
def _row_tile(m, target=512):
    """Largest row tile <= target that divides m and is a multiple of 8.
    Prefers >= 2 blocks so a v7x megacore gets both TensorCores busy."""
    if m % 8 != 0 or m <= 8:
        return m
    half = m // 2
    cap = min(target, half if half % 8 == 0 else m)
    t = (cap // 8) * 8
    while t >= 8:
        if m % t == 0:
            return t
        t -= 8
    return m


def _col_tile(n, target=1024):
    """Largest lane tile <= target that divides n and is a multiple of 128 (else n)."""
    if n <= target:
        return n
    t = (target // 128) * 128
    while t >= 128:
        if n % t == 0:
            return t
        t -= 128
    return n


# ----------------------------------------------------------------------------
# small helpers shared by kernels (operate on values, not refs)
# ----------------------------------------------------------------------------
def _layernorm(x, g, b):
    mu = jnp.mean(x, axis=-1, keepdims=True)
    xc = x - mu
    var = jnp.mean(xc * xc, axis=-1, keepdims=True)
    return xc * lax.rsqrt(var + _LN_EPS) * g + b


def _gelu_erf(x):
    # exact (erf) GELU, matching torch.nn.GELU()
    return 0.5 * x * (1.0 + lax.erf(x * _INV_SQRT2))


# ----------------------------------------------------------------------------
# LayerNorm + Linear (QKV / Q projection) and plain Linear (KV from mems)
# ----------------------------------------------------------------------------
def _ln_linear_kernel(x_ref, g_ref, b_ref, w_ref, bias_ref, o_ref):
    h = _layernorm(x_ref[...], g_ref[...], b_ref[...]).astype(jnp.bfloat16)
    o_ref[...] = (jnp.dot(h, w_ref[...], preferred_element_type=jnp.float32)
                  + bias_ref[...])


def ln_linear(x2d, g, b, w, bias):
    """y = LN(x) @ w + bias; x2d: (M, C) f32, w: (C, N) bf16."""
    M, C = x2d.shape
    N = w.shape[1]
    tm = _row_tile(M)
    tn = _col_tile(N)
    # TODO(synk): at C >= 2048 also tile K with an f32 VMEM accumulator (P3 pattern)
    # so the (C, tn) weight block stays within v7x's 64 MiB VMEM.
    return pl.pallas_call(
        _ln_linear_kernel,
        grid=(M // tm, N // tn),
        in_specs=[
            pl.BlockSpec((tm, C), lambda i, j: (i, 0)),
            pl.BlockSpec((1, C), lambda i, j: (0, 0)),
            pl.BlockSpec((1, C), lambda i, j: (0, 0)),
            pl.BlockSpec((C, tn), lambda i, j: (0, j)),
            pl.BlockSpec((1, tn), lambda i, j: (0, j)),
        ],
        out_specs=pl.BlockSpec((tm, tn), lambda i, j: (i, j)),
        out_shape=jax.ShapeDtypeStruct((M, N), jnp.float32),
        compiler_params=_cparams("parallel", "parallel"),
    )(x2d, g.reshape(1, C), b.reshape(1, C), w, bias.reshape(1, N))


def _linear_kernel(x_ref, w_ref, bias_ref, o_ref):
    o_ref[...] = (jnp.dot(x_ref[...].astype(jnp.bfloat16), w_ref[...],
                          preferred_element_type=jnp.float32)
                  + bias_ref[...])


def linear(x2d, w, bias):
    """y = x @ w + bias (no LayerNorm); used for the KV projection of mems."""
    M, K = x2d.shape
    N = w.shape[1]
    tm = _row_tile(M)
    tn = _col_tile(N)
    return pl.pallas_call(
        _linear_kernel,
        grid=(M // tm, N // tn),
        in_specs=[
            pl.BlockSpec((tm, K), lambda i, j: (i, 0)),
            pl.BlockSpec((K, tn), lambda i, j: (0, j)),
            pl.BlockSpec((1, tn), lambda i, j: (0, j)),
        ],
        out_specs=pl.BlockSpec((tm, tn), lambda i, j: (i, j)),
        out_shape=jax.ShapeDtypeStruct((M, N), jnp.float32),
        compiler_params=_cparams("parallel", "parallel"),
    )(x2d, w, bias.reshape(1, N))


# ----------------------------------------------------------------------------
# multi-head attention: all heads batched in a single contraction per step
# ----------------------------------------------------------------------------
def _mha_kernel(q_ref, k_ref, v_ref, cos_ref, sin_ref, o_ref, *, scale):
    cos = cos_ref[...]                 # (T, D) full-width tables, broadcast over heads
    sin = sin_ref[...]
    d2 = cos.shape[-1] // 2

    def rope(x):                       # x: (H, T, D); split-half rotary, full lane width
        neg = jnp.concatenate([-x[..., d2:], x[..., :d2]], axis=-1)
        return x * cos + neg * sin

    q = rope(q_ref[0])                 # (H, T, D) f32
    k = rope(k_ref[0])

    # one head-batched MXU contraction (depth = full D), bf16 operands / f32 accumulate
    s = jnp.einsum("htd,hsd->hts",
                   q.astype(jnp.bfloat16), k.astype(jnp.bfloat16),
                   preferred_element_type=jnp.float32) * scale

    seq = s.shape[-1]
    row = lax.broadcasted_iota(jnp.int32, (seq, seq), 0)
    col = lax.broadcasted_iota(jnp.int32, (seq, seq), 1)
    allow = (row > col) | (col == 0)   # "ar" mask: tril(-1) with column 0 forced on
    s = jnp.where(allow, s, -1e30)
    s = s - jnp.max(s, axis=-1, keepdims=True)
    p = jnp.exp(s)
    p = p * pl.reciprocal(jnp.sum(p, axis=-1, keepdims=True), approx=True)

    o_ref[0] = jnp.einsum("hts,hsd->htd",
                          p.astype(jnp.bfloat16), v_ref[0].astype(jnp.bfloat16),
                          preferred_element_type=jnp.float32)


def mh_attention(q, k, v, cos, sin):
    """q/k/v: (B, H, T, D) f32 -> (B, H, T, D) f32. Same 'ar' mask for self & cross attn."""
    B, H, T, D = q.shape
    kernel = functools.partial(_mha_kernel, scale=1.0 / math.sqrt(D))
    blk = pl.BlockSpec((1, H, T, D), lambda b: (b, 0, 0, 0))
    rope_blk = pl.BlockSpec((T, D), lambda b: (0, 0))
    # TODO(synk): at production T, tile the KV axis (flash-style online softmax) so the
    # (H, T, T) score tensor never materializes — needed for v7x's 64 MiB VMEM.
    return pl.pallas_call(
        kernel,
        grid=(B,),
        in_specs=[blk, blk, blk, rope_blk, rope_blk],
        out_specs=blk,
        out_shape=jax.ShapeDtypeStruct((B, H, T, D), jnp.float32),
        compiler_params=_cparams("parallel"),
    )(q, k, v, cos, sin)


# ----------------------------------------------------------------------------
# out-projection + residual + LN2 + GELU-MLP + residual, fused
# ----------------------------------------------------------------------------
def _attn_out_mlp_kernel(y_ref, x_ref, pw_ref, pb_ref, g_ref, b_ref,
                         fcw_ref, fcb_ref, pjw_ref, pjb_ref, o_ref):
    x1 = (x_ref[...]
          + jnp.dot(y_ref[...].astype(jnp.bfloat16), pw_ref[...],
                    preferred_element_type=jnp.float32)
          + pb_ref[...])
    h = _layernorm(x1, g_ref[...], b_ref[...]).astype(jnp.bfloat16)
    h = _gelu_erf(jnp.dot(h, fcw_ref[...], preferred_element_type=jnp.float32)
                  + fcb_ref[...])
    o_ref[...] = (x1
                  + jnp.dot(h.astype(jnp.bfloat16), pjw_ref[...],
                            preferred_element_type=jnp.float32)
                  + pjb_ref[...])


def attn_out_mlp(y2d, x2d, p):
    M, C = x2d.shape
    F = p["fc_w"].shape[1]
    tm = _row_tile(M)
    # TODO(synk): at C >= 2048 stream proj_w / fc_w / fcproj_w in (tk, tn) blocks on a
    # trailing 'arbitrary' grid axis with a VMEM accumulator instead of full blocks.
    return pl.pallas_call(
        _attn_out_mlp_kernel,
        grid=(M // tm,),
        in_specs=[
            pl.BlockSpec((tm, C), lambda i: (i, 0)),   # attention output
            pl.BlockSpec((tm, C), lambda i: (i, 0)),   # residual input
            pl.BlockSpec((C, C), lambda i: (0, 0)),    # proj_w (bf16)
            pl.BlockSpec((1, C), lambda i: (0, 0)),    # proj_b
            pl.BlockSpec((1, C), lambda i: (0, 0)),    # ln2_g
            pl.BlockSpec((1, C), lambda i: (0, 0)),    # ln2_b
            pl.BlockSpec((C, F), lambda i: (0, 0)),    # fc_w (bf16)
            pl.BlockSpec((1, F), lambda i: (0, 0)),    # fc_b
            pl.BlockSpec((F, C), lambda i: (0, 0)),    # fcproj_w (bf16)
            pl.BlockSpec((1, C), lambda i: (0, 0)),    # fcproj_b
        ],
        out_specs=pl.BlockSpec((tm, C), lambda i: (i, 0)),
        out_shape=jax.ShapeDtypeStruct((M, C), jnp.float32),
        compiler_params=_cparams("parallel"),
    )(y2d, x2d, p["proj_w"], p["proj_b"].reshape(1, C),
      p["ln2_g"].reshape(1, C), p["ln2_b"].reshape(1, C),
      p["fc_w"], p["fc_b"].reshape(1, F), p["fcproj_w"], p["fcproj_b"].reshape(1, C))


# ----------------------------------------------------------------------------
# final LN + lm_head (vocab-streamed online LSE) + per-token cross entropy
# ----------------------------------------------------------------------------
def _lnf_lmhead_loss_kernel(x_ref, g_ref, b_ref, w_ref, bias_ref, tgt_ref,
                            logits_ref, loss_ref, h_sc, m_sc, l_sc, p_sc, *, tv):
    j = pl.program_id(1)

    @pl.when(j == 0)
    def _():
        h_sc[...] = _layernorm(x_ref[...], g_ref[...], b_ref[...]).astype(jnp.bfloat16)
        m_sc[...] = jnp.full_like(m_sc, -jnp.inf)
        l_sc[...] = jnp.zeros_like(l_sc)
        p_sc[...] = jnp.zeros_like(p_sc)

    # weight consumed pre-transposed as (C, tv) bf16 — no per-tile relayout
    z = (jnp.dot(h_sc[...], w_ref[...], preferred_element_type=jnp.float32)
         + bias_ref[...])
    logits_ref[...] = z

    # streaming log-sum-exp over the vocab tiles
    m_new = jnp.maximum(m_sc[...], jnp.max(z, axis=-1, keepdims=True))
    l_sc[...] = (l_sc[...] * jnp.exp(m_sc[...] - m_new)
                 + jnp.sum(jnp.exp(z - m_new), axis=-1, keepdims=True))
    m_sc[...] = m_new

    # target logit from integer targets (no one-hot); global vocab index of this tile
    col = j * tv + lax.broadcasted_iota(jnp.int32, z.shape, 1)
    p_sc[...] += jnp.sum(jnp.where(col == tgt_ref[...], z, 0.0), axis=-1, keepdims=True)

    @pl.when(j == pl.num_programs(1) - 1)
    def _():
        loss_ref[...] = m_sc[...] + jnp.log(l_sc[...]) - p_sc[...]


def lnf_lmhead_loss(x2d, g, b, w_cv, bias_v, targets):
    """Final LN + lm_head + per-token CE. w_cv: (C, V) bf16 (pre-transposed once).
    Returns (logits (M, V) f32, per-token loss (M, 1) f32)."""
    M, C = x2d.shape
    V = w_cv.shape[1]
    tm = _row_tile(M)
    tv = _col_tile(V, 2048)
    kernel = functools.partial(_lnf_lmhead_loss_kernel, tv=tv)
    # TODO(synk): move targets to scalar prefetch (SMEM) and emit only the block-sum of
    # the loss (SMEM scalar) when the caller does not need per-token values.
    return pl.pallas_call(
        kernel,
        grid=(M // tm, V // tv),
        in_specs=[
            pl.BlockSpec((tm, C), lambda i, j: (i, 0)),
            pl.BlockSpec((1, C), lambda i, j: (0, 0)),
            pl.BlockSpec((1, C), lambda i, j: (0, 0)),
            pl.BlockSpec((C, tv), lambda i, j: (0, j)),
            pl.BlockSpec((1, tv), lambda i, j: (0, j)),
            pl.BlockSpec((tm, 1), lambda i, j: (i, 0)),
        ],
        out_specs=(pl.BlockSpec((tm, tv), lambda i, j: (i, j)),
                   pl.BlockSpec((tm, 1), lambda i, j: (i, 0))),
        out_shape=(jax.ShapeDtypeStruct((M, V), jnp.float32),
                   jax.ShapeDtypeStruct((M, 1), jnp.float32)),
        scratch_shapes=[pltpu.VMEM((tm, C), jnp.bfloat16),
                        pltpu.VMEM((tm, 1), jnp.float32),
                        pltpu.VMEM((tm, 1), jnp.float32),
                        pltpu.VMEM((tm, 1), jnp.float32)],
        compiler_params=_cparams("parallel", "arbitrary"),
    )(x2d, g.reshape(1, C), b.reshape(1, C), w_cv, bias_v.reshape(1, V),
      targets.reshape(M, 1).astype(jnp.int32))


# ----------------------------------------------------------------------------
# Model (plain-JAX glue around the kernels)
# ----------------------------------------------------------------------------
def make_config():
    return dict(n_embd=32, n_head=4, n_layer=2, vocab_size=64, bias=True,
                dropout=0.0, attn_sink=False, stack_enc_dec=False,
                tie_lmhead=True, train_mode="ar", scale_loss=False)


def init_params(key, cfg):
    C, V, L = cfg["n_embd"], cfg["vocab_size"], cfg["n_layer"]
    keys = iter(jax.random.split(key, 256))

    def w(shape):
        return (0.02 * jax.random.normal(next(keys), shape)).astype(jnp.float32)

    bf = lambda a: a.astype(jnp.bfloat16)     # MXU operands stored bf16 (f32 accumulate)
    zeros = lambda s: jnp.zeros(s, jnp.float32)
    ones = lambda s: jnp.ones(s, jnp.float32)

    def mlp_and_ln():
        return dict(ln2_g=ones((C,)), ln2_b=zeros((C,)),
                    fc_w=bf(w((C, 4 * C))), fc_b=zeros((4 * C,)),
                    fcproj_w=bf(w((4 * C, C))), fcproj_b=zeros((C,)))

    enc_layers = []
    for _ in range(L):
        p = dict(ln1_g=ones((C,)), ln1_b=zeros((C,)),
                 attn_w=bf(w((C, 3 * C))), attn_b=zeros((3 * C,)),
                 proj_w=bf(w((C, C))), proj_b=zeros((C,)))
        p.update(mlp_and_ln())
        enc_layers.append(p)

    dec_layers = []
    for _ in range(L):
        p = dict(ln1_g=ones((C,)), ln1_b=zeros((C,)),
                 attn_w=bf(w((C, C))), attn_b=zeros((C,)),
                 attn_mem_w=bf(w((C, 2 * C))), attn_mem_b=zeros((2 * C,)),
                 proj_w=bf(w((C, C))), proj_b=zeros((C,)))
        p.update(mlp_and_ln())
        dec_layers.append(p)

    lm_head_w = w((V, C))                       # f32 master weight (tied embedding table)
    params = dict(enc=enc_layers, dec=dec_layers,
                  enc_lnf_g=ones((C,)), enc_lnf_b=zeros((C,)),  # unused (enc ln_f discarded)
                  dec_lnf_g=ones((C,)), dec_lnf_b=zeros((C,)),
                  lm_head_w=lm_head_w, lm_head_b=zeros((V,)),
                  lm_head_wt=bf(lm_head_w.T),   # (C, V) bf16, pre-transposed once
                  wpe=w((1, C)))
    # tie_lmhead=True: token embedding shares the lm_head weight (V, C)
    params["wte"] = params["lm_head_w"]
    return params


def rotary_cache(T, D):
    """Full-width (T, D) cos/sin tables (cat of the two half-angle tables), so RoPE is
    applied once per tensor over all heads instead of per head-half slices."""
    theta = 1.0 / (10000.0 ** (jnp.arange(0, D, 2, dtype=jnp.float32) / D))
    idx = jnp.arange(T, dtype=jnp.float32)
    idx_theta = jnp.einsum("n,d->nd", idx, theta)              # (T, D//2)
    idx_theta2 = jnp.concatenate([idx_theta, idx_theta], axis=1)
    return jnp.cos(idx_theta2), jnp.sin(idx_theta2)            # (T, D) each


def self_attention_block(x, p, cfg, cos, sin):
    B, T, C = x.shape
    H = cfg["n_head"]
    D = C // H
    qkv = ln_linear(x.reshape(B * T, C), p["ln1_g"], p["ln1_b"],
                    p["attn_w"], p["attn_b"])                   # (B*T, 3C)
    qkv = qkv.reshape(B, T, 3, H, D).transpose(2, 0, 3, 1, 4)   # (3, B, H, T, D)
    y = mh_attention(qkv[0], qkv[1], qkv[2], cos, sin)          # (B, H, T, D)
    y = y.transpose(0, 2, 1, 3).reshape(B * T, C)
    return attn_out_mlp(y, x.reshape(B * T, C), p).reshape(B, T, C)


def cross_attention_block(x, mems, p, cfg, cos, sin):
    B, T, C = x.shape
    H = cfg["n_head"]
    D = C // H
    q = ln_linear(x.reshape(B * T, C), p["ln1_g"], p["ln1_b"],
                  p["attn_w"], p["attn_b"])                     # (B*T, C)
    q = q.reshape(B, T, H, D).transpose(0, 2, 1, 3)             # (B, H, T, D)
    kv = linear(mems.reshape(B * T, C), p["attn_mem_w"], p["attn_mem_b"])
    kv = kv.reshape(B, T, 2, H, D).transpose(2, 0, 3, 1, 4)     # (2, B, H, T, D)
    y = mh_attention(q, kv[0], kv[1], cos, sin)                 # (B, H, T, D)
    y = y.transpose(0, 2, 1, 3).reshape(B * T, C)
    return attn_out_mlp(y, x.reshape(B * T, C), p).reshape(B, T, C)


def past_forward(params, cfg, input_ids):
    B, T = input_ids.shape
    C, H, V = cfg["n_embd"], cfg["n_head"], cfg["vocab_size"]
    D = C // H

    cos, sin = rotary_cache(T, D)

    # --- embeddings ---
    # TODO(synk): token-embedding gather stays in plain JAX (no Pallas gather win here).
    tok_emb = params["wte"][input_ids]                                  # (B, T, C)
    pos_emb = jnp.broadcast_to(params["wpe"].reshape(1, 1, C), (B, T, C))

    # --- encoder (self-attention); mems collected pre-ln_f (stack_enc_dec=False) ---
    x = tok_emb
    mems_list = []
    for p in params["enc"]:
        x = self_attention_block(x, p, cfg, cos, sin)
        mems_list.append(x)
    # encoder's ln_f output is discarded by PAST.forward, so it is not computed.

    # --- decoder (cross-attention over per-layer encoder mems) ---
    x = pos_emb
    for p, mems in zip(params["dec"], mems_list):
        x = cross_attention_block(x, mems, p, cfg, cos, sin)

    # --- final LN + lm head (vocab-streamed) + per-token CE, fused in one kernel ---
    logits2d, per_tok = lnf_lmhead_loss(
        x.reshape(B * T, C), params["dec_lnf_g"], params["dec_lnf_b"],
        params["lm_head_wt"], params["lm_head_b"], input_ids.reshape(-1))
    logits = logits2d.reshape(B, T, V)

    # mode="ar" with attention_mask=None => prediction_mask is all ones
    pmask = jnp.ones((B, T), jnp.float32)
    loss = jnp.sum(per_tok.reshape(B, T) * pmask) / jnp.sum(pmask)
    return logits, loss


if __name__ == "__main__":
    cfg = make_config()
    key = jax.random.PRNGKey(0)
    pkey, dkey = jax.random.split(key)
    params = init_params(pkey, cfg)

    B, T = 2, 8
    input_ids = jax.random.randint(dkey, (B, T), 0, cfg["vocab_size"], dtype=jnp.int32)

    fwd = jax.jit(lambda prm, ids: past_forward(prm, cfg, ids))
    logits, loss = fwd(params, input_ids)
    jax.block_until_ready((logits, loss))
    assert logits.shape == (B, T, cfg["vocab_size"])
    assert loss.shape == ()
    print("KERNEL_OK")
</pallas_src>

<mosaic_0001>
module attributes {stable_mosaic.version = 11 : i64} {
  func.func @_attn_out_mlp_kernel(%arg0: i32, %arg1: memref<8x32xf32, #tpu.memory_space<vmem>>, %arg2: memref<8x32xf32, #tpu.memory_space<vmem>>, %arg3: memref<32x32xbf16, #tpu.memory_space<vmem>>, %arg4: memref<1x32xf32, #tpu.memory_space<vmem>>, %arg5: memref<1x32xf32, #tpu.memory_space<vmem>>, %arg6: memref<1x32xf32, #tpu.memory_space<vmem>>, %arg7: memref<32x128xbf16, #tpu.memory_space<vmem>>, %arg8: memref<1x128xf32, #tpu.memory_space<vmem>>, %arg9: memref<128x32xbf16, #tpu.memory_space<vmem>>, %arg10: memref<1x32xf32, #tpu.memory_space<vmem>>, %arg11: memref<8x32xf32, #tpu.memory_space<vmem>>) attributes {dimension_semantics = [#tpu.dimension_semantics<parallel>], iteration_bounds = array<i64: 2>, scalar_prefetch = 0 : i64, scratch_operands = 0 : i64, tpu.core_type = #tpu.core_type<tc>, window_params = [{transform_indices = @transform_0, window_bounds = array<i64: 8, 32>}, {transform_indices = @transform_1, window_bounds = array<i64: 8, 32>}, {pipeline_mode = #tpu.pipeline_mode<synchronous>, transform_indices = @transform_2, window_bounds = array<i64: 32, 32>}, {pipeline_mode = #tpu.pipeline_mode<synchronous>, transform_indices = @transform_3, window_bounds = array<i64: 1, 32>}, {pipeline_mode = #tpu.pipeline_mode<synchronous>, transform_indices = @transform_4, window_bounds = array<i64: 1, 32>}, {pipeline_mode = #tpu.pipeline_mode<synchronous>, transform_indices = @transform_5, window_bounds = array<i64: 1, 32>}, {pipeline_mode = #tpu.pipeline_mode<synchronous>, transform_indices = @transform_6, window_bounds = array<i64: 32, 128>}, {pipeline_mode = #tpu.pipeline_mode<synchronous>, transform_indices = @transform_7, window_bounds = array<i64: 1, 128>}, {pipeline_mode = #tpu.pipeline_mode<synchronous>, transform_indices = @transform_8, window_bounds = array<i64: 128, 32>}, {pipeline_mode = #tpu.pipeline_mode<synchronous>, transform_indices = @transform_9, window_bounds = array<i64: 1, 32>}, {transform_indices = @transform_10, window_bounds = array<i64: 8, 32>}]} {
    %c0 = arith.constant 0 : index
    %c0_0 = arith.constant 0 : index
    %0 = vector.load %arg2[%c0, %c0_0] : memref<8x32xf32, #tpu.memory_space<vmem>>, vector<8x32xf32>
    %c0_1 = arith.constant 0 : index
    %c0_2 = arith.constant 0 : index
    %1 = vector.load %arg1[%c0_1, %c0_2] : memref<8x32xf32, #tpu.memory_space<vmem>>, vector<8x32xf32>
    %2 = arith.truncf %1 : vector<8x32xf32> to vector<8x32xbf16>
    %c0_3 = arith.constant 0 : index
    %c0_4 = arith.constant 0 : index
    %3 = vector.load %arg3[%c0_3, %c0_4] : memref<32x32xbf16, #tpu.memory_space<vmem>>, vector<32x32xbf16>
    %cst = arith.constant dense<0.000000e+00> : vector<8x32xf32>
    %4 = tpu.matmul %2, %3, %cst {dimension_numbers = #tpu.dot_dimension_numbers<[1], [0], [0], [1], [0, 0, 1, 1], [], []>} : vector<8x32xbf16>, vector<32x32xbf16>, vector<8x32xf32> -> vector<8x32xf32>
    %5 = arith.addf %0, %4 : vector<8x32xf32>
    %c0_5 = arith.constant 0 : index
    %c0_6 = arith.constant 0 : index
    %6 = vector.load %arg4[%c0_5, %c0_6] : memref<1x32xf32, #tpu.memory_space<vmem>>, vector<1x32xf32>
    %7 = vector.broadcast %6 : vector<1x32xf32> to vector<8x32xf32>
    %8 = arith.addf %5, %7 : vector<8x32xf32>
    %c0_7 = arith.constant 0 : index
    %c0_8 = arith.constant 0 : index
    %9 = vector.load %arg5[%c0_7, %c0_8] : memref<1x32xf32, #tpu.memory_space<vmem>>, vector<1x32xf32>
    %c0_9 = arith.constant 0 : index
    %c0_10 = arith.constant 0 : index
    %10 = vector.load %arg6[%c0_9, %c0_10] : memref<1x32xf32, #tpu.memory_space<vmem>>, vector<1x32xf32>
    %cst_11 = arith.constant dense<0.000000e+00> : vector<8xf32>
    %11 = vector.multi_reduction <add>, %8, %cst_11 [1] : vector<8x32xf32> to vector<8xf32>
    %12 = vector.shape_cast %11 : vector<8xf32> to vector<8x1xf32>
    %cst_12 = arith.constant 3.200000e+01 : f32
    %13 = vector.broadcast %cst_12 : f32 to vector<8x1xf32>
    %14 = arith.divf %12, %13 : vector<8x1xf32>
    %15 = vector.broadcast %14 : vector<8x1xf32> to vector<8x32xf32>
    %16 = arith.subf %8, %15 : vector<8x32xf32>
    %17 = arith.mulf %16, %16 : vector<8x32xf32>
    %cst_13 = arith.constant dense<0.000000e+00> : vector<8xf32>
    %18 = vector.multi_reduction <add>, %17, %cst_13 [1] : vector<8x32xf32> to vector<8xf32>
    %19 = vector.shape_cast %18 : vector<8xf32> to vector<8x1xf32>
    %cst_14 = arith.constant 3.200000e+01 : f32
    %20 = vector.broadcast %cst_14 : f32 to vector<8x1xf32>
    %21 = arith.divf %19, %20 : vector<8x1xf32>
    %cst_15 = arith.constant 9.99999974E-6 : f32
    %22 = vector.broadcast %cst_15 : f32 to vector<8x1xf32>
    %23 = arith.addf %21, %22 : vector<8x1xf32>
    %24 = math.rsqrt %23 : vector<8x1xf32>
    %25 = vector.broadcast %24 : vector<8x1xf32> to vector<8x32xf32>
    %26 = arith.mulf %16, %25 : vector<8x32xf32>
    %27 = vector.broadcast %9 : vector<1x32xf32> to vector<8x32xf32>
    %28 = arith.mulf %26, %27 : vector<8x32xf32>
    %29 = vector.broadcast %10 : vector<1x32xf32> to vector<8x32xf32>
    %30 = arith.addf %28, %29 : vector<8x32xf32>
    %31 = arith.truncf %30 : vector<8x32xf32> to vector<8x32xbf16>
    %c0_16 = arith.constant 0 : index
    %c0_17 = arith.constant 0 : index
    %32 = vector.load %arg7[%c0_16, %c0_17] : memref<32x128xbf16, #tpu.memory_space<vmem>>, vector<32x128xbf16>
    %cst_18 = arith.constant dense<0.000000e+00> : vector<8x128xf32>
    %33 = tpu.matmul %31, %32, %cst_18 {dimension_numbers = #tpu.dot_dimension_numbers<[1], [0], [0], [1], [0, 0, 1, 1], [], []>} : vector<8x32xbf16>, vector<32x128xbf16>, vector<8x128xf32> -> vector<8x128xf32>
    %c0_19 = arith.constant 0 : index
    %c0_20 = arith.constant 0 : index
    %34 = vector.load %arg8[%c0_19, %c0_20] : memref<1x128xf32, #tpu.memory_space<vmem>>, vector<1x128xf32>
    %35 = vector.broadcast %34 : vector<1x128xf32> to vector<8x128xf32>
    %36 = arith.addf %33, %35 : vector<8x128xf32>
    %cst_21 = arith.constant 5.000000e-01 : f32
    %37 = vector.broadcast %cst_21 : f32 to vector<8x128xf32>
    %38 = arith.mulf %37, %36 : vector<8x128xf32>
    %cst_22 = arith.constant 0.707106769 : f32
    %39 = vector.broadcast %cst_22 : f32 to vector<8x128xf32>
    %40 = arith.mulf %36, %39 : vector<8x128xf32>
    %41 = math.erf %40 : vector<8x128xf32>
    %cst_23 = arith.constant 1.000000e+00 : f32
    %42 = vector.broadcast %cst_23 : f32 to vector<8x128xf32>
    %43 = arith.addf %42, %41 : vector<8x128xf32>
    %44 = arith.mulf %38, %43 : vector<8x128xf32>
    %45 = arith.truncf %44 : vector<8x128xf32> to vector<8x128xbf16>
    %c0_24 = arith.constant 0 : index
    %c0_25 = arith.constant 0 : index
    %46 = vector.load %arg9[%c0_24, %c0_25] : memref<128x32xbf16, #tpu.memory_space<vmem>>, vector<128x32xbf16>
    %cst_26 = arith.constant dense<0.000000e+00> : vector<8x32xf32>
    %47 = tpu.matmul %45, %46, %cst_26 {dimension_numbers = #tpu.dot_dimension_numbers<[1], [0], [0], [1], [0, 0, 1, 1], [], []>} : vector<8x128xbf16>, vector<128x32xbf16>, vector<8x32xf32> -> vector<8x32xf32>
    %48 = arith.addf %8, %47 : vector<8x32xf32>
    %c0_27 = arith.constant 0 : index
    %c0_28 = arith.constant 0 : index
    %49 = vector.load %arg10[%c0_27, %c0_28] : memref<1x32xf32, #tpu.memory_space<vmem>>, vector<1x32xf32>
    %50 = vector.broadcast %49 : vector<1x32xf32> to vector<8x32xf32>
    %51 = arith.addf %48, %50 : vector<8x32xf32>
    %c0_29 = arith.constant 0 : index
    %c0_30 = arith.constant 0 : index
    %52 = vector.load %arg11[%c0_29, %c0_30] : memref<8x32xf32, #tpu.memory_space<vmem>>, vector<8x32xf32>
    tpu.vector_store %arg11[%c0_29, %c0_30], %51 {strides = array<i32>} : memref<8x32xf32, #tpu.memory_space<vmem>>, vector<8x32xf32>,
    return
  }
  func.func @transform_0(%arg0: i32) -> (i32, i32) {
    %c0_i32 = arith.constant 0 : i32
    %c0_i32_0 = arith.constant 0 : i32
    return %arg0, %c0_i32 : i32, i32
  }
  func.func @transform_1(%arg0: i32) -> (i32, i32) {
    %c0_i32 = arith.constant 0 : i32
    %c0_i32_0 = arith.constant 0 : i32
    return %arg0, %c0_i32 : i32, i32
  }
  func.func @transform_2(%arg0: i32) -> (i32, i32) {
    %c0_i32 = arith.constant 0 : i32
    %c0_i32_0 = arith.constant 0 : i32
    %c0_i32_1 = arith.constant 0 : i32
    return %c0_i32, %c0_i32_0 : i32, i32
  }
  func.func @transform_3(%arg0: i32) -> (i32, i32) {
    %c0_i32 = arith.constant 0 : i32
    %c0_i32_0 = arith.constant 0 : i32
    %c0_i32_1 = arith.constant 0 : i32
    return %c0_i32, %c0_i32_0 : i32, i32
  }
  func.func @transform_4(%arg0: i32) -> (i32, i32) {
    %c0_i32 = arith.constant 0 : i32
    %c0_i32_0 = arith.constant 0 : i32
    %c0_i32_1 = arith.constant 0 : i32
    return %c0_i32, %c0_i32_0 : i32, i32
  }
  func.func @transform_5(%arg0: i32) -> (i32, i32) {
    %c0_i32 = arith.constant 0 : i32
    %c0_i32_0 = arith.constant 0 : i32
    %c0_i32_1 = arith.constant 0 : i32
    return %c0_i32, %c0_i32_0 : i32, i32
  }
  func.func @transform_6(%arg0: i32) -> (i32, i32) {
    %c0_i32 = arith.constant 0 : i32
    %c0_i32_0 = arith.constant 0 : i32
    %c0_i32_1 = arith.constant 0 : i32
    return %c0_i32, %c0_i32_0 : i32, i32
  }
  func.func @transform_7(%arg0: i32) -> (i32, i32) {
    %c0_i32 = arith.constant 0 : i32
    %c0_i32_0 = arith.constant 0 : i32
    %c0_i32_1 = arith.constant 0 : i32
    return %c0_i32, %c0_i32_0 : i32, i32
  }
  func.func @transform_8(%arg0: i32) -> (i32, i32) {
    %c0_i32 = arith.constant 0 : i32
    %c0_i32_0 = arith.constant 0 : i32
    %c0_i32_1 = arith.constant 0 : i32
    return %c0_i32, %c0_i32_0 : i32, i32
  }
  func.func @transform_9(%arg0: i32) -> (i32, i32) {
    %c0_i32 = arith.constant 0 : i32
    %c0_i32_0 = arith.constant 0 : i32
    %c0_i32_1 = arith.constant 0 : i32
    return %c0_i32, %c0_i32_0 : i32, i32
  }
  func.func @transform_10(%arg0: i32) -> (i32, i32) {
    %c0_i32 = arith.constant 0 : i32
    %c0_i32_0 = arith.constant 0 : i32
    return %arg0, %c0_i32 : i32, i32
  }
}

module attributes {stable_mosaic.version = 11 : i64} {
  func.func @_ln_linear_kernel(%arg0: i32, %arg1: i32, %arg2: memref<8x32xf32, #tpu.memory_space<vmem>>, %arg3: memref<1x32xf32, #tpu.memory_space<vmem>>, %arg4: memref<1x32xf32, #tpu.memory_space<vmem>>, %arg5: memref<32x96xbf16, #tpu.memory_space<vmem>>, %arg6: memref<1x96xf32, #tpu.memory_space<vmem>>, %arg7: memref<8x96xf32, #tpu.memory_space<vmem>>) attributes {dimension_semantics = [#tpu.dimension_semantics<parallel>, #tpu.dimension_semantics<parallel>], iteration_bounds = array<i64: 2, 1>, scalar_prefetch = 0 : i64, scratch_operands = 0 : i64, tpu.core_type = #tpu.core_type<tc>, window_params = [{transform_indices = @transform_0, window_bounds = array<i64: 8, 32>}, {pipeline_mode = #tpu.pipeline_mode<synchronous>, transform_indices = @transform_1, window_bounds = array<i64: 1, 32>}, {pipeline_mode = #tpu.pipeline_mode<synchronous>, transform_indices = @transform_2, window_bounds = array<i64: 1, 32>}, {transform_indices = @transform_3, window_bounds = array<i64: 32, 96>}, {transform_indices = @transform_4, window_bounds = array<i64: 1, 96>}, {transform_indices = @transform_5, window_bounds = array<i64: 8, 96>}]} {
    %c0 = arith.constant 0 : index
    %c0_0 = arith.constant 0 : index
    %0 = vector.load %arg2[%c0, %c0_0] : memref<8x32xf32, #tpu.memory_space<vmem>>, vector<8x32xf32>
    %c0_1 = arith.constant 0 : index
    %c0_2 = arith.constant 0 : index
    %1 = vector.load %arg3[%c0_1, %c0_2] : memref<1x32xf32, #tpu.memory_space<vmem>>, vector<1x32xf32>
    %c0_3 = arith.constant 0 : index
    %c0_4 = arith.constant 0 : index
    %2 = vector.load %arg4[%c0_3, %c0_4] : memref<1x32xf32, #tpu.memory_space<vmem>>, vector<1x32xf32>
    %cst = arith.constant dense<0.000000e+00> : vector<8xf32>
    %3 = vector.multi_reduction <add>, %0, %cst [1] : vector<8x32xf32> to vector<8xf32>
    %4 = vector.shape_cast %3 : vector<8xf32> to vector<8x1xf32>
    %cst_5 = arith.constant 3.200000e+01 : f32
    %5 = vector.broadcast %cst_5 : f32 to vector<8x1xf32>
    %6 = arith.divf %4, %5 : vector<8x1xf32>
    %7 = vector.broadcast %6 : vector<8x1xf32> to vector<8x32xf32>
    %8 = arith.subf %0, %7 : vector<8x32xf32>
    %9 = arith.mulf %8, %8 : vector<8x32xf32>
    %cst_6 = arith.constant dense<0.000000e+00> : vector<8xf32>
    %10 = vector.multi_reduction <add>, %9, %cst_6 [1] : vector<8x32xf32> to vector<8xf32>
    %11 = vector.shape_cast %10 : vector<8xf32> to vector<8x1xf32>
    %cst_7 = arith.constant 3.200000e+01 : f32
    %12 = vector.broadcast %cst_7 : f32 to vector<8x1xf32>
    %13 = arith.divf %11, %12 : vector<8x1xf32>
    %cst_8 = arith.constant 9.99999974E-6 : f32
    %14 = vector.broadcast %cst_8 : f32 to vector<8x1xf32>
    %15 = arith.addf %13, %14 : vector<8x1xf32>
    %16 = math.rsqrt %15 : vector<8x1xf32>
    %17 = vector.broadcast %16 : vector<8x1xf32> to vector<8x32xf32>
    %18 = arith.mulf %8, %17 : vector<8x32xf32>
    %19 = vector.broadcast %1 : vector<1x32xf32> to vector<8x32xf32>
    %20 = arith.mulf %18, %19 : vector<8x32xf32>
    %21 = vector.broadcast %2 : vector<1x32xf32> to vector<8x32xf32>
    %22 = arith.addf %20, %21 : vector<8x32xf32>
    %23 = arith.truncf %22 : vector<8x32xf32> to vector<8x32xbf16>
    %c0_9 = arith.constant 0 : index
    %c0_10 = arith.constant 0 : index
    %24 = vector.load %arg5[%c0_9, %c0_10] : memref<32x96xbf16, #tpu.memory_space<vmem>>, vector<32x96xbf16>
    %cst_11 = arith.constant dense<0.000000e+00> : vector<8x96xf32>
    %25 = tpu.matmul %23, %24, %cst_11 {dimension_numbers = #tpu.dot_dimension_numbers<[1], [0], [0], [1], [0, 0, 1, 1], [], []>} : vector<8x32xbf16>, vector<32x96xbf16>, vector<8x96xf32> -> vector<8x96xf32>
    %c0_12 = arith.constant 0 : index
    %c0_13 = arith.constant 0 : index
    %26 = vector.load %arg6[%c0_12, %c0_13] : memref<1x96xf32, #tpu.memory_space<vmem>>, vector<1x96xf32>
    %27 = vector.broadcast %26 : vector<1x96xf32> to vector<8x96xf32>
    %28 = arith.addf %25, %27 : vector<8x96xf32>
    %c0_14 = arith.constant 0 : index
    %c0_15 = arith.constant 0 : index
    %29 = vector.load %arg7[%c0_14, %c0_15] : memref<8x96xf32, #tpu.memory_space<vmem>>, vector<8x96xf32>
    tpu.vector_store %arg7[%c0_14, %c0_15], %28 {strides = array<i32>} : memref<8x96xf32, #tpu.memory_space<vmem>>, vector<8x96xf32>,
    return
  }
  func.func @transform_0(%arg0: i32, %arg1: i32) -> (i32, i32) {
    %c0_i32 = arith.constant 0 : i32
    %c0_i32_0 = arith.constant 0 : i32
    return %arg0, %c0_i32 : i32, i32
  }
  func.func @transform_1(%arg0: i32, %arg1: i32) -> (i32, i32) {
    %c0_i32 = arith.constant 0 : i32
    %c0_i32_0 = arith.constant 0 : i32
    %c0_i32_1 = arith.constant 0 : i32
    return %c0_i32, %c0_i32_0 : i32, i32
  }
  func.func @transform_2(%arg0: i32, %arg1: i32) -> (i32, i32) {
    %c0_i32 = arith.constant 0 : i32
    %c0_i32_0 = arith.constant 0 : i32
    %c0_i32_1 = arith.constant 0 : i32
    return %c0_i32, %c0_i32_0 : i32, i32
  }
  func.func @transform_3(%arg0: i32, %arg1: i32) -> (i32, i32) {
    %c0_i32 = arith.constant 0 : i32
    %c0_i32_0 = arith.constant 0 : i32
    return %c0_i32, %arg1 : i32, i32
  }
  func.func @transform_4(%arg0: i32, %arg1: i32) -> (i32, i32) {
    %c0_i32 = arith.constant 0 : i32
    %c0_i32_0 = arith.constant 0 : i32
    return %c0_i32, %arg1 : i32, i32
  }
  func.func @transform_5(%arg0: i32, %arg1: i32) -> (i32, i32) {
    %c0_i32 = arith.constant 0 : i32
    return %arg0, %arg1 : i32, i32
  }
}

module attributes {stable_mosaic.version = 11 : i64} {
  func.func @_mha_kernel(%arg0: i32, %arg1: memref<1x4x8x8xf32, #tpu.memory_space<vmem>>, %arg2: memref<1x4x8x8xf32, #tpu.memory_space<vmem>>, %arg3: memref<1x4x8x8xf32, #tpu.memory_space<vmem>>, %arg4: memref<8x8xf32, #tpu.memory_space<vmem>>, %arg5: memref<8x8xf32, #tpu.memory_space<vmem>>, %arg6: memref<1x4x8x8xf32, #tpu.memory_space<vmem>>) attributes {dimension_semantics = [#tpu.dimension_semantics<parallel>], iteration_bounds = array<i64: 2>, scalar_prefetch = 0 : i64, scratch_operands = 0 : i64, tpu.core_type = #tpu.core_type<tc>, window_params = [{transform_indices = @transform_0, window_bounds = array<i64: 1, 4, 8, 8>}, {transform_indices = @transform_1, window_bounds = array<i64: 1, 4, 8, 8>}, {transform_indices = @transform_2, window_bounds = array<i64: 1, 4, 8, 8>}, {pipeline_mode = #tpu.pipeline_mode<synchronous>, transform_indices = @transform_3, window_bounds = array<i64: 8, 8>}, {pipeline_mode = #tpu.pipeline_mode<synchronous>, transform_indices = @transform_4, window_bounds = array<i64: 8, 8>}, {transform_indices = @transform_5, window_bounds = array<i64: 1, 4, 8, 8>}]} {
    %c0 = arith.constant 0 : index
    %c0_0 = arith.constant 0 : index
    %0 = vector.load %arg4[%c0, %c0_0] : memref<8x8xf32, #tpu.memory_space<vmem>>, vector<8x8xf32>
    %c0_1 = arith.constant 0 : index
    %c0_2 = arith.constant 0 : index
    %1 = vector.load %arg5[%c0_1, %c0_2] : memref<8x8xf32, #tpu.memory_space<vmem>>, vector<8x8xf32>
    %c0_3 = arith.constant 0 : index
    %c0_4 = arith.constant 0 : index
    %c0_5 = arith.constant 0 : index
    %c0_6 = arith.constant 0 : index
    %2 = vector.load %arg1[%c0_3, %c0_4, %c0_5, %c0_6] : memref<1x4x8x8xf32, #tpu.memory_space<vmem>>, vector<1x4x8x8xf32>
    %3 = vector.shape_cast %2 : vector<1x4x8x8xf32> to vector<4x8x8xf32>
    %4 = vector.extract_strided_slice %3 {offsets = [0, 0, 4], sizes = [4, 8, 4], strides = [1, 1, 1]} : vector<4x8x8xf32> to vector<4x8x4xf32>
    %cst = arith.constant 0.000000e+00 : f32
    %5 = vector.broadcast %cst : f32 to vector<4x8x4xf32>
    %6 = arith.subf %5, %4 : vector<4x8x4xf32>
    %7 = vector.extract_strided_slice %3 {offsets = [0, 0, 0], sizes = [4, 8, 4], strides = [1, 1, 1]} : vector<4x8x8xf32> to vector<4x8x4xf32>
    %8 = tpu.concatenate %6, %7 in 2 : vector<4x8x4xf32>, vector<4x8x4xf32> -> vector<4x8x8xf32>
    %9 = vector.shape_cast %0 : vector<8x8xf32> to vector<1x8x8xf32>
    %10 = vector.broadcast %9 : vector<1x8x8xf32> to vector<4x8x8xf32>
    %11 = arith.mulf %3, %10 : vector<4x8x8xf32>
    %12 = vector.shape_cast %1 : vector<8x8xf32> to vector<1x8x8xf32>
    %13 = vector.broadcast %12 : vector<1x8x8xf32> to vector<4x8x8xf32>
    %14 = arith.mulf %8, %13 : vector<4x8x8xf32>
    %15 = arith.addf %11, %14 : vector<4x8x8xf32>
    %c0_7 = arith.constant 0 : index
    %c0_8 = arith.constant 0 : index
    %c0_9 = arith.constant 0 : index
    %c0_10 = arith.constant 0 : index
    %16 = vector.load %arg2[%c0_7, %c0_8, %c0_9, %c0_10] : memref<1x4x8x8xf32, #tpu.memory_space<vmem>>, vector<1x4x8x8xf32>
    %17 = vector.shape_cast %16 : vector<1x4x8x8xf32> to vector<4x8x8xf32>
    %18 = vector.extract_strided_slice %17 {offsets = [0, 0, 4], sizes = [4, 8, 4], strides = [1, 1, 1]} : vector<4x8x8xf32> to vector<4x8x4xf32>
    %cst_11 = arith.constant 0.000000e+00 : f32
    %19 = vector.broadcast %cst_11 : f32 to vector<4x8x4xf32>
    %20 = arith.subf %19, %18 : vector<4x8x4xf32>
    %21 = vector.extract_strided_slice %17 {offsets = [0, 0, 0], sizes = [4, 8, 4], strides = [1, 1, 1]} : vector<4x8x8xf32> to vector<4x8x4xf32>
    %22 = tpu.concatenate %20, %21 in 2 : vector<4x8x4xf32>, vector<4x8x4xf32> -> vector<4x8x8xf32>
    %23 = vector.shape_cast %0 : vector<8x8xf32> to vector<1x8x8xf32>
    %24 = vector.broadcast %23 : vector<1x8x8xf32> to vector<4x8x8xf32>
    %25 = arith.mulf %17, %24 : vector<4x8x8xf32>
    %26 = vector.shape_cast %1 : vector<8x8xf32> to vector<1x8x8xf32>
    %27 = vector.broadcast %26 : vector<1x8x8xf32> to vector<4x8x8xf32>
    %28 = arith.mulf %22, %27 : vector<4x8x8xf32>
    %29 = arith.addf %25, %28 : vector<4x8x8xf32>
    %30 = arith.truncf %15 : vector<4x8x8xf32> to vector<4x8x8xbf16>
    %31 = arith.truncf %29 : vector<4x8x8xf32> to vector<4x8x8xbf16>
    "tpu.trace_start"() <{level = 10 : i32, message = "htd,hsd->hts"}> : () -> ()
    %cst_12 = arith.constant dense<0.000000e+00> : vector<4x8x8xf32>
    %32 = tpu.matmul %30, %31, %cst_12 {dimension_numbers = #tpu.dot_dimension_numbers<[2], [2], [1], [1], [0, 0, 0, 1, 1, 1], [0], [0]>} : vector<4x8x8xbf16>, vector<4x8x8xbf16>, vector<4x8x8xf32> -> vector<4x8x8xf32>
    "tpu.trace_stop"() : () -> ()
    %cst_13 = arith.constant 0.353553385 : f32
    %33 = vector.broadcast %cst_13 : f32 to vector<4x8x8xf32>
    %34 = arith.mulf %32, %33 : vector<4x8x8xf32>
    %35 = tpu.iota {dimensions = array<i32: 0>} : vector<8x8xi32>
    %36 = tpu.iota {dimensions = array<i32: 1>} : vector<8x8xi32>
    %37 = arith.cmpi sgt, %35, %36 : vector<8x8xi32>
    %c0_i32 = arith.constant 0 : i32
    %38 = vector.broadcast %c0_i32 : i32 to vector<8x8xi32>
    %39 = arith.cmpi eq, %36, %38 : vector<8x8xi32>
    %40 = arith.ori %37, %39 : vector<8x8xi1>
    %cst_14 = arith.constant -1.000000e+30 : f32
    %41 = vector.shape_cast %40 : vector<8x8xi1> to vector<1x8x8xi1>
    %42 = vector.broadcast %41 : vector<1x8x8xi1> to vector<4x8x8xi1>
    %43 = vector.broadcast %cst_14 : f32 to vector<4x8x8xf32>
    %44 = arith.select %42, %34, %43 : vector<4x8x8xi1>, vector<4x8x8xf32>
    %cst_15 = arith.constant dense<0xFF800000> : vector<4x8xf32>
    %45 = vector.multi_reduction <maximumf>, %44, %cst_15 [2] : vector<4x8x8xf32> to vector<4x8xf32>
    %46 = vector.shape_cast %45 : vector<4x8xf32> to vector<4x8x1xf32>
    %47 = vector.broadcast %46 : vector<4x8x1xf32> to vector<4x8x8xf32>
    %48 = arith.subf %44, %47 : vector<4x8x8xf32>
    %49 = math.exp %48 : vector<4x8x8xf32>
    %cst_16 = arith.constant dense<0.000000e+00> : vector<4x8xf32>
    %50 = vector.multi_reduction <add>, %49, %cst_16 [2] : vector<4x8x8xf32> to vector<4x8xf32>
    %51 = vector.shape_cast %50 : vector<4x8xf32> to vector<4x8x1xf32>
    %52 = tpu.reciprocal %51 {approx = true} : vector<4x8x1xf32> -> vector<4x8x1xf32>
    %53 = vector.broadcast %52 : vector<4x8x1xf32> to vector<4x8x8xf32>
    %54 = arith.mulf %49, %53 : vector<4x8x8xf32>
    %55 = arith.truncf %54 : vector<4x8x8xf32> to vector<4x8x8xbf16>
    %c0_17 = arith.constant 0 : index
    %c0_18 = arith.constant 0 : index
    %c0_19 = arith.constant 0 : index
    %c0_20 = arith.constant 0 : index
    %56 = vector.load %arg3[%c0_17, %c0_18, %c0_19, %c0_20] : memref<1x4x8x8xf32, #tpu.memory_space<vmem>>, vector<1x4x8x8xf32>
    %57 = vector.shape_cast %56 : vector<1x4x8x8xf32> to vector<4x8x8xf32>
    %58 = arith.truncf %57 : vector<4x8x8xf32> to vector<4x8x8xbf16>
    "tpu.trace_start"() <{level = 10 : i32, message = "hts,hsd->htd"}> : () -> ()
    %cst_21 = arith.constant dense<0.000000e+00> : vector<4x8x8xf32>
    %59 = tpu.matmul %55, %58, %cst_21 {dimension_numbers = #tpu.dot_dimension_numbers<[2], [1], [1], [2], [0, 0, 0, 1, 1, 2], [0], [0]>} : vector<4x8x8xbf16>, vector<4x8x8xbf16>, vector<4x8x8xf32> -> vector<4x8x8xf32>
    "tpu.trace_stop"() : () -> ()
    %c0_22 = arith.constant 0 : index
    %c0_23 = arith.constant 0 : index
    %c0_24 = arith.constant 0 : index
    %c0_25 = arith.constant 0 : index
    %60 = vector.load %arg6[%c0_22, %c0_23, %c0_24, %c0_25] : memref<1x4x8x8xf32, #tpu.memory_space<vmem>>, vector<1x4x8x8xf32>
    %61 = vector.shape_cast %60 : vector<1x4x8x8xf32> to vector<4x8x8xf32>
    %62 = vector.shape_cast %59 : vector<4x8x8xf32> to vector<1x4x8x8xf32>
    tpu.vector_store %arg6[%c0_22, %c0_23, %c0_24, %c0_25], %62 {strides = array<i32>} : memref<1x4x8x8xf32, #tpu.memory_space<vmem>>, vector<1x4x8x8xf32>,
    return
  }
  func.func @transform_0(%arg0: i32) -> (i32, i32, i32, i32) {
    %c0_i32 = arith.constant 0 : i32
    %c0_i32_0 = arith.constant 0 : i32
    %c0_i32_1 = arith.constant 0 : i32
    %c0_i32_2 = arith.constant 0 : i32
    return %arg0, %c0_i32, %c0_i32_0, %c0_i32_1 : i32, i32, i32, i32
  }
  func.func @transform_1(%arg0: i32) -> (i32, i32, i32, i32) {
    %c0_i32 = arith.constant 0 : i32
    %c0_i32_0 = arith.constant 0 : i32
    %c0_i32_1 = arith.constant 0 : i32
    %c0_i32_2 = arith.constant 0 : i32
    return %arg0, %c0_i32, %c0_i32_0, %c0_i32_1 : i32, i32, i32, i32
  }
  func.func @transform_2(%arg0: i32) -> (i32, i32, i32, i32) {
    %c0_i32 = arith.constant 0 : i32
    %c0_i32_0 = arith.constant 0 : i32
    %c0_i32_1 = arith.constant 0 : i32
    %c0_i32_2 = arith.constant 0 : i32
    return %arg0, %c0_i32, %c0_i32_0, %c0_i32_1 : i32, i32, i32, i32
  }
  func.func @transform_3(%arg0: i32) -> (i32, i32) {
    %c0_i32 = arith.constant 0 : i32
    %c0_i32_0 = arith.constant 0 : i32
    %c0_i32_1 = arith.constant 0 : i32
    return %c0_i32, %c0_i32_0 : i32, i32
  }
  func.func @transform_4(%arg0: i32) -> (i32, i32) {
    %c0_i32 = arith.constant 0 : i32
    %c0_i32_0 = arith.constant 0 : i32
    %c0_i32_1 = arith.constant 0 : i32
    return %c0_i32, %c0_i32_0 : i32, i32
  }
  func.func @transform_5(%arg0: i32) -> (i32, i32, i32, i32) {
    %c0_i32 = arith.constant 0 : i32
    %c0_i32_0 = arith.constant 0 : i32
    %c0_i32_1 = arith.constant 0 : i32
    %c0_i32_2 = arith.constant 0 : i32
    return %arg0, %c0_i32, %c0_i32_0, %c0_i32_1 : i32, i32, i32, i32
  }
}

module attributes {stable_mosaic.version = 11 : i64} {
  func.func @_linear_kernel(%arg0: i32, %arg1: i32, %arg2: memref<8x32xf32, #tpu.memory_space<vmem>>, %arg3: memref<32x64xbf16, #tpu.memory_space<vmem>>, %arg4: memref<1x64xf32, #tpu.memory_space<vmem>>, %arg5: memref<8x64xf32, #tpu.memory_space<vmem>>) attributes {dimension_semantics = [#tpu.dimension_semantics<parallel>, #tpu.dimension_semantics<parallel>], iteration_bounds = array<i64: 2, 1>, scalar_prefetch = 0 : i64, scratch_operands = 0 : i64, tpu.core_type = #tpu.core_type<tc>, window_params = [{transform_indices = @transform_0, window_bounds = array<i64: 8, 32>}, {transform_indices = @transform_1, window_bounds = array<i64: 32, 64>}, {transform_indices = @transform_2, window_bounds = array<i64: 1, 64>}, {transform_indices = @transform_3, window_bounds = array<i64: 8, 64>}]} {
    %c0 = arith.constant 0 : index
    %c0_0 = arith.constant 0 : index
    %0 = vector.load %arg2[%c0, %c0_0] : memref<8x32xf32, #tpu.memory_space<vmem>>, vector<8x32xf32>
    %1 = arith.truncf %0 : vector<8x32xf32> to vector<8x32xbf16>
    %c0_1 = arith.constant 0 : index
    %c0_2 = arith.constant 0 : index
    %2 = vector.load %arg3[%c0_1, %c0_2] : memref<32x64xbf16, #tpu.memory_space<vmem>>, vector<32x64xbf16>
    %cst = arith.constant dense<0.000000e+00> : vector<8x64xf32>
    %3 = tpu.matmul %1, %2, %cst {dimension_numbers = #tpu.dot_dimension_numbers<[1], [0], [0], [1], [0, 0, 1, 1], [], []>} : vector<8x32xbf16>, vector<32x64xbf16>, vector<8x64xf32> -> vector<8x64xf32>
    %c0_3 = arith.constant 0 : index
    %c0_4 = arith.constant 0 : index
    %4 = vector.load %arg4[%c0_3, %c0_4] : memref<1x64xf32, #tpu.memory_space<vmem>>, vector<1x64xf32>
    %5 = vector.broadcast %4 : vector<1x64xf32> to vector<8x64xf32>
    %6 = arith.addf %3, %5 : vector<8x64xf32>
    %c0_5 = arith.constant 0 : index
    %c0_6 = arith.constant 0 : index
    %7 = vector.load %arg5[%c0_5, %c0_6] : memref<8x64xf32, #tpu.memory_space<vmem>>, vector<8x64xf32>
    tpu.vector_store %arg5[%c0_5, %c0_6], %6 {strides = array<i32>} : memref<8x64xf32, #tpu.memory_space<vmem>>, vector<8x64xf32>,
    return
  }
  func.func @transform_0(%arg0: i32, %arg1: i32) -> (i32, i32) {
    %c0_i32 = arith.constant 0 : i32
    %c0_i32_0 = arith.constant 0 : i32
    return %arg0, %c0_i32 : i32, i32
  }
  func.func @transform_1(%arg0: i32, %arg1: i32) -> (i32, i32) {
    %c0_i32 = arith.constant 0 : i32
    %c0_i32_0 = arith.constant 0 : i32
    return %c0_i32, %arg1 : i32, i32
  }
  func.func @transform_2(%arg0: i32, %arg1: i32) -> (i32, i32) {
    %c0_i32 = arith.constant 0 : i32
    %c0_i32_0 = arith.constant 0 : i32
    return %c0_i32, %arg1 : i32, i32
  }
  func.func @transform_3(%arg0: i32, %arg1: i32) -> (i32, i32) {
    %c0_i32 = arith.constant 0 : i32
    return %arg0, %arg1 : i32, i32
  }
}

module attributes {stable_mosaic.version = 11 : i64} {
  func.func @_ln_linear_kernel(%arg0: i32, %arg1: i32, %arg2: memref<8x32xf32, #tpu.memory_space<vmem>>, %arg3: memref<1x32xf32, #tpu.memory_space<vmem>>, %arg4: memref<1x32xf32, #tpu.memory_space<vmem>>, %arg5: memref<32x32xbf16, #tpu.memory_space<vmem>>, %arg6: memref<1x32xf32, #tpu.memory_space<vmem>>, %arg7: memref<8x32xf32, #tpu.memory_space<vmem>>) attributes {dimension_semantics = [#tpu.dimension_semantics<parallel>, #tpu.dimension_semantics<parallel>], iteration_bounds = array<i64: 2, 1>, scalar_prefetch = 0 : i64, scratch_operands = 0 : i64, tpu.core_type = #tpu.core_type<tc>, window_params = [{transform_indices = @transform_0, window_bounds = array<i64: 8, 32>}, {pipeline_mode = #tpu.pipeline_mode<synchronous>, transform_indices = @transform_1, window_bounds = array<i64: 1, 32>}, {pipeline_mode = #tpu.pipeline_mode<synchronous>, transform_indices = @transform_2, window_bounds = array<i64: 1, 32>}, {transform_indices = @transform_3, window_bounds = array<i64: 32, 32>}, {transform_indices = @transform_4, window_bounds = array<i64: 1, 32>}, {transform_indices = @transform_5, window_bounds = array<i64: 8, 32>}]} {
    %c0 = arith.constant 0 : index
    %c0_0 = arith.constant 0 : index
    %0 = vector.load %arg2[%c0, %c0_0] : memref<8x32xf32, #tpu.memory_space<vmem>>, vector<8x32xf32>
    %c0_1 = arith.constant 0 : index
    %c0_2 = arith.constant 0 : index
    %1 = vector.load %arg3[%c0_1, %c0_2] : memref<1x32xf32, #tpu.memory_space<vmem>>, vector<1x32xf32>
    %c0_3 = arith.constant 0 : index
    %c0_4 = arith.constant 0 : index
    %2 = vector.load %arg4[%c0_3, %c0_4] : memref<1x32xf32, #tpu.memory_space<vmem>>, vector<1x32xf32>
    %cst = arith.constant dense<0.000000e+00> : vector<8xf32>
    %3 = vector.multi_reduction <add>, %0, %cst [1] : vector<8x32xf32> to vector<8xf32>
    %4 = vector.shape_cast %3 : vector<8xf32> to vector<8x1xf32>
    %cst_5 = arith.constant 3.200000e+01 : f32
    %5 = vector.broadcast %cst_5 : f32 to vector<8x1xf32>
    %6 = arith.divf %4, %5 : vector<8x1xf32>
    %7 = vector.broadcast %6 : vector<8x1xf32> to vector<8x32xf32>
    %8 = arith.subf %0, %7 : vector<8x32xf32>
    %9 = arith.mulf %8, %8 : vector<8x32xf32>
    %cst_6 = arith.constant dense<0.000000e+00> : vector<8xf32>
    %10 = vector.multi_reduction <add>, %9, %cst_6 [1] : vector<8x32xf32> to vector<8xf32>
    %11 = vector.shape_cast %10 : vector<8xf32> to vector<8x1xf32>
    %cst_7 = arith.constant 3.200000e+01 : f32
    %12 = vector.broadcast %cst_7 : f32 to vector<8x1xf32>
    %13 = arith.divf %11, %12 : vector<8x1xf32>
    %cst_8 = arith.constant 9.99999974E-6 : f32
    %14 = vector.broadcast %cst_8 : f32 to vector<8x1xf32>
    %15 = arith.addf %13, %14 : vector<8x1xf32>
    %16 = math.rsqrt %15 : vector<8x1xf32>
    %17 = vector.broadcast %16 : vector<8x1xf32> to vector<8x32xf32>
    %18 = arith.mulf %8, %17 : vector<8x32xf32>
    %19 = vector.broadcast %1 : vector<1x32xf32> to vector<8x32xf32>
    %20 = arith.mulf %18, %19 : vector<8x32xf32>
    %21 = vector.broadcast %2 : vector<1x32xf32> to vector<8x32xf32>
    %22 = arith.addf %20, %21 : vector<8x32xf32>
    %23 = arith.truncf %22 : vector<8x32xf32> to vector<8x32xbf16>
    %c0_9 = arith.constant 0 : index
    %c0_10 = arith.constant 0 : index
    %24 = vector.load %arg5[%c0_9, %c0_10] : memref<32x32xbf16, #tpu.memory_space<vmem>>, vector<32x32xbf16>
    %cst_11 = arith.constant dense<0.000000e+00> : vector<8x32xf32>
    %25 = tpu.matmul %23, %24, %cst_11 {dimension_numbers = #tpu.dot_dimension_numbers<[1], [0], [0], [1], [0, 0, 1, 1], [], []>} : vector<8x32xbf16>, vector<32x32xbf16>, vector<8x32xf32> -> vector<8x32xf32>
    %c0_12 = arith.constant 0 : index
    %c0_13 = arith.constant 0 : index
    %26 = vector.load %arg6[%c0_12, %c0_13] : memref<1x32xf32, #tpu.memory_space<vmem>>, vector<1x32xf32>
    %27 = vector.broadcast %26 : vector<1x32xf32> to vector<8x32xf32>
    %28 = arith.addf %25, %27 : vector<8x32xf32>
    %c0_14 = arith.constant 0 : index
    %c0_15 = arith.constant 0 : index
    %29 = vector.load %arg7[%c0_14, %c0_15] : memref<8x32xf32, #tpu.memory_space<vmem>>, vector<8x32xf32>
    tpu.vector_store %arg7[%c0_14, %c0_15], %28 {strides = array<i32>} : memref<8x32xf32, #tpu.memory_space<vmem>>, vector<8x32xf32>,
    return
  }
  func.func @transform_0(%arg0: i32, %arg1: i32) -> (i32, i32) {
    %c0_i32 = arith.constant 0 : i32
    %c0_i32_0 = arith.constant 0 : i32
    return %arg0, %c0_i32 : i32, i32
  }
  func.func @transform_1(%arg0: i32, %arg1: i32) -> (i32, i32) {
    %c0_i32 = arith.constant 0 : i32
    %c0_i32_0 = arith.constant 0 : i32
    %c0_i32_1 = arith.constant 0 : i32
    return %c0_i32, %c0_i32_0 : i32, i32
  }
  func.func @transform_2(%arg0: i32, %arg1: i32) -> (i32, i32) {
    %c0_i32 = arith.constant 0 : i32
    %c0_i32_0 = arith.constant 0 : i32
    %c0_i32_1 = arith.constant 0 : i32
    return %c0_i32, %c0_i32_0 : i32, i32
  }
  func.func @transform_3(%arg0: i32, %arg1: i32) -> (i32, i32) {
    %c0_i32 = arith.constant 0 : i32
    %c0_i32_0 = arith.constant 0 : i32
    return %c0_i32, %arg1 : i32, i32
  }
  func.func @transform_4(%arg0: i32, %arg1: i32) -> (i32, i32) {
    %c0_i32 = arith.constant 0 : i32
    %c0_i32_0 = arith.constant 0 : i32
    return %c0_i32, %arg1 : i32, i32
  }
  func.func @transform_5(%arg0: i32, %arg1: i32) -> (i32, i32) {
    %c0_i32 = arith.constant 0 : i32
    return %arg0, %arg1 : i32, i32
  }
}

module attributes {stable_mosaic.version = 11 : i64} {
  func.func @_lnf_lmhead_loss_kernel(%arg0: i32, %arg1: i32, %arg2: memref<8x32xf32, #tpu.memory_space<vmem>>, %arg3: memref<1x32xf32, #tpu.memory_space<vmem>>, %arg4: memref<1x32xf32, #tpu.memory_space<vmem>>, %arg5: memref<32x64xbf16, #tpu.memory_space<vmem>>, %arg6: memref<1x64xf32, #tpu.memory_space<vmem>>, %arg7: memref<8x1xi32, #tpu.memory_space<vmem>>, %arg8: memref<8x64xf32, #tpu.memory_space<vmem>>, %arg9: memref<8x1xf32, #tpu.memory_space<vmem>>, %arg10: memref<8x32xbf16, #tpu.memory_space<vmem>>, %arg11: memref<8x1xf32, #tpu.memory_space<vmem>>, %arg12: memref<8x1xf32, #tpu.memory_space<vmem>>, %arg13: memref<8x1xf32, #tpu.memory_space<vmem>>) attributes {dimension_semantics = [#tpu.dimension_semantics<parallel>, #tpu.dimension_semantics<arbitrary>], iteration_bounds = array<i64: 2, 1>, scalar_prefetch = 0 : i64, scratch_operands = 4 : i64, tpu.core_type = #tpu.core_type<tc>, window_params = [{transform_indices = @transform_0, window_bounds = array<i64: 8, 32>}, {pipeline_mode = #tpu.pipeline_mode<synchronous>, transform_indices = @transform_1, window_bounds = array<i64: 1, 32>}, {pipeline_mode = #tpu.pipeline_mode<synchronous>, transform_indices = @transform_2, window_bounds = array<i64: 1, 32>}, {transform_indices = @transform_3, window_bounds = array<i64: 32, 64>}, {transform_indices = @transform_4, window_bounds = array<i64: 1, 64>}, {transform_indices = @transform_5, window_bounds = array<i64: 8, 1>}, {transform_indices = @transform_6, window_bounds = array<i64: 8, 64>}, {transform_indices = @transform_7, window_bounds = array<i64: 8, 1>}]} {
    %c0_i32 = arith.constant 0 : i32
    %0 = arith.cmpi eq, %arg1, %c0_i32 : i32
    %1 = arith.extui %0 : i1 to i32
    %c0_i32_0 = arith.constant 0 : i32
    %2 = arith.cmpi ne, %1, %c0_i32_0 : i32
    scf.if %2 {
      %c0_30 = arith.constant 0 : index
      %c0_31 = arith.constant 0 : index
      %44 = vector.load %arg2[%c0_30, %c0_31] : memref<8x32xf32, #tpu.memory_space<vmem>>, vector<8x32xf32>
      %c0_32 = arith.constant 0 : index
      %c0_33 = arith.constant 0 : index
      %45 = vector.load %arg3[%c0_32, %c0_33] : memref<1x32xf32, #tpu.memory_space<vmem>>, vector<1x32xf32>
      %c0_34 = arith.constant 0 : index
      %c0_35 = arith.constant 0 : index
      %46 = vector.load %arg4[%c0_34, %c0_35] : memref<1x32xf32, #tpu.memory_space<vmem>>, vector<1x32xf32>
      %cst_36 = arith.constant dense<0.000000e+00> : vector<8xf32>
      %47 = vector.multi_reduction <add>, %44, %cst_36 [1] : vector<8x32xf32> to vector<8xf32>
      %48 = vector.shape_cast %47 : vector<8xf32> to vector<8x1xf32>
      %cst_37 = arith.constant 3.200000e+01 : f32
      %49 = vector.broadcast %cst_37 : f32 to vector<8x1xf32>
      %50 = arith.divf %48, %49 : vector<8x1xf32>
      %51 = vector.broadcast %50 : vector<8x1xf32> to vector<8x32xf32>
      %52 = arith.subf %44, %51 : vector<8x32xf32>
      %53 = arith.mulf %52, %52 : vector<8x32xf32>
      %cst_38 = arith.constant dense<0.000000e+00> : vector<8xf32>
      %54 = vector.multi_reduction <add>, %53, %cst_38 [1] : vector<8x32xf32> to vector<8xf32>
      %55 = vector.shape_cast %54 : vector<8xf32> to vector<8x1xf32>
      %cst_39 = arith.constant 3.200000e+01 : f32
      %56 = vector.broadcast %cst_39 : f32 to vector<8x1xf32>
      %57 = arith.divf %55, %56 : vector<8x1xf32>
      %cst_40 = arith.constant 9.99999974E-6 : f32
      %58 = vector.broadcast %cst_40 : f32 to vector<8x1xf32>
      %59 = arith.addf %57, %58 : vector<8x1xf32>
      %60 = math.rsqrt %59 : vector<8x1xf32>
      %61 = vector.broadcast %60 : vector<8x1xf32> to vector<8x32xf32>
      %62 = arith.mulf %52, %61 : vector<8x32xf32>
      %63 = vector.broadcast %45 : vector<1x32xf32> to vector<8x32xf32>
      %64 = arith.mulf %62, %63 : vector<8x32xf32>
      %65 = vector.broadcast %46 : vector<1x32xf32> to vector<8x32xf32>
      %66 = arith.addf %64, %65 : vector<8x32xf32>
      %67 = arith.truncf %66 : vector<8x32xf32> to vector<8x32xbf16>
      %c0_41 = arith.constant 0 : index
      %c0_42 = arith.constant 0 : index
      %68 = vector.load %arg10[%c0_41, %c0_42] : memref<8x32xbf16, #tpu.memory_space<vmem>>, vector<8x32xbf16>
      tpu.vector_store %arg10[%c0_41, %c0_42], %67 {strides = array<i32>} : memref<8x32xbf16, #tpu.memory_space<vmem>>, vector<8x32xbf16>,
      %cst_43 = arith.constant 0xFF800000 : f32
      %69 = vector.broadcast %cst_43 : f32 to vector<8x1xf32>
      %c0_44 = arith.constant 0 : index
      %c0_45 = arith.constant 0 : index
      %70 = vector.load %arg11[%c0_44, %c0_45] : memref<8x1xf32, #tpu.memory_space<vmem>>, vector<8x1xf32>
      tpu.vector_store %arg11[%c0_44, %c0_45], %69 {strides = array<i32>} : memref<8x1xf32, #tpu.memory_space<vmem>>, vector<8x1xf32>,
      %cst_46 = arith.constant 0.000000e+00 : f32
      %71 = vector.broadcast %cst_46 : f32 to vector<8x1xf32>
      %c0_47 = arith.constant 0 : index
      %c0_48 = arith.constant 0 : index
      %72 = vector.load %arg12[%c0_47, %c0_48] : memref<8x1xf32, #tpu.memory_space<vmem>>, vector<8x1xf32>
      tpu.vector_store %arg12[%c0_47, %c0_48], %71 {strides = array<i32>} : memref<8x1xf32, #tpu.memory_space<vmem>>, vector<8x1xf32>,
      %cst_49 = arith.constant 0.000000e+00 : f32
      %73 = vector.broadcast %cst_49 : f32 to vector<8x1xf32>
      %c0_50 = arith.constant 0 : index
      %c0_51 = arith.constant 0 : index
      %74 = vector.load %arg13[%c0_50, %c0_51] : memref<8x1xf32, #tpu.memory_space<vmem>>, vector<8x1xf32>
      tpu.vector_store %arg13[%c0_50, %c0_51], %73 {strides = array<i32>} : memref<8x1xf32, #tpu.memory_space<vmem>>, vector<8x1xf32>,
    } else {
    }
    %c0 = arith.constant 0 : index
    %c0_1 = arith.constant 0 : index
    %3 = vector.load %arg10[%c0, %c0_1] : memref<8x32xbf16, #tpu.memory_space<vmem>>, vector<8x32xbf16>
    %c0_2 = arith.constant 0 : index
    %c0_3 = arith.constant 0 : index
    %4 = vector.load %arg5[%c0_2, %c0_3] : memref<32x64xbf16, #tpu.memory_space<vmem>>, vector<32x64xbf16>
    %cst = arith.constant dense<0.000000e+00> : vector<8x64xf32>
    %5 = tpu.matmul %3, %4, %cst {dimension_numbers = #tpu.dot_dimension_numbers<[1], [0], [0], [1], [0, 0, 1, 1], [], []>} : vector<8x32xbf16>, vector<32x64xbf16>, vector<8x64xf32> -> vector<8x64xf32>
    %c0_4 = arith.constant 0 : index
    %c0_5 = arith.constant 0 : index
    %6 = vector.load %arg6[%c0_4, %c0_5] : memref<1x64xf32, #tpu.memory_space<vmem>>, vector<1x64xf32>
    %7 = vector.broadcast %6 : vector<1x64xf32> to vector<8x64xf32>
    %8 = arith.addf %5, %7 : vector<8x64xf32>
    %c0_6 = arith.constant 0 : index
    %c0_7 = arith.constant 0 : index
    %9 = vector.load %arg8[%c0_6, %c0_7] : memref<8x64xf32, #tpu.memory_space<vmem>>, vector<8x64xf32>
    tpu.vector_store %arg8[%c0_6, %c0_7], %8 {strides = array<i32>} : memref<8x64xf32, #tpu.memory_space<vmem>>, vector<8x64xf32>,
    %c0_8 = arith.constant 0 : index
    %c0_9 = arith.constant 0 : index
    %10 = vector.load %arg11[%c0_8, %c0_9] : memref<8x1xf32, #tpu.memory_space<vmem>>, vector<8x1xf32>
    %cst_10 = arith.constant dense<0xFF800000> : vector<8xf32>
    %11 = vector.multi_reduction <maximumf>, %8, %cst_10 [1] : vector<8x64xf32> to vector<8xf32>
    %12 = vector.shape_cast %11 : vector<8xf32> to vector<8x1xf32>
    %13 = arith.maximumf %10, %12 : vector<8x1xf32>
    %c0_11 = arith.constant 0 : index
    %c0_12 = arith.constant 0 : index
    %14 = vector.load %arg12[%c0_11, %c0_12] : memref<8x1xf32, #tpu.memory_space<vmem>>, vector<8x1xf32>
    %c0_13 = arith.constant 0 : index
    %c0_14 = arith.constant 0 : index
    %15 = vector.load %arg11[%c0_13, %c0_14] : memref<8x1xf32, #tpu.memory_space<vmem>>, vector<8x1xf32>
    %16 = arith.subf %15, %13 : vector<8x1xf32>
    %17 = math.exp %16 : vector<8x1xf32>
    %18 = arith.mulf %14, %17 : vector<8x1xf32>
    %19 = vector.broadcast %13 : vector<8x1xf32> to vector<8x64xf32>
    %20 = arith.subf %8, %19 : vector<8x64xf32>
    %21 = math.exp %20 : vector<8x64xf32>
    %cst_15 = arith.constant dense<0.000000e+00> : vector<8xf32>
    %22 = vector.multi_reduction <add>, %21, %cst_15 [1] : vector<8x64xf32> to vector<8xf32>
    %23 = vector.shape_cast %22 : vector<8xf32> to vector<8x1xf32>
    %24 = arith.addf %18, %23 : vector<8x1xf32>
    %c0_16 = arith.constant 0 : index
    %c0_17 = arith.constant 0 : index
    %25 = vector.load %arg12[%c0_16, %c0_17] : memref<8x1xf32, #tpu.memory_space<vmem>>, vector<8x1xf32>
    tpu.vector_store %arg12[%c0_16, %c0_17], %24 {strides = array<i32>} : memref<8x1xf32, #tpu.memory_space<vmem>>, vector<8x1xf32>,
    %c0_18 = arith.constant 0 : index
    %c0_19 = arith.constant 0 : index
    %26 = vector.load %arg11[%c0_18, %c0_19] : memref<8x1xf32, #tpu.memory_space<vmem>>, vector<8x1xf32>
    tpu.vector_store %arg11[%c0_18, %c0_19], %13 {strides = array<i32>} : memref<8x1xf32, #tpu.memory_space<vmem>>, vector<8x1xf32>,
    %c64_i32 = arith.constant 64 : i32
    %27 = arith.muli %arg1, %c64_i32 : i32
    %28 = tpu.iota {dimensions = array<i32: 1>} : vector<8x64xi32>
    %29 = vector.broadcast %27 : i32 to vector<8x64xi32>
    %30 = arith.addi %29, %28 : vector<8x64xi32>
    %c0_20 = arith.constant 0 : index
    %c0_21 = arith.constant 0 : index
    %31 = vector.load %arg13[%c0_20, %c0_21] : memref<8x1xf32, #tpu.memory_space<vmem>>, vector<8x1xf32>
    %c0_22 = arith.constant 0 : index
    %c0_23 = arith.constant 0 : index
    %32 = vector.load %arg7[%c0_22, %c0_23] : memref<8x1xi32, #tpu.memory_space<vmem>>, vector<8x1xi32>
    %33 = vector.broadcast %32 : vector<8x1xi32> to vector<8x64xi32>
    %34 = arith.cmpi eq, %30, %33 : vector<8x64xi32>
    %cst_24 = arith.constant 0.000000e+00 : f32
    %35 = vector.broadcast %cst_24 : f32 to vector<8x64xf32>
    %36 = arith.select %34, %8, %35 : vector<8x64xi1>, vector<8x64xf32>
    %cst_25 = arith.constant dense<0.000000e+00> : vector<8xf32>
    %37 = vector.multi_reduction <add>, %36, %cst_25 [1] : vector<8x64xf32> to vector<8xf32>
    %38 = vector.shape_cast %37 : vector<8xf32> to vector<8x1xf32>
    %39 = arith.addf %31, %38 : vector<8x1xf32>
    %c0_26 = arith.constant 0 : index
    %c0_27 = arith.constant 0 : index
    %40 = vector.load %arg13[%c0_26, %c0_27] : memref<8x1xf32, #tpu.memory_space<vmem>>, vector<8x1xf32>
    tpu.vector_store %arg13[%c0_26, %c0_27], %39 {strides = array<i32>} : memref<8x1xf32, #tpu.memory_space<vmem>>, vector<8x1xf32>,
    %c0_i32_28 = arith.constant 0 : i32
    %41 = arith.cmpi eq, %arg1, %c0_i32_28 : i32
    %42 = arith.extui %41 : i1 to i32
    %c0_i32_29 = arith.constant 0 : i32
    %43 = arith.cmpi ne, %42, %c0_i32_29 : i32
    scf.if %43 {
      %c0_30 = arith.constant 0 : index
      %c0_31 = arith.constant 0 : index
      %44 = vector.load %arg11[%c0_30, %c0_31] : memref<8x1xf32, #tpu.memory_space<vmem>>, vector<8x1xf32>
      %c0_32 = arith.constant 0 : index
      %c0_33 = arith.constant 0 : index
      %45 = vector.load %arg12[%c0_32, %c0_33] : memref<8x1xf32, #tpu.memory_space<vmem>>, vector<8x1xf32>
      %46 = math.log %45 : vector<8x1xf32>
      %47 = arith.addf %44, %46 : vector<8x1xf32>
      %c0_34 = arith.constant 0 : index
      %c0_35 = arith.constant 0 : index
      %48 = vector.load %arg13[%c0_34, %c0_35] : memref<8x1xf32, #tpu.memory_space<vmem>>, vector<8x1xf32>
      %49 = arith.subf %47, %48 : vector<8x1xf32>
      %c0_36 = arith.constant 0 : index
      %c0_37 = arith.constant 0 : index
      %50 = vector.load %arg9[%c0_36, %c0_37] : memref<8x1xf32, #tpu.memory_space<vmem>>, vector<8x1xf32>
      tpu.vector_store %arg9[%c0_36, %c0_37], %49 {strides = array<i32>} : memref<8x1xf32, #tpu.memory_space<vmem>>, vector<8x1xf32>,
    } else {
    }
    return
  }
  func.func @transform_0(%arg0: i32, %arg1: i32) -> (i32, i32) {
    %c0_i32 = arith.constant 0 : i32
    %c0_i32_0 = arith.constant 0 : i32
    return %arg0, %c0_i32 : i32, i32
  }
  func.func @transform_1(%arg0: i32, %arg1: i32) -> (i32, i32) {
    %c0_i32 = arith.constant 0 : i32
    %c0_i32_0 = arith.constant 0 : i32
    %c0_i32_1 = arith.constant 0 : i32
    return %c0_i32, %c0_i32_0 : i32, i32
  }
  func.func @transform_2(%arg0: i32, %arg1: i32) -> (i32, i32) {
    %c0_i32 = arith.constant 0 : i32
    %c0_i32_0 = arith.constant 0 : i32
    %c0_i32_1 = arith.constant 0 : i32
    return %c0_i32, %c0_i32_0 : i32, i32
  }
  func.func @transform_3(%arg0: i32, %arg1: i32) -> (i32, i32) {
    %c0_i32 = arith.constant 0 : i32
    %c0_i32_0 = arith.constant 0 : i32
    return %c0_i32, %arg1 : i32, i32
  }
  func.func @transform_4(%arg0: i32, %arg1: i32) -> (i32, i32) {
    %c0_i32 = arith.constant 0 : i32
    %c0_i32_0 = arith.constant 0 : i32
    return %c0_i32, %arg1 : i32, i32
  }
  func.func @transform_5(%arg0: i32, %arg1: i32) -> (i32, i32) {
    %c0_i32 = arith.constant 0 : i32
    %c0_i32_0 = arith.constant 0 : i32
    return %arg0, %c0_i32 : i32, i32
  }
  func.func @transform_6(%arg0: i32, %arg1: i32) -> (i32, i32) {
    %c0_i32 = arith.constant 0 : i32
    return %arg0, %arg1 : i32, i32
  }
  func.func @transform_7(%arg0: i32, %arg1: i32) -> (i32, i32) {
    %c0_i32 = arith.constant 0 : i32
    %c0_i32_0 = arith.constant 0 : i32
    return %arg0, %c0_i32 : i32, i32
  }
}

</mosaic_0001>

<bundles_post_ra>
// kernel: _lambda_.26
= control target key start
LH: loop header
LB: loop body
LE: loop exit
PB: predicated region body
PF: predicated region fallthrough
CT: control target
= control target key end

     0   :  { %8 = vsyncpa [#allocation3], 0  ;;  %s1004_s0 = inlined_call_operand.hbm [shape: f32[16,32], index: 0, kind: input, shape index: {}]   ;;  %s1005_s1 = inlined_call_operand.hbm [shape: bf16[32,64], index: 1, kind: input, shape index: {}]   ;;  %s1006_s2 = inlined_call_operand.hbm [shape: f32[1,64], index: 2, kind: input, shape index: {}]   ;;  %s1007_s3 = inlined_call_operand.hbm [shape: f32[16,64], index: 3, kind: output, shape index: {}]  }
   0x1   :  { %10 = vsyncpa [#allocation3 + $0x1], 0 }
   0x2   :  { %11 = vsyncpa [#allocation6], 0 }
   0x3   :  { %12 = vsyncpa [#allocation4], 0 }
   0x4   :  { %14 = vsyncpa [#allocation4 + $0x1], 0  ;;  %s753_s12 = smov 0   ;;  %s755_s13 = smov 0  }
   0x5   :  { %s757_s14 = smov 0   ;;  %s759_s15 = smov 0  }
   0x6   :  { %s761_s16 = smov 0   ;;  %s763_s17 = smov 0  }
   0x7 LB: > { %s430_s18 = sadd.s32 4294967295, %s723_s17   ;;  %s431_s19 = sadd.s32 4294967294, %s723_s17   ;;  %s723_s17 = sphi %s763_s17, %s20_s17   ;;  %s719_s16 = sphi %s761_s16, %s1029_s16   ;;  %s715_s15 = sphi %s759_s15, %s1028_s15   ;;  %s711_s14 = sphi %s757_s14, %s1027_s14   ;;  %s707_s13 = sphi %s755_s13, %s1026_s13   ;;  %s703_s12 = sphi %s753_s12, %s1025_s12  }
   0x8   : > { %p52_p0 = scmp.ne.s32.totalorder %s707_s13, %s703_s12  ;;  %p787_p1 = scmp.eq.s32.totalorder %s430_s18, 0 }
   0x9   : > { %p791_p2 = scmp.eq.s32.totalorder %s430_s18, 1  ;;  %p136_p3 = scmp.eq.s32.totalorder %s431_s19, 1 }
   0xa   : > { %s1012_s20 = scalar_select %p787_p1, 1, 0 }
   0xb   : > { %p797_p4 = por %p787_p1, %p52_p0  ;;  %p432_p5 = scmp.ge.s32.totalorder %s723_s17, 1 }
   0xc   : > { %p802_p6 = por %p136_p3, %p52_p0  ;;  %p143_p7 = scmp.lt.s32.totalorder %s723_s17, 3 }
   0xd   : > { %s1014_s22 = scalar_select %p797_p4, 1, 0 }
   0xe   : > { %s1015_s23 = scalar_select %p802_p6, 1, 0 }
   0xf   : > { %p807_p8 = pnand %p432_p5, %p143_p7  ;;  %s725_s25 = smov [#allocation5]  }
  0x10   : > { %s157_s26 = sshll.u32 %s725_s25, 4  ;;  %s726_s28 = smov [#allocation7]   ;;  %s811_s26 = int_to_ptr.vmem [resolvable:$true] %s157_s26 }
  0x11   : > { %p474_p9 = pneg %p807_p8  ;;  %s173_s29 = sshll.u32 %s726_s28, 4  ;;  %s822_s29 = int_to_ptr.vmem [resolvable:$true] %s173_s29 }
  0x12   : > { %s551_s5 = scalar_lea.hbm %s1005_s1, 256 }
  0x13   : > { %p818_p11 = pnand %p474_p9, %p787_p1  ;;  %p552_p12 = scmp.ne.s32.totalorder %s1005_s1, %s551_s5 }
  0x14   : > { %p558_p5 = scmp.lt.u32.totalorder %s551_s5, %s1005_s1 }
  0x15   : > { %p553_p13 = pneg %p818_p11 }
  0x17   : > { %p554_p0 = pnand %p553_p13, %p552_p12 }
  0x19   : > { %p555_p3 = pneg %p554_p0 }
  0x1b   : > { %p560_p7 = pnand %p558_p5, %p555_p3 }
  0x1d   : > { %563 = shalt.err (!%p560_p7)
}
  0x1e   : > { %s564_s10 = scalar_lea.vmem %s811_s26, 256  ;;  %p572_p1 = scmp.lt.s32.totalorder %s811_s26, %s811_s26 }
  0x1f   : > { %p565_p9 = scmp.ne.s32.totalorder %s811_s26, %s564_s10  ;;  %p573_p12 = scmp.lt.s32.totalorder %s564_s10, %s564_s10 }
  0x21   : > { %p567_p10 = pnand %p565_p9, %p553_p13  ;;  %p574_p0 = por %p573_p12, %p572_p1 }
  0x23   : > { %p568_p6 = pneg %p567_p10 }
  0x25   : > { %p575_p4 = pnand %p574_p0, %p568_p6 }
  0x27   : > { %578 = shalt.err (!%p575_p4)
}
  0x28   : > { %s727_s11 = smov 64   ;;  %s728_s18 = smov 4  }
  0x29   : > { %477 = dma.hbm_to_vmem [thread:$0]  (!%p818_p11), %s1005_s1, 256, %s811_s26, [#allocation6], %s727_s11, %s727_s11, %s728_s18  }
  0x2a   : > { %s579_s4 = scalar_lea.hbm %s1006_s2, 16 }
  0x2b   : > { %p580_p1 = scmp.ne.s32.totalorder %s1006_s2, %s579_s4  ;;  %p586_p10 = scmp.lt.u32.totalorder %s579_s4, %s1006_s2 }
  0x2d   : > { %p582_p4 = pnand %p580_p1, %p553_p13 }
  0x2f   : > { %p583_p6 = pneg %p582_p4 }
  0x31   : > { %p588_p3 = pnand %p586_p10, %p583_p6 }
  0x33   : > { %591 = shalt.err (!%p588_p3)
}
  0x34   : > { %s592_s26 = scalar_lea.vmem %s822_s29, 16  ;;  %s599_s9 = scalar_lea.vmem %s822_s29, 32 }
  0x35   : > { %p593_p5 = scmp.ne.s32.totalorder %s822_s29, %s592_s26  ;;  %p600_p12 = scmp.lt.s32.totalorder %s822_s29, %s822_s29 }
  0x36   : > { %p601_p0 = scmp.lt.s32.totalorder %s599_s9, %s592_s26 }
  0x37   : > { %p595_p7 = pnand %p593_p5, %p553_p13 }
  0x38   : > { %p602_p1 = por %p601_p0, %p600_p12 }
  0x39   : > { %p596_p9 = pneg %p595_p7 }
  0x3b   : > { %p603_p4 = pnand %p602_p1, %p596_p9 }
  0x3d   : > { %606 = shalt.err (!%p603_p4)
}
  0x3e   : > { %480 = dma.hbm_to_vmem [thread:$0]  (!%p818_p11), %s1006_s2, 16, %s822_s29, [#allocation6]  }
  0x3f   : > { %s32_s18 = sadd.s32 1, %s719_s16  ;;  %s39_s19 = sadd.s32 1, %s711_s14 }
  0x40   : > { %p34_p13 = scmp.ge.s32.totalorder %s32_s18, 2  ;;  %p46_p6 = scmp.ne.s32.totalorder %s711_s14, %s707_s13 }
  0x41   : > { %p47_p10 = scmp.eq.s32.totalorder %s723_s17, 0  ;;  %p491_p3 = scmp.lt.s32.totalorder %s723_s17, 2 }
  0x42   : > { %s1031_s18 = smov (%p34_p13, %s32_s18), 0  ;;  %p887_p7 = por %p791_p2, %p46_p6 }
  0x43   : > { %p48_p5 = por %p47_p10, %p46_p6  ;;  %s36_s25 = ssub.s32 %s719_s16, %s1031_s18 }
  0x44   : > { %s1018_s27 = scalar_select %p887_p7, 1, 0 }
  0x45   : > { %s184_s28 = sand.u32 1, %s711_s14   ;;  %p37_p9 = scmp.eq.s32.totalorder %s36_s25, 0 }
  0x46   : > { %s436_s29 = sshll.u32 %s184_s28, 3  ;;  %s437_s30 = sshll.u32 %s719_s16, 7 }
  0x47   : > { %s896_s4 = scalar_select %p37_p9, %s711_s14, %s39_s19  }
  0x48   : > { %s901_s7 = scalar_lea.hbm %s1004_s0, %s437_s30  ;;  %s188_s21 = scalar_lea.vmem [#allocation2], %s436_s29 }
  0x49   : > { %s195_s8 = sshll.u32 %s188_s21, 4  ;;  %p905_p2 = pnand %p491_p3, %p48_p5  ;;  %s909_s8 = int_to_ptr.vmem [resolvable:$true] %s195_s8 }
  0x4a   : > { %s185_s9 = scalar_lea.sflag [#allocation3], %s184_s28  ;;  %s607_s10 = scalar_lea.hbm %s901_s7, 128 }
  0x4b   : > { %p608_p11 = scmp.ne.s32.totalorder %s901_s7, %s607_s10  ;;  %p609_p12 = pneg %p905_p2 }
  0x4c   : > { %s612_s25 = scalar_lea.hbm %s1004_s0, 256  ;;  %p613_p4 = scmp.lt.u32.totalorder %s901_s7, %s1004_s0 }
  0x4d   : > { %p610_p0 = pnand %p609_p12, %p608_p11  ;;  %p614_p13 = scmp.lt.u32.totalorder %s612_s25, %s607_s10 }
  0x4e   : > { %p616_p10 = scmp.lt.u32.totalorder %s607_s10, %s901_s7 }
  0x4f   : > { %p611_p1 = pneg %p610_p0  ;;  %p615_p6 = por %p614_p13, %p613_p4 }
  0x51   : > { %p617_p3 = por %p616_p10, %p615_p6 }
  0x53   : > { %p618_p5 = pnand %p617_p3, %p611_p1 }
  0x55   : > { %621 = shalt.err (!%p618_p5)
}
  0x56   : > { %s622_s28 = scalar_lea.vmem %s909_s8, 128  ;;  %s729_s5 = smov [#allocation2]  }
  0x57   : > { %p623_p9 = scmp.ne.s32.totalorder %s909_s8, %s622_s28  ;;  %s627_s6 = sshll.u32 %s729_s5, 4  ;;  %s628_s6 = int_to_ptr.vmem [resolvable:$false] %s627_s6 }
  0x58   : > { %s629_s21 = scalar_lea.vmem %s628_s6, 256  ;;  %p630_p7 = scmp.lt.s32.totalorder %s909_s8, %s628_s6 }
  0x59   : > { %p625_p11 = pnand %p623_p9, %p609_p12  ;;  %p631_p4 = scmp.lt.s32.totalorder %s629_s21, %s622_s28 }
  0x5b   : > { %p626_p0 = pneg %p625_p11  ;;  %p632_p13 = por %p631_p4, %p630_p7 }
  0x5d   : > { %p633_p6 = pnand %p632_p13, %p626_p0 }
  0x5f   : > { %636 = shalt.err (!%p633_p6)
}
  0x60   : > { %484 = dma.hbm_to_vmem [thread:$0]  (!%p905_p2), %s901_s7, 128, %s909_s8, %s185_s9  }
  0x61   : > { %204 = sbr.rel (%p807_p8) target bundleno = 345 (0x159), region = 32  ;;  %s939_s10 = sand.u32 (!%p807_p8), 1, %s707_s13  }
  0x62   : > { %s439_s11 = sshll.u32 (!%p807_p8), %s939_s10, 3  ;;  %s207_s19 = scalar_lea.sflag (!%p807_p8), [#allocation3], %s939_s10 }
  0x63   : > { %s210_s25 = scalar_lea.vmem (!%p807_p8), [#allocation2], %s439_s11  ;;  %p1020_p7 = scmp.ne.s32.totalorder (!%p807_p8), %s1014_s22, 0 }
  0x68   : > { %690 = dma.done.wait (%p1020_p7), %s207_s19, 128  }
  0x69   : > { %692 = vsyncadd (%p1020_p7), %s207_s19, 4294967168  ;;  %p1021_p12 = scmp.ne.s32.totalorder %s1012_s20, 0 }
  0x6b   : > { %694 = dma.done.wait (%p1021_p12), [#allocation6], 272  }
  0x6c   : > { %696 = vsyncadd (%p1021_p12), [#allocation6], 4294967024  ;;  %v730_v0 = vmov 0.0   ;;  %vm731_vm0 = vmmov 0   ;;  %v549_v1 = vld [vmem:[#allocation5] sm:$0xff]   ;;  %v550_v2 = vld [vmem:[#allocation5 + $0x8] sm:$0xff]  }
  0x6d   : > { %454 = vmatprep.subr.bf16.mxu0 %v730_v0  ;;  %458 = vmatprep.mubr.msk.bf16.mxu0 %vm731_vm0, %v730_v0  ;;  %v242_v3 = vld [vmem:[%s210_s25] sm:$0xff]  ;;  %vm267_vm1 = vcmask 261120   ;;  %s448_s22 = sshll.u32 %s715_s15, 7  ;;  %s240_s20 = scalar_lea.vmem [#allocation8], %s439_s11  ;;  %vm311_vm2 = vcmask 523264  }
  0x6e   : > { %455 = vmatpush3.bf16.msra.mxu0 %v549_v1  ;;  %v243_v4 = vpack.c.bf16 %v242_v3, %v242_v3  ;;  %v443_v5 = vld [vmem:[#allocation7] ss:$0 sm:$0xff]  ;;  %s328_s24 = sshll.u32 %s240_s20, 4  ;;  %s955_s26 = scalar_lea.hbm %s1007_s3, %s448_s22  ;;  %s957_s24 = int_to_ptr.vmem [resolvable:$true] %s328_s24 }
  0x6f   : > { %456 = vmatprep.subr.bf16.mxu0 %v730_v0  ;;  %s314_s15 = scalar_lea.sflag [#allocation4], %s939_s10  ;;  %s637_s9 = scalar_lea.vmem %s957_s24, 128 }
  0x70   : > { %p638_p8 = scmp.ne.s32.totalorder %s957_s24, %s637_s9  ;;  %p1022_p2 = scmp.ne.s32.totalorder %s1018_s27, 0 }
  0x71   : > { %s732_s29 = smov [#allocation8]  }
  0x72   : > { %457 = vmatpush3.bf16.msra.mxu0 %v550_v2  ;;  %p639_p1 = pnand %p638_p8, %p1022_p2  ;;  %s641_s30 = sshll.u32 %s732_s29, 4  ;;  %s642_s30 = int_to_ptr.vmem [resolvable:$false] %s641_s30 }
  0x73   : > { %s643_s28 = scalar_lea.vmem %s642_s30, 256  ;;  %p644_p3 = scmp.lt.s32.totalorder %s957_s24, %s642_s30 }
  0x74   : > { %p640_p10 = pneg %p639_p1  ;;  %p645_p5 = scmp.lt.s32.totalorder %s643_s28, %s637_s9 }
  0x75   : > { %459 = vmatmul.mubr.msk.bf16.vlgmr.msra.gmra.mrb[0].mxu0 %vm267_vm1, %v243_v4 }
  0x76   : > { %p646_p9 = por %p645_p5, %p644_p3 }
  0x78   : > { %p647_p11 = pnand %p646_p9, %p640_p10 }
 0x148   : > { %v305_v6 = vpop.f32.mrb[0].mxu0 }
 0x149   : > { %v306_v7 = vadd.f32 %v443_v5, %v305_v6  ;;  %v460_v8 = vpop.f32.mrb[1].mxu0 }
 0x14a   : > { %v308_v9 = vpop.f32.mrb[2].mxu0 }
 0x14b   : > { %v461_v10 = vpop.f32.mrb[3].mxu0  ;;  %312 = vst.msk [vmem:[%s240_s20] sm:$0xff] %vm311_vm2, %v306_v7 }
 0x14c   : > { %650 = shalt.err (!%p647_p11)
}
 0x14d   : > { %s651_s5 = scalar_lea.hbm %s955_s26, 128  ;;  %s655_s10 = scalar_lea.hbm %s1007_s3, 256 }
 0x14e   : > { %p652_p0 = scmp.ne.s32.totalorder %s955_s26, %s651_s5  ;;  %p656_p6 = scmp.lt.u32.totalorder %s955_s26, %s1007_s3 }
 0x14f   : > { %p657_p7 = scmp.lt.u32.totalorder %s655_s10, %s651_s5  ;;  %p659_p8 = scmp.lt.u32.totalorder %s651_s5, %s955_s26 }
 0x150   : > { %p653_p4 = pnand %p652_p0, %p1022_p2 }
 0x151   : > { %p658_p12 = por %p657_p7, %p656_p6 }
 0x152   : > { %p654_p13 = pneg %p653_p4 }
 0x153   : > { %p660_p1 = por %p659_p8, %p658_p12 }
 0x155   : > { %p661_p10 = pnand %p660_p1, %p654_p13 }
 0x157   : > { %664 = shalt.err (!%p661_p10)
}
 0x158   : > { %472 = dma.vmem_to_hbm [thread:$0]  (%p1022_p2), %s957_s24, 128, %s955_s26, %s314_s15  }
 0x159 PF: > { %s340_s25 = sand.u32 1, %s703_s12   ;;  %p1023_p3 = scmp.ne.s32.totalorder %s1015_s23, 0 }
 0x15a   : > { %p1024_p5 = scmp.ge.s32.totalorder %s723_s17, 2  ;;  %s341_s22 = scalar_lea.sflag [#allocation4], %s340_s25 }
 0x15c   : > { %p486_p9 = pnand %p1024_p5, %p1023_p3 }
 0x15e   : > { %698 = dma.done.wait (!%p486_p9), %s341_s22, 128  }
 0x15f   : > { %700 = vsyncadd (!%p486_p9), %s341_s22, 4294967168  ;;  %s20_s17 = sadd.s32 1, %s723_s17   ;;  %s1025_s12 = smov %s707_s13 }
 0x160   : > { %p17_p11 = scmp.ge.s32.totalorder %s20_s17, 4   ;;  %s1026_s13 = smov %s711_s14 }
 0x161   : > { %s1027_s14 = smov %s896_s4  ;;  %s1028_s15 = smov %s719_s16 }
 0x162   : > { %s1029_s16 = smov %s1031_s18  ;;  %19 = sbr.rel (!%p17_p11) target bundleno = 7 (0x7), region = 87 }
 0x169   :  { %346 = vsyncpa [#allocation3], 1 }
 0x16a   :  { %348 = vsyncpa [#allocation3 + $0x1], 1 }
 0x16b   :  { %349 = vsyncpa [#allocation6], 1 }
 0x16c   :  { %350 = vsyncpa [#allocation4], 1 }
 0x16d   :  { %352 = vsyncpa [#allocation4 + $0x1], 1 }

// kernel: _lambda_.15
= control target key start
LH: loop header
LB: loop body
LE: loop exit
PB: predicated region body
PF: predicated region fallthrough
CT: control target
= control target key end

     0   :  { %10 = vsyncpa [#allocation3], 0  ;;  %s1276_s0 = inlined_call_operand.hbm [shape: f32[16,32], index: 0, kind: input, shape index: {}]   ;;  %s1277_s1 = inlined_call_operand.hbm [shape: f32[1,32], index: 1, kind: input, shape index: {}]   ;;  %s1278_s2 = inlined_call_operand.hbm [shape: f32[1,32], index: 2, kind: input, shape index: {}]   ;;  %s1279_s3 = inlined_call_operand.hbm [shape: bf16[32,96], index: 3, kind: input, shape index: {}]   ;;  %s1280_s4 = inlined_call_operand.hbm [shape: f32[1,96], index: 4, kind: input, shape index: {}]   ;;  %s1281_s5 = inlined_call_operand.hbm [shape: f32[16,96], index: 5, kind: output, shape index: {}]  }
   0x1   :  { %12 = vsyncpa [#allocation3 + $0x1], 0 }
   0x2   :  { %13 = vsyncpa [#allocation6], 0 }
   0x3   :  { %14 = vsyncpa [#allocation9], 0 }
   0x4   :  { %15 = vsyncpa [#allocation4], 0 }
   0x5   :  { %17 = vsyncpa [#allocation4 + $0x1], 0  ;;  %s981_s18 = smov 0   ;;  %s983_s19 = smov 0  }
   0x6   :  { %s985_s20 = smov 0   ;;  %s987_s21 = smov 0  }
   0x7   :  { %s989_s22 = smov 0   ;;  %s991_s23 = smov 0  }
   0x8 LB: > { %s558_s24 = sadd.s32 4294967295, %s939_s23   ;;  %p560_p0 = scmp.ge.s32.totalorder %s939_s23, 1  ;;  %s939_s23 = sphi %s991_s23, %s23_s23   ;;  %s935_s22 = sphi %s989_s22, %s1305_s22   ;;  %s931_s21 = sphi %s987_s21, %s1304_s21   ;;  %s927_s20 = sphi %s985_s20, %s1303_s20   ;;  %s923_s19 = sphi %s983_s19, %s1302_s19   ;;  %s919_s18 = sphi %s981_s18, %s1301_s18  }
   0x9   : > { %p1015_p1 = scmp.eq.s32.totalorder %s558_s24, 0  ;;  %p188_p2 = scmp.lt.s32.totalorder %s939_s23, 3 }
   0xa   : > { %s941_s27 = smov [#allocation5]   ;;  %s942_s29 = smov [#allocation8]  }
   0xb   : > { %s1286_s25 = scalar_select %p1015_p1, 1, 0 }
   0xc   : > { %p1020_p3 = pnand %p560_p0, %p188_p2  ;;  %s201_s28 = sshll.u32 %s941_s27, 4  ;;  %s202_s28 = int_to_ptr.vmem [resolvable:$true] %s201_s28 }
   0xd   : > { %s224_s30 = sshll.u32 %s942_s29, 4  ;;  %s943_s7 = smov [#allocation7]   ;;  %s1033_s30 = int_to_ptr.vmem [resolvable:$true] %s224_s30 }
   0xe   : > { %s1287_s26 = scalar_select %p1020_p3, 1, 0 }
   0xf   : > { %p616_p5 = pneg %p1020_p3  ;;  %s1035_s8 = sshll.u32 %s943_s7, 4  ;;  %s213_s8 = int_to_ptr.vmem [resolvable:$true] %s1035_s8 }
  0x10   : > { %s707_s11 = scalar_lea.hbm %s1277_s1, 16 }
  0x11   : > { %p1029_p6 = pnand %p616_p5, %p1015_p1  ;;  %p708_p7 = scmp.ne.s32.totalorder %s1277_s1, %s707_s11 }
  0x12   : > { %p714_p11 = scmp.lt.u32.totalorder %s707_s11, %s1277_s1 }
  0x13   : > { %p1045_p8 = pneg %p1029_p6 }
  0x15   : > { %p710_p9 = pnand %p1045_p8, %p708_p7 }
  0x17   : > { %p711_p10 = pneg %p710_p9 }
  0x19   : > { %p716_p12 = pnand %p714_p11, %p711_p10 }
  0x1b   : > { %719 = shalt.err (!%p716_p12)
}
  0x1c   : > { %s720_s17 = scalar_lea.vmem %s202_s28, 16  ;;  %s727_s27 = scalar_lea.vmem %s202_s28, 32 }
  0x1d   : > { %p721_p13 = scmp.ne.s32.totalorder %s202_s28, %s720_s17  ;;  %p728_p5 = scmp.lt.s32.totalorder %s202_s28, %s202_s28 }
  0x1e   : > { %p729_p4 = scmp.lt.s32.totalorder %s727_s27, %s720_s17 }
  0x1f   : > { %p723_p0 = pnand %p721_p13, %p1045_p8 }
  0x20   : > { %p730_p3 = por %p729_p4, %p728_p5 }
  0x21   : > { %p724_p2 = pneg %p723_p0 }
  0x23   : > { %p731_p1 = pnand %p730_p3, %p724_p2 }
  0x25   : > { %734 = shalt.err (!%p731_p1)
}
  0x26   : > { %619 = dma.hbm_to_vmem [thread:$0]  (!%p1029_p6), %s1277_s1, 16, %s202_s28, [#allocation6]  }
  0x27   : > { %s735_s11 = scalar_lea.hbm %s1279_s3, 256 }
  0x28   : > { %p736_p7 = scmp.ne.s32.totalorder %s1279_s3, %s735_s11  ;;  %p742_p1 = scmp.lt.u32.totalorder %s735_s11, %s1279_s3 }
  0x2a   : > { %p738_p9 = pnand %p736_p7, %p1045_p8 }
  0x2c   : > { %p739_p4 = pneg %p738_p9 }
  0x2e   : > { %p744_p3 = pnand %p742_p1, %p739_p4 }
  0x30   : > { %747 = shalt.err (!%p744_p3)
}
  0x31   : > { %s748_s28 = scalar_lea.vmem %s1033_s30, 256  ;;  %p756_p13 = scmp.lt.s32.totalorder %s1033_s30, %s1033_s30 }
  0x32   : > { %p749_p10 = scmp.ne.s32.totalorder %s1033_s30, %s748_s28  ;;  %p757_p0 = scmp.lt.s32.totalorder %s748_s28, %s748_s28 }
  0x34   : > { %p751_p11 = pnand %p749_p10, %p1045_p8  ;;  %p758_p2 = por %p757_p0, %p756_p13 }
  0x36   : > { %p752_p12 = pneg %p751_p11 }
  0x38   : > { %p759_p5 = pnand %p758_p2, %p752_p12 }
  0x3a   : > { %762 = shalt.err (!%p759_p5)
}
  0x3b   : > { %s944_s17 = smov 64   ;;  %s945_s27 = smov 4  }
  0x3c   : > { %625 = dma.hbm_to_vmem [thread:$0]  (!%p1029_p6), %s1279_s3, 256, %s1033_s30, [#allocation9], %s944_s17, %s944_s17, %s945_s27  }
  0x3d   : > { %s763_s11 = scalar_lea.hbm %s1278_s2, 16 }
  0x3e   : > { %p764_p7 = scmp.ne.s32.totalorder %s1278_s2, %s763_s11  ;;  %p770_p1 = scmp.lt.u32.totalorder %s763_s11, %s1278_s2 }
  0x40   : > { %p766_p9 = pnand %p764_p7, %p1045_p8 }
  0x42   : > { %p767_p4 = pneg %p766_p9 }
  0x44   : > { %p772_p3 = pnand %p770_p1, %p767_p4 }
  0x46   : > { %775 = shalt.err (!%p772_p3)
}
  0x47   : > { %s776_s28 = scalar_lea.vmem %s213_s8, 16  ;;  %s783_s30 = scalar_lea.vmem %s213_s8, 32 }
  0x48   : > { %p777_p10 = scmp.ne.s32.totalorder %s213_s8, %s776_s28  ;;  %p784_p13 = scmp.lt.s32.totalorder %s213_s8, %s213_s8 }
  0x49   : > { %p785_p0 = scmp.lt.s32.totalorder %s783_s30, %s776_s28 }
  0x4a   : > { %p779_p11 = pnand %p777_p10, %p1045_p8 }
  0x4b   : > { %p786_p2 = por %p785_p0, %p784_p13 }
  0x4c   : > { %p780_p12 = pneg %p779_p11 }
  0x4e   : > { %p787_p5 = pnand %p786_p2, %p780_p12 }
  0x50   : > { %790 = shalt.err (!%p787_p5)
}
  0x51   : > { %622 = dma.hbm_to_vmem [thread:$0]  (!%p1029_p6), %s1278_s2, 16, %s213_s8, [#allocation6]  }
  0x52   : > { %s946_s29 = smov [#allocation10]   ;;  %s791_s11 = scalar_lea.hbm %s1280_s4, 16 }
  0x53   : > { %s240_s7 = sshll.u32 %s946_s29, 4  ;;  %p792_p7 = scmp.ne.s32.totalorder %s1280_s4, %s791_s11  ;;  %s241_s7 = int_to_ptr.vmem [resolvable:$true] %s240_s7 }
  0x54   : > { %p798_p1 = scmp.lt.u32.totalorder %s791_s11, %s1280_s4 }
  0x55   : > { %p794_p9 = pnand %p792_p7, %p1045_p8 }
  0x57   : > { %p795_p4 = pneg %p794_p9 }
  0x59   : > { %p800_p3 = pnand %p798_p1, %p795_p4 }
  0x5b   : > { %803 = shalt.err (!%p800_p3)
}
  0x5c   : > { %s804_s8 = scalar_lea.vmem %s241_s7, 16  ;;  %s811_s28 = scalar_lea.vmem %s241_s7, 32 }
  0x5d   : > { %p805_p10 = scmp.ne.s32.totalorder %s241_s7, %s804_s8  ;;  %p812_p13 = scmp.lt.s32.totalorder %s241_s7, %s241_s7 }
  0x5e   : > { %p813_p0 = scmp.lt.s32.totalorder %s811_s28, %s804_s8 }
  0x5f   : > { %p807_p11 = pnand %p805_p10, %p1045_p8 }
  0x60   : > { %p814_p2 = por %p813_p0, %p812_p13 }
  0x61   : > { %p808_p12 = pneg %p807_p11 }
  0x63   : > { %p815_p5 = pnand %p814_p2, %p808_p12 }
  0x65   : > { %818 = shalt.err (!%p815_p5)
}
  0x66   : > { %628 = dma.hbm_to_vmem [thread:$0]  (!%p1029_p6), %s1280_s4, 16, %s241_s7, [#allocation9]  }
  0x67   : > { %s559_s14 = sadd.s32 4294967294, %s939_s23   ;;  %s35_s27 = sadd.s32 1, %s935_s22 }
  0x68   : > { %p37_p8 = scmp.ge.s32.totalorder %s35_s27, 2  ;;  %s42_s6 = sadd.s32 1, %s927_s20 }
  0x69   : > { %p49_p7 = scmp.ne.s32.totalorder %s927_s20, %s923_s19  ;;  %p50_p9 = scmp.eq.s32.totalorder %s939_s23, 0 }
  0x6a   : > { %s1307_s27 = smov (%p37_p8, %s35_s27), 0  ;;  %p55_p1 = scmp.ne.s32.totalorder %s923_s19, %s919_s18 }
  0x6b   : > { %p1129_p4 = por %p50_p9, %p49_p7  ;;  %s39_s7 = ssub.s32 %s935_s22, %s1307_s27 }
  0x6c   : > { %p175_p6 = scmp.eq.s32.totalorder %s558_s24, 1  ;;  %p40_p3 = scmp.eq.s32.totalorder %s39_s7, 0 }
  0x6d   : > { %p1291_p10 = scmp.ne.s32.totalorder %s1286_s25, 0  ;;  %p181_p13 = scmp.eq.s32.totalorder %s559_s14, 1 }
  0x6e   : > { %p1145_p12 = por %p175_p6, %p49_p7  ;;  %p641_p2 = scmp.lt.s32.totalorder %s939_s23, 2 }
  0x6f   : > { %p1141_p11 = por %p1291_p10, %p55_p1  ;;  %p1152_p0 = por %p181_p13, %p55_p1 }
  0x70   : > { %s1293_s10 = scalar_select %p1145_p12, 1, 0 }
  0x71   : > { %s1150_s11 = scalar_select %p40_p3, %s927_s20, %s42_s6  }
  0x72   : > { %s1294_s12 = scalar_select %p1152_p0, 1, 0 }
  0x73   : > { %s251_s13 = sand.u32 1, %s927_s20   ;;  %s567_s24 = sshll.u32 %s935_s22, 7 }
  0x74   : > { %s566_s15 = sshll.u32 %s251_s13, 3  ;;  %s1162_s28 = scalar_lea.hbm %s1276_s0, %s567_s24 }
  0x75   : > { %s255_s30 = scalar_lea.vmem [#allocation2], %s566_s15  ;;  %p1166_p5 = pnand %p641_p2, %p1129_p4 }
  0x76   : > { %s262_s17 = sshll.u32 %s255_s30, 4  ;;  %s252_s6 = scalar_lea.sflag [#allocation3], %s251_s13  ;;  %s1170_s17 = int_to_ptr.vmem [resolvable:$true] %s262_s17 }
  0x77   : > { %s819_s7 = scalar_lea.hbm %s1162_s28, 128  ;;  %p821_p7 = pneg %p1166_p5 }
  0x78   : > { %p820_p8 = scmp.ne.s32.totalorder %s1162_s28, %s819_s7  ;;  %s824_s29 = scalar_lea.hbm %s1276_s0, 256 }
  0x79   : > { %p825_p4 = scmp.lt.u32.totalorder %s1162_s28, %s1276_s0  ;;  %p826_p6 = scmp.lt.u32.totalorder %s824_s29, %s819_s7 }
  0x7a   : > { %p822_p9 = pnand %p821_p7, %p820_p8  ;;  %p828_p10 = scmp.lt.u32.totalorder %s819_s7, %s1162_s28 }
  0x7b   : > { %p827_p3 = por %p826_p6, %p825_p4 }
  0x7c   : > { %p823_p1 = pneg %p822_p9 }
  0x7d   : > { %p829_p13 = por %p828_p10, %p827_p3 }
  0x7f   : > { %p830_p2 = pnand %p829_p13, %p823_p1 }
  0x81   : > { %833 = shalt.err (!%p830_p2)
}
  0x82   : > { %s834_s13 = scalar_lea.vmem %s1170_s17, 128  ;;  %s947_s30 = smov [#allocation2]  }
  0x83   : > { %p835_p8 = scmp.ne.s32.totalorder %s1170_s17, %s834_s13  ;;  %s839_s24 = sshll.u32 %s947_s30, 4  ;;  %s840_s24 = int_to_ptr.vmem [resolvable:$false] %s839_s24 }
  0x84   : > { %s841_s15 = scalar_lea.vmem %s840_s24, 256  ;;  %p842_p12 = scmp.lt.s32.totalorder %s1170_s17, %s840_s24 }
  0x85   : > { %p837_p9 = pnand %p835_p8, %p821_p7  ;;  %p843_p4 = scmp.lt.s32.totalorder %s841_s15, %s834_s13 }
  0x87   : > { %p838_p0 = pneg %p837_p9  ;;  %p844_p6 = por %p843_p4, %p842_p12 }
  0x89   : > { %p845_p3 = pnand %p844_p6, %p838_p0 }
  0x8b   : > { %848 = shalt.err (!%p845_p3)
}
  0x8c   : > { %632 = dma.hbm_to_vmem [thread:$0]  (!%p1166_p5), %s1162_s28, 128, %s1170_s17, %s252_s6  }
  0x8d   : > { %p1296_p1 = scmp.ne.s32.totalorder %s1287_s26, 0 }
  0x8e   : > { %s1200_s7 = sand.u32 (!%p1296_p1), 1, %s923_s19  }
  0x8f   : > { %271 = sbr.rel (%p1296_p1) target bundleno = 700 (0x2bc), region = 40  ;;  %s569_s29 = sshll.u32 (!%p1296_p1), %s1200_s7, 3 }
  0x90   : > { %s274_s16 = scalar_lea.sflag (!%p1296_p1), [#allocation3], %s1200_s7  ;;  %s277_s8 = scalar_lea.vmem (!%p1296_p1), [#allocation2], %s569_s29 }
  0x96   : > { %902 = dma.done.wait (%p1141_p11), %s274_s16, 128  }
  0x97   : > { %904 = vsyncadd (%p1141_p11), %s274_s16, 4294967168  ;;  %p1297_p12 = scmp.ne.s32.totalorder %s1286_s25, 0 }
  0x99   : > { %906 = dma.done.wait (%p1297_p12), [#allocation6], 32  }
  0x9a   : > { %908 = vsyncadd (%p1297_p12), [#allocation6], 4294967264 }
  0x9b   : > { %910 = dma.done.wait (%p1297_p12), [#allocation9], 272  }
  0x9c   : > { %912 = vsyncadd (%p1297_p12), [#allocation9], 4294967024  ;;  %vm324_vm0 = vcmask 261120   ;;  %v321_v0 = vld [vmem:[%s277_s8] sm:$0xff]  ;;  %v703_v7 = vld [vmem:[#allocation8] sm:$0xff]   ;;  %v948_v8 = vmov 0.0  }
  0x9d   : > { %v325_v1 = vsel %vm324_vm0, %v321_v0, 0.0  ;;  %588 = vmatprep.subr.bf16.mxu0 %v948_v8  ;;  %v704_v9 = vld [vmem:[#allocation8 + $0x8] sm:$0xff]   ;;  %vm949_vm1 = vmmov 0   ;;  %v575_v14 = vld [vmem:[#allocation5] ss:$0 sm:$0xff]  ;;  %s582_s25 = sshll.u32 %s931_s21, 7 }
  0x9e   : > { %326 = vadd.xlane.f32.xlu0 %v325_v1  ;;  %589 = vmatpush3.bf16.msra.mxu0 %v703_v7  ;;  %v576_v16 = vld [vmem:[#allocation7] ss:$0 sm:$0xff]  ;;  %v577_v20 = vld [vmem:[#allocation10] ss:$0 sm:$0xff]  ;;  %s319_s26 = scalar_lea.vmem [#allocation11], %s569_s29  ;;  %vm420_vm2 = vcmask 785408   ;;  %s1227_s14 = scalar_lea.hbm %s1281_s5, %s582_s25 }
  0x9f   : > { %592 = vmatprep.mubr.msk.bf16.mxu0 %vm949_vm1, %v948_v8  ;;  %590 = vmatprep.subr.bf16.mxu0 %v948_v8  ;;  %s437_s9 = sshll.u32 %s319_s26, 4  ;;  %s423_s21 = scalar_lea.sflag [#allocation4], %s1200_s7  ;;  %s1229_s9 = int_to_ptr.vmem [resolvable:$true] %s437_s9 }
  0xa0   : > { %s849_s6 = scalar_lea.vmem %s1229_s9, 128  ;;  %p1298_p0 = scmp.ne.s32.totalorder %s1293_s10, 0 }
  0xa1   : > { %p850_p11 = scmp.ne.s32.totalorder %s1229_s9, %s849_s6  ;;  %s950_s13 = smov [#allocation11]  }
  0xa2   : > { %591 = vmatpush3.bf16.msra.mxu0 %v704_v9  ;;  %s853_s30 = sshll.u32 %s950_s13, 4  ;;  %s854_s30 = int_to_ptr.vmem [resolvable:$false] %s853_s30 }
  0xa3   : > { %p851_p5 = pnand %p850_p11, %p1298_p0  ;;  %s855_s24 = scalar_lea.vmem %s854_s30, 256 }
  0xa4   : > { %p856_p10 = scmp.lt.s32.totalorder %s1229_s9, %s854_s30  ;;  %p857_p13 = scmp.lt.s32.totalorder %s855_s24, %s849_s6 }
  0xa5   : > { %p852_p7 = pneg %p851_p5 }
  0xa6   : > { %p858_p2 = por %p857_p13, %p856_p10 }
  0xa8   : > { %p859_p8 = pnand %p858_p2, %p852_p7 }
 0x12b   : > { %v327_v2 = vpop.xlane.xlu0 %326 }
 0x12c   : > { %v329_v3 = vmul.f32 0.03125, %v327_v2 }
 0x12e   : > { %v330_v4 = vsub.f32 %v321_v0, %v329_v3 }
 0x130   : > { %v331_v5 = vmul.f32 %v330_v4, %v330_v4 }
 0x132   : > { %v332_v6 = vsel %vm324_vm0, %v331_v5, 0.0 }
 0x133   : > { %333 = vadd.xlane.f32.xlu0 %v332_v6 }
 0x1c0   : > { %v334_v10 = vpop.xlane.xlu0 %333 }
 0x1c1   : > { %v335_v11 = vmul.f32 0.03125, %v334_v10 }
 0x1c3   : > { %v336_v12 = vadd.f32 1e-05, %v335_v11 }
 0x1c5   : > { %705 = vrsqrt.f32 %v336_v12 }
 0x1cf   : > { %v706_v13 = vpop.eup %705 }
 0x1d0   : > { %v338_v15 = vmul.f32 %v706_v13, %v330_v4 }
 0x1d2   : > { %v345_v17 = vmul.f32 %v575_v14, %v338_v15 }
 0x1d4   : > { %v352_v18 = vadd.f32 %v576_v16, %v345_v17 }
 0x1d6   : > { %v353_v19 = vpack.c.bf16 %v352_v18, %v352_v18 }
 0x1d8   : > { %593 = vmatmul.mubr.msk.bf16.vlgmr.msra.gmra.mrb[0].mxu0 %vm324_vm0, %v353_v19 }
 0x2ab   : > { %v414_v21 = vpop.f32.mrb[0].mxu0 }
 0x2ac   : > { %v415_v22 = vadd.f32 %v577_v20, %v414_v21  ;;  %v594_v23 = vpop.f32.mrb[1].mxu0 }
 0x2ad   : > { %v417_v24 = vpop.f32.mrb[2].mxu0 }
 0x2ae   : > { %v595_v25 = vpop.f32.mrb[3].mxu0  ;;  %421 = vst.msk [vmem:[%s319_s26] sm:$0xff] %vm420_vm2, %v415_v22 }
 0x2af   : > { %862 = shalt.err (!%p859_p8)
}
 0x2b0   : > { %s863_s15 = scalar_lea.hbm %s1227_s14, 128  ;;  %s867_s16 = scalar_lea.hbm %s1281_s5, 256 }
 0x2b1   : > { %p864_p9 = scmp.ne.s32.totalorder %s1227_s14, %s863_s15  ;;  %p868_p3 = scmp.lt.u32.totalorder %s1227_s14, %s1281_s5 }
 0x2b2   : > { %p869_p1 = scmp.lt.u32.totalorder %s867_s16, %s863_s15  ;;  %p871_p11 = scmp.lt.u32.totalorder %s863_s15, %s1227_s14 }
 0x2b3   : > { %p865_p4 = pnand %p864_p9, %p1298_p0 }
 0x2b4   : > { %p870_p12 = por %p869_p1, %p868_p3 }
 0x2b5   : > { %p866_p6 = pneg %p865_p4 }
 0x2b6   : > { %p872_p5 = por %p871_p11, %p870_p12 }
 0x2b8   : > { %p873_p7 = pnand %p872_p5, %p866_p6 }
 0x2ba   : > { %876 = shalt.err (!%p873_p7)
}
 0x2bb   : > { %614 = dma.vmem_to_hbm [thread:$0]  (%p1298_p0), %s1229_s9, 128, %s1227_s14, %s423_s21  }
 0x2bc PF: > { %s449_s26 = sand.u32 1, %s919_s18   ;;  %p1299_p10 = scmp.ne.s32.totalorder %s1294_s12, 0 }
 0x2bd   : > { %p1300_p13 = scmp.ge.s32.totalorder %s939_s23, 2  ;;  %s450_s28 = scalar_lea.sflag [#allocation4], %s449_s26 }
 0x2bf   : > { %p634_p2 = pnand %p1300_p13, %p1299_p10 }
 0x2c1   : > { %914 = dma.done.wait (!%p634_p2), %s450_s28, 128  }
 0x2c2   : > { %916 = vsyncadd (!%p634_p2), %s450_s28, 4294967168  ;;  %s23_s23 = sadd.s32 1, %s939_s23   ;;  %s1301_s18 = smov %s923_s19 }
 0x2c3   : > { %p20_p8 = scmp.ge.s32.totalorder %s23_s23, 4   ;;  %s1302_s19 = smov %s927_s20 }
 0x2c4   : > { %s1303_s20 = smov %s1150_s11  ;;  %s1304_s21 = smov %s935_s22 }
 0x2c5   : > { %s1305_s22 = smov %s1307_s27  ;;  %22 = sbr.rel (!%p20_p8) target bundleno = 8 (0x8), region = 103 }
 0x2cc   :  { %455 = vsyncpa [#allocation3], 1 }
 0x2cd   :  { %457 = vsyncpa [#allocation3 + $0x1], 1 }
 0x2ce   :  { %458 = vsyncpa [#allocation6], 1 }
 0x2cf   :  { %459 = vsyncpa [#allocation9], 1 }
 0x2d0   :  { %460 = vsyncpa [#allocation4], 1 }
 0x2d1   :  { %462 = vsyncpa [#allocation4 + $0x1], 1 }

// kernel: _lambda_.17
= control target key start
LH: loop header
LB: loop body
LE: loop exit
PB: predicated region body
PF: predicated region fallthrough
CT: control target
= control target key end

     0   :  { %s2131_s0 = inlined_call_operand.hbm [shape: f32[16,32], index: 0, kind: input, shape index: {}]   ;;  %s2132_s1 = inlined_call_operand.hbm [shape: f32[16,32], index: 1, kind: input, shape index: {}]   ;;  %s2133_s2 = inlined_call_operand.hbm [shape: bf16[32,32], index: 2, kind: input, shape index: {}]   ;;  %s2134_s3 = inlined_call_operand.hbm [shape: f32[1,32], index: 3, kind: input, shape index: {}]   ;;  %s2135_s4 = inlined_call_operand.hbm [shape: f32[1,32], index: 4, kind: input, shape index: {}]   ;;  %s2136_s5 = inlined_call_operand.hbm [shape: f32[1,32], index: 5, kind: input, shape index: {}]   ;;  %s2137_s6 = inlined_call_operand.hbm [shape: bf16[32,128], index: 6, kind: input, shape index: {}]   ;;  %s2138_s7 = inlined_call_operand.hbm [shape: f32[1,128], index: 7, kind: input, shape index: {}]   ;;  %s2139_s8 = inlined_call_operand.hbm [shape: bf16[128,32], index: 8, kind: input, shape index: {}]   ;;  %s2140_s9 = inlined_call_operand.hbm [shape: f32[1,32], index: 9, kind: input, shape index: {}]   ;;  %s2141_s10 = inlined_call_operand.hbm [shape: f32[16,32], index: 10, kind: output, shape index: {}]  }
   0x1   :  { %2150 = sst [smem:[#allocation29_spill]] %s2133_s2 }
   0x2   :  { %2151 = sst [smem:[#allocation30_spill]] %s2134_s3 }
   0x3   :  { %2152 = sst [smem:[#allocation31_spill]] %s2135_s4 }
   0x4   :  { %2153 = sst [smem:[#allocation32_spill]] %s2136_s5 }
   0x5   :  { %2154 = sst [smem:[#allocation33_spill]] %s2137_s6 }
   0x6   :  { %2155 = sst [smem:[#allocation34_spill]] %s2141_s10 }
   0x7   :  { %15 = vsyncpa [#allocation3], 0 }
   0x8   :  { %17 = vsyncpa [#allocation3 + $0x1], 0 }
   0x9   :  { %18 = vsyncpa [#allocation6], 0 }
   0xa   :  { %20 = vsyncpa [#allocation6 + $0x1], 0 }
   0xb   :  { %21 = vsyncpa [#allocation9], 0 }
   0xc   :  { %22 = vsyncpa [#allocation12], 0 }
   0xd   :  { %23 = vsyncpa [#allocation15], 0 }
   0xe   :  { %24 = vsyncpa [#allocation18], 0 }
   0xf   :  { %25 = vsyncpa [#allocation4], 0 }
  0x10   :  { %27 = vsyncpa [#allocation4 + $0x1], 0  ;;  %s1690_s13 = smov 0   ;;  %s1692_s14 = smov 0  }
  0x11   :  { %s1694_s15 = smov 0   ;;  %s1696_s16 = smov 0  }
  0x12 LB: > { %s1620_s17 = smov [#allocation7]   ;;  %s1711_s19 = sadd.s32 4294967295, %s1618_s16   ;;  %s1618_s16 = sphi %s1696_s16, %s2192_s16   ;;  %s1614_s15 = sphi %s1694_s15, %s2191_s15   ;;  %s1610_s14 = sphi %s1692_s14, %s2190_s14   ;;  %s1606_s13 = sphi %s1690_s13, %s2189_s13  }
  0x13   : > { %s296_s18 = sshll.u32 %s1620_s17, 4  ;;  %p992_p0 = scmp.ge.s32.totalorder %s1618_s16, 1  ;;  %s1716_s18 = int_to_ptr.vmem [resolvable:$true] %s296_s18 }
  0x14   : > { %p2146_p1 = scmp.eq.s32.totalorder %s1711_s19, 0  ;;  %p284_p2 = scmp.lt.s32.totalorder %s1618_s16, 3 }
  0x15   : > { %s1621_s21 = smov [#allocation8]   ;;  %s1622_s24 = smov [#allocation11]  }
  0x16   : > { %p1718_p3 = pnand %p992_p0, %p284_p2  ;;  %s310_s22 = sshll.u32 %s1621_s21, 4  ;;  %s1731_s22 = int_to_ptr.vmem [resolvable:$true] %s310_s22 }
  0x17   : > { %s332_s25 = sshll.u32 %s1622_s24, 4  ;;  %s2159_s2 = sld [smem:[#allocation29_spill]]  ;;  %s1733_s25 = int_to_ptr.vmem [resolvable:$true] %s332_s25 }
  0x18   : > { %s2156_s20 = scalar_select %p1718_p3, 1, 0 }
  0x19   : > { %p1130_p5 = pneg %p1718_p3 }
  0x1a   : > { %2157 = sst [smem:[#allocation28_spill]] %s2156_s20 }
  0x1b   : > { %p1727_p6 = pnand %p1130_p5, %p2146_p1 }
  0x1d   : > { %s1244_s28 = scalar_lea.hbm %s2159_s2, 256  ;;  %p1743_p8 = pneg %p1727_p6 }
  0x1e   : > { %p1245_p7 = scmp.ne.s32.totalorder %s2159_s2, %s1244_s28  ;;  %p1251_p11 = scmp.lt.u32.totalorder %s1244_s28, %s2159_s2 }
  0x20   : > { %p1247_p9 = pnand %p1743_p8, %p1245_p7 }
  0x22   : > { %p1248_p10 = pneg %p1247_p9 }
  0x24   : > { %p1253_p12 = pnand %p1251_p11, %p1248_p10 }
  0x26   : > { %1256 = shalt.err (!%p1253_p12)
}
  0x27   : > { %s1257_s21 = scalar_lea.vmem %s1716_s18, 256  ;;  %p1265_p5 = scmp.lt.s32.totalorder %s1716_s18, %s1716_s18 }
  0x28   : > { %p1258_p13 = scmp.ne.s32.totalorder %s1716_s18, %s1257_s21  ;;  %p1266_p4 = scmp.lt.s32.totalorder %s1257_s21, %s1257_s21 }
  0x2a   : > { %p1260_p0 = pnand %p1258_p13, %p1743_p8  ;;  %p1267_p7 = por %p1266_p4, %p1265_p5 }
  0x2c   : > { %p1261_p2 = pneg %p1260_p0 }
  0x2e   : > { %p1268_p9 = pnand %p1267_p7, %p1261_p2 }
  0x30   : > { %1271 = shalt.err (!%p1268_p9)
}
  0x31   : > { %s2144_s24 = smov 64   ;;  %s1624_s26 = smov 4  }
  0x32   : > { %1133 = dma.hbm_to_vmem [thread:$0]  (!%p1727_p6), %s2159_s2, 256, %s1716_s18, [#allocation6], %s2144_s24, %s2144_s24, %s1624_s26  }
  0x33   : > { %s2161_s3 = sld [smem:[#allocation30_spill]] }
  0x39   : > { %s1272_s12 = scalar_lea.hbm %s2161_s3, 16 }
  0x3a   : > { %p1273_p4 = scmp.ne.s32.totalorder %s2161_s3, %s1272_s12  ;;  %p1279_p12 = scmp.lt.u32.totalorder %s1272_s12, %s2161_s3 }
  0x3c   : > { %p1275_p10 = pnand %p1273_p4, %p1743_p8 }
  0x3e   : > { %p1276_p11 = pneg %p1275_p10 }
  0x40   : > { %p1281_p13 = pnand %p1279_p12, %p1276_p11 }
  0x42   : > { %1284 = shalt.err (!%p1281_p13)
}
  0x43   : > { %s1285_s18 = scalar_lea.vmem %s1731_s22, 16  ;;  %s1292_s27 = scalar_lea.vmem %s1731_s22, 32 }
  0x44   : > { %p1286_p0 = scmp.ne.s32.totalorder %s1731_s22, %s1285_s18  ;;  %p1293_p7 = scmp.lt.s32.totalorder %s1731_s22, %s1731_s22 }
  0x45   : > { %p1294_p9 = scmp.lt.s32.totalorder %s1292_s27, %s1285_s18 }
  0x46   : > { %p1288_p2 = pnand %p1286_p0, %p1743_p8 }
  0x47   : > { %p1295_p4 = por %p1294_p9, %p1293_p7 }
  0x48   : > { %p1289_p5 = pneg %p1288_p2 }
  0x4a   : > { %p1296_p10 = pnand %p1295_p4, %p1289_p5 }
  0x4c   : > { %1299 = shalt.err (!%p1296_p10)
}
  0x4d   : > { %1136 = dma.hbm_to_vmem [thread:$0]  (!%p1727_p6), %s2161_s3, 16, %s1731_s22, [#allocation9]  }
  0x4e   : > { %s2162_s5 = sld [smem:[#allocation32_spill]] }
  0x54   : > { %s1300_s30 = scalar_lea.hbm %s2162_s5, 16 }
  0x55   : > { %p1301_p11 = scmp.ne.s32.totalorder %s2162_s5, %s1300_s30  ;;  %p1307_p0 = scmp.lt.u32.totalorder %s1300_s30, %s2162_s5 }
  0x57   : > { %p1303_p12 = pnand %p1301_p11, %p1743_p8 }
  0x59   : > { %p1304_p13 = pneg %p1303_p12 }
  0x5b   : > { %p1309_p2 = pnand %p1307_p0, %p1304_p13 }
  0x5d   : > { %1312 = shalt.err (!%p1309_p2)
}
  0x5e   : > { %s1313_s22 = scalar_lea.vmem %s1733_s25, 16  ;;  %s1320_s27 = scalar_lea.vmem %s1733_s25, 32 }
  0x5f   : > { %p1314_p5 = scmp.ne.s32.totalorder %s1733_s25, %s1313_s22  ;;  %p1321_p4 = scmp.lt.s32.totalorder %s1733_s25, %s1733_s25 }
  0x60   : > { %p1322_p10 = scmp.lt.s32.totalorder %s1320_s27, %s1313_s22 }
  0x61   : > { %p1316_p7 = pnand %p1314_p5, %p1743_p8 }
  0x62   : > { %p1323_p11 = por %p1322_p10, %p1321_p4 }
  0x63   : > { %p1317_p9 = pneg %p1316_p7 }
  0x65   : > { %p1324_p12 = pnand %p1323_p11, %p1317_p9 }
  0x67   : > { %1327 = shalt.err (!%p1324_p12)
}
  0x68   : > { %1142 = dma.hbm_to_vmem [thread:$0]  (!%p1727_p6), %s2162_s5, 16, %s1733_s25, [#allocation12]  }
  0x69   : > { %s1625_s28 = smov [#allocation14]   ;;  %s1626_s30 = smov [#allocation10]  }
  0x6a   : > { %s356_s29 = sshll.u32 %s1625_s28, 4  ;;  %s321_s12 = sshll.u32 %s1626_s30, 4  ;;  %s357_s29 = int_to_ptr.vmem [resolvable:$true] %s356_s29  ;;  %s322_s12 = int_to_ptr.vmem [resolvable:$true] %s321_s12 }
  0x6b   : > { %s1328_s18 = scalar_lea.hbm %s2138_s7, 16 }
  0x6c   : > { %p1329_p13 = scmp.ne.s32.totalorder %s2138_s7, %s1328_s18  ;;  %p1335_p5 = scmp.lt.u32.totalorder %s1328_s18, %s2138_s7 }
  0x6e   : > { %p1331_p0 = pnand %p1329_p13, %p1743_p8 }
  0x70   : > { %p1332_p2 = pneg %p1331_p0 }
  0x72   : > { %p1337_p7 = pnand %p1335_p5, %p1332_p2 }
  0x74   : > { %1340 = shalt.err (!%p1337_p7)
}
  0x75   : > { %s1341_s25 = scalar_lea.vmem %s357_s29, 16  ;;  %s1348_s20 = scalar_lea.vmem %s357_s29, 32 }
  0x76   : > { %p1342_p9 = scmp.ne.s32.totalorder %s357_s29, %s1341_s25  ;;  %p1349_p11 = scmp.lt.s32.totalorder %s357_s29, %s357_s29 }
  0x77   : > { %p1350_p12 = scmp.lt.s32.totalorder %s1348_s20, %s1341_s25 }
  0x78   : > { %p1344_p4 = pnand %p1342_p9, %p1743_p8 }
  0x79   : > { %p1351_p1 = por %p1350_p12, %p1349_p11 }
  0x7a   : > { %p1345_p10 = pneg %p1344_p4 }
  0x7c   : > { %p1352_p3 = pnand %p1351_p1, %p1345_p10 }
  0x7e   : > { %1355 = shalt.err (!%p1352_p3)
}
  0x7f   : > { %1148 = dma.hbm_to_vmem [thread:$0]  (!%p1727_p6), %s2138_s7, 16, %s357_s29, [#allocation15]  }
  0x80   : > { %s2163_s4 = sld [smem:[#allocation31_spill]] }
  0x86   : > { %s1356_s21 = scalar_lea.hbm %s2163_s4, 16 }
  0x87   : > { %p1357_p13 = scmp.ne.s32.totalorder %s2163_s4, %s1356_s21  ;;  %p1363_p3 = scmp.lt.u32.totalorder %s1356_s21, %s2163_s4 }
  0x89   : > { %p1359_p0 = pnand %p1357_p13, %p1743_p8 }
  0x8b   : > { %p1360_p1 = pneg %p1359_p0 }
  0x8d   : > { %p1365_p2 = pnand %p1363_p3, %p1360_p1 }
  0x8f   : > { %1368 = shalt.err (!%p1365_p2)
}
  0x90   : > { %s1369_s25 = scalar_lea.vmem %s322_s12, 16  ;;  %s1376_s29 = scalar_lea.vmem %s322_s12, 32 }
  0x91   : > { %p1370_p5 = scmp.ne.s32.totalorder %s322_s12, %s1369_s25  ;;  %p1377_p4 = scmp.lt.s32.totalorder %s322_s12, %s322_s12 }
  0x92   : > { %p1378_p10 = scmp.lt.s32.totalorder %s1376_s29, %s1369_s25 }
  0x93   : > { %p1372_p7 = pnand %p1370_p5, %p1743_p8 }
  0x94   : > { %p1379_p11 = por %p1378_p10, %p1377_p4 }
  0x95   : > { %p1373_p9 = pneg %p1372_p7 }
  0x97   : > { %p1380_p12 = pnand %p1379_p11, %p1373_p9 }
  0x99   : > { %1383 = shalt.err (!%p1380_p12)
}
  0x9a   : > { %1139 = dma.hbm_to_vmem [thread:$0]  (!%p1727_p6), %s2163_s4, 16, %s322_s12, [#allocation9]  }
  0x9b   : > { %s1627_s30 = smov [#allocation13]   ;;  %s1628_s17 = smov [#allocation16]  }
  0x9c   : > { %s342_s24 = sshll.u32 %s1627_s30, 4  ;;  %s366_s21 = sshll.u32 %s1628_s17, 4  ;;  %s343_s24 = int_to_ptr.vmem [resolvable:$true] %s342_s24  ;;  %s367_s21 = int_to_ptr.vmem [resolvable:$true] %s366_s21 }
  0x9d   : > { %s2164_s6 = sld [smem:[#allocation33_spill]] }
  0xa3   : > { %s1384_s27 = scalar_lea.hbm %s2164_s6, 256 }
  0xa4   : > { %p1385_p13 = scmp.ne.s32.totalorder %s2164_s6, %s1384_s27  ;;  %p1391_p3 = scmp.lt.u32.totalorder %s1384_s27, %s2164_s6 }
  0xa6   : > { %p1387_p0 = pnand %p1385_p13, %p1743_p8 }
  0xa8   : > { %p1388_p1 = pneg %p1387_p0 }
  0xaa   : > { %p1393_p2 = pnand %p1391_p3, %p1388_p1 }
  0xac   : > { %1396 = shalt.err (!%p1393_p2)
}
  0xad   : > { %s1397_s12 = scalar_lea.vmem %s343_s24, 256  ;;  %p1405_p4 = scmp.lt.s32.totalorder %s343_s24, %s343_s24 }
  0xae   : > { %p1398_p5 = scmp.ne.s32.totalorder %s343_s24, %s1397_s12  ;;  %p1406_p10 = scmp.lt.s32.totalorder %s1397_s12, %s1397_s12 }
  0xb0   : > { %p1400_p7 = pnand %p1398_p5, %p1743_p8  ;;  %p1407_p11 = por %p1406_p10, %p1405_p4 }
  0xb2   : > { %p1401_p9 = pneg %p1400_p7 }
  0xb4   : > { %p1408_p12 = pnand %p1407_p11, %p1401_p9 }
  0xb6   : > { %1411 = shalt.err (!%p1408_p12)
}
  0xb7   : > { %s2165_s28 = smov 64   ;;  %s1412_s27 = scalar_lea.hbm %s2139_s8, 1024 }
  0xb8   : > { %1145 = dma.hbm_to_vmem [thread:$0]  (!%p1727_p6), %s2164_s6, 256, %s343_s24, [#allocation12], %s2165_s28, %s2165_s28, %s1624_s26  }
  0xb9   : > { %p1413_p13 = scmp.ne.s32.totalorder %s2139_s8, %s1412_s27  ;;  %p1419_p3 = scmp.lt.u32.totalorder %s1412_s27, %s2139_s8 }
  0xbb   : > { %p1415_p0 = pnand %p1413_p13, %p1743_p8 }
  0xbd   : > { %p1416_p1 = pneg %p1415_p0 }
  0xbf   : > { %p1421_p2 = pnand %p1419_p3, %p1416_p1 }
  0xc1   : > { %1424 = shalt.err (!%p1421_p2)
}
  0xc2   : > { %s1425_s12 = scalar_lea.vmem %s367_s21, 1024  ;;  %p1433_p4 = scmp.lt.s32.totalorder %s367_s21, %s367_s21 }
  0xc3   : > { %p1426_p5 = scmp.ne.s32.totalorder %s367_s21, %s1425_s12  ;;  %p1434_p10 = scmp.lt.s32.totalorder %s1425_s12, %s1425_s12 }
  0xc5   : > { %p1428_p7 = pnand %p1426_p5, %p1743_p8  ;;  %p1435_p11 = por %p1434_p10, %p1433_p4 }
  0xc7   : > { %p1429_p9 = pneg %p1428_p7 }
  0xc9   : > { %p1436_p12 = pnand %p1435_p11, %p1429_p9 }
  0xcb   : > { %1439 = shalt.err (!%p1436_p12)
}
  0xcc   : > { %1151 = dma.hbm_to_vmem [thread:$0]  (!%p1727_p6), %s2139_s8, 1024, %s367_s21, [#allocation15], %s2165_s28, %s2165_s28, %s1624_s26  }
  0xcd   : > { %s1629_s17 = smov [#allocation17]   ;;  %s1440_s10 = scalar_lea.hbm %s2140_s9, 16 }
  0xce   : > { %s380_s18 = sshll.u32 %s1629_s17, 4  ;;  %p1441_p13 = scmp.ne.s32.totalorder %s2140_s9, %s1440_s10  ;;  %s381_s18 = int_to_ptr.vmem [resolvable:$true] %s380_s18 }
  0xcf   : > { %p1447_p3 = scmp.lt.u32.totalorder %s1440_s10, %s2140_s9 }
  0xd0   : > { %p1443_p0 = pnand %p1441_p13, %p1743_p8 }
  0xd2   : > { %p1444_p1 = pneg %p1443_p0 }
  0xd4   : > { %p1449_p2 = pnand %p1447_p3, %p1444_p1 }
  0xd6   : > { %1452 = shalt.err (!%p1449_p2)
}
  0xd7   : > { %s1453_s26 = scalar_lea.vmem %s381_s18, 16  ;;  %s1460_s21 = scalar_lea.vmem %s381_s18, 32 }
  0xd8   : > { %p1454_p5 = scmp.ne.s32.totalorder %s381_s18, %s1453_s26  ;;  %p1461_p4 = scmp.lt.s32.totalorder %s381_s18, %s381_s18 }
  0xd9   : > { %p1462_p10 = scmp.lt.s32.totalorder %s1460_s21, %s1453_s26 }
  0xda   : > { %p1456_p7 = pnand %p1454_p5, %p1743_p8 }
  0xdb   : > { %p1463_p11 = por %p1462_p10, %p1461_p4 }
  0xdc   : > { %p1457_p9 = pneg %p1456_p7 }
  0xde   : > { %p1464_p12 = pnand %p1463_p11, %p1457_p9 }
  0xe0   : > { %1467 = shalt.err (!%p1464_p12)
}
  0xe1   : > { %1154 = dma.hbm_to_vmem [thread:$0]  (!%p1727_p6), %s2140_s9, 16, %s381_s18, [#allocation18]  }
  0xe2   : > { %s991_s11 = sadd.s32 4294967294, %s1618_s16   ;;  %s1913_s23 = sadd.s32 1, %s1618_s16  }
  0xe3   : > { %s37_s30 = ssub.s32 %s1618_s16, %s1913_s23  ;;  %s40_s17 = sadd.s32 1, %s1614_s15 }
  0xe4   : > { %p38_p8 = scmp.eq.s32.totalorder %s37_s30, 0  ;;  %p47_p13 = scmp.ne.s32.totalorder %s1614_s15, %s1610_s14 }
  0xe5   : > { %p48_p0 = scmp.eq.s32.totalorder %s1618_s16, 0  ;;  %p53_p1 = scmp.ne.s32.totalorder %s1610_s14, %s1606_s13 }
  0xe6   : > { %s1924_s22 = scalar_select %p38_p8, %s1614_s15, %s40_s17  }
  0xe7   : > { %p1926_p3 = por %p48_p0, %p47_p13  ;;  %p2167_p2 = scmp.eq.s32.totalorder %s1711_s19, 0 }
  0xe8   : > { %p271_p5 = scmp.eq.s32.totalorder %s1711_s19, 1  ;;  %p277_p7 = scmp.eq.s32.totalorder %s991_s11, 1 }
  0xe9   : > { %p1932_p6 = por %p2167_p2, %p53_p1  ;;  %p1174_p9 = scmp.lt.s32.totalorder %s1618_s16, 2 }
  0xea   : > { %s391_s10 = sand.u32 1, %s1614_s15   ;;  %p1939_p4 = por %p271_p5, %p47_p13 }
  0xeb   : > { %s2168_s18 = scalar_select %p1932_p6, 1, 0 }
  0xec   : > { %s2169_s25 = scalar_select %p1939_p4, 1, 0 }
  0xed   : > { %p1943_p10 = por %p277_p7, %p53_p1  ;;  %s1947_s20 = sshll.u32 %s391_s10, 3 }
  0xee   : > { %s1003_s12 = sshll.u32 %s1618_s16, 7  ;;  %s395_s24 = scalar_lea.vmem [#allocation2], %s1947_s20 }
  0xef   : > { %s2170_s29 = scalar_select %p1943_p10, 1, 0 }
  0xf0   : > { %s1953_s28 = scalar_lea.hbm %s2131_s0, %s1003_s12  ;;  %s402_s11 = sshll.u32 %s395_s24, 4  ;;  %s1956_s11 = int_to_ptr.vmem [resolvable:$true] %s402_s11 }
  0xf1   : > { %p1960_p11 = pnand %p1174_p9, %p1926_p3  ;;  %s1967_s26 = scalar_lea.hbm %s2132_s1, %s1003_s12 }
  0xf2   : > { %s409_s21 = sand.u32 1, %s1618_s16   ;;  %s392_s3 = scalar_lea.sflag [#allocation3], %s391_s10 }
  0xf3   : > { %s1468_s4 = scalar_lea.hbm %s1953_s28, 128  ;;  %p1470_p8 = pneg %p1960_p11 }
  0xf4   : > { %p1469_p12 = scmp.ne.s32.totalorder %s1953_s28, %s1468_s4  ;;  %s1473_s5 = scalar_lea.hbm %s2131_s0, 256 }
  0xf5   : > { %p1474_p1 = scmp.lt.u32.totalorder %s1953_s28, %s2131_s0  ;;  %p1475_p3 = scmp.lt.u32.totalorder %s1473_s5, %s1468_s4 }
  0xf6   : > { %p1471_p13 = pnand %p1470_p8, %p1469_p12  ;;  %p1477_p5 = scmp.lt.u32.totalorder %s1468_s4, %s1953_s28 }
  0xf7   : > { %p1476_p2 = por %p1475_p3, %p1474_p1 }
  0xf8   : > { %p1472_p0 = pneg %p1471_p13 }
  0xf9   : > { %p1478_p7 = por %p1477_p5, %p1476_p2 }
  0xfb   : > { %p1479_p9 = pnand %p1478_p7, %p1472_p0 }
  0xfd   : > { %1482 = shalt.err (!%p1479_p9)
}
  0xfe   : > { %s1483_s10 = scalar_lea.vmem %s1956_s11, 128  ;;  %s1630_s12 = smov [#allocation2]  }
  0xff   : > { %p1484_p12 = scmp.ne.s32.totalorder %s1956_s11, %s1483_s10  ;;  %s1488_s17 = sshll.u32 %s1630_s12, 4  ;;  %s1489_s17 = int_to_ptr.vmem [resolvable:$false] %s1488_s17 }
 0x100   : > { %s1490_s6 = scalar_lea.vmem %s1489_s17, 256  ;;  %p1491_p4 = scmp.lt.s32.totalorder %s1956_s11, %s1489_s17 }
 0x101   : > { %p1486_p13 = pnand %p1484_p12, %p1470_p8  ;;  %p1492_p1 = scmp.lt.s32.totalorder %s1490_s6, %s1483_s10 }
 0x103   : > { %p1487_p10 = pneg %p1486_p13  ;;  %p1493_p3 = por %p1492_p1, %p1491_p4 }
 0x105   : > { %p1494_p2 = pnand %p1493_p3, %p1487_p10 }
 0x107   : > { %1497 = shalt.err (!%p1494_p2)
}
 0x108   : > { %1158 = dma.hbm_to_vmem [thread:$0]  (!%p1960_p11), %s1953_s28, 128, %s1956_s11, %s392_s3  }
 0x109   : > { %s413_s4 = scalar_lea.vmem [#allocation5], %s1947_s20  ;;  %s410_s27 = scalar_lea.sflag [#allocation6], %s409_s21 }
 0x10a   : > { %s420_s5 = sshll.u32 %s413_s4, 4  ;;  %s1498_s24 = scalar_lea.hbm %s1967_s26, 128  ;;  %s421_s5 = int_to_ptr.vmem [resolvable:$true] %s420_s5 }
 0x10b   : > { %p1499_p4 = scmp.ne.s32.totalorder %s1967_s26, %s1498_s24  ;;  %s1503_s12 = scalar_lea.hbm %s2132_s1, 256 }
 0x10c   : > { %p1504_p5 = scmp.lt.u32.totalorder %s1967_s26, %s2132_s1  ;;  %p1505_p7 = scmp.lt.u32.totalorder %s1503_s12, %s1498_s24 }
 0x10d   : > { %p1501_p10 = pnand %p1499_p4, %p1470_p8  ;;  %p1507_p12 = scmp.lt.u32.totalorder %s1498_s24, %s1967_s26 }
 0x10e   : > { %p1506_p9 = por %p1505_p7, %p1504_p5 }
 0x10f   : > { %p1502_p0 = pneg %p1501_p10 }
 0x110   : > { %p1508_p13 = por %p1507_p12, %p1506_p9 }
 0x112   : > { %p1509_p1 = pnand %p1508_p13, %p1502_p0 }
 0x114   : > { %1512 = shalt.err (!%p1509_p1)
}
 0x115   : > { %s1513_s3 = scalar_lea.vmem %s421_s5, 128  ;;  %s1631_s20 = smov [#allocation5]  }
 0x116   : > { %p1514_p3 = scmp.ne.s32.totalorder %s421_s5, %s1513_s3  ;;  %s1518_s28 = sshll.u32 %s1631_s20, 4  ;;  %s1519_s28 = int_to_ptr.vmem [resolvable:$false] %s1518_s28 }
 0x117   : > { %s1520_s11 = scalar_lea.vmem %s1519_s28, 256  ;;  %p1521_p10 = scmp.lt.s32.totalorder %s421_s5, %s1519_s28 }
 0x118   : > { %p1516_p2 = pnand %p1514_p3, %p1470_p8  ;;  %p1522_p6 = scmp.lt.s32.totalorder %s1520_s11, %s1513_s3 }
 0x11a   : > { %p1517_p4 = pneg %p1516_p2  ;;  %p1523_p5 = por %p1522_p6, %p1521_p10 }
 0x11c   : > { %p1524_p7 = pnand %p1523_p5, %p1517_p4 }
 0x11e   : > { %1527 = shalt.err (!%p1524_p7)
}
 0x11f   : > { %1161 = dma.hbm_to_vmem [thread:$0]  (!%p1960_p11), %s1967_s26, 128, %s421_s5, %s410_s27  }
 0x120   : > { %s2172_s21 = sld [smem:[#allocation28_spill]] }
 0x126   : > { %p2173_p0 = scmp.ne.s32.totalorder %s2172_s21, 0 }
 0x127   : > { %s2020_s4 = sand.u32 (!%p2173_p0), 1, %s1610_s14   ;;  %p2174_p6 = scmp.ne.s32.totalorder (!%p2173_p0), %s2168_s18, 0 }
 0x128   : > { %429 = sbr.rel (%p2173_p0) target bundleno = 1327 (0x52f), region = 60  ;;  %s2023_s24 = sshll.u32 (!%p2173_p0), %s2020_s4, 3 }
 0x129   : > { %s432_s2 = scalar_lea.sflag (!%p2173_p0), [#allocation3], %s2020_s4  ;;  %s435_s10 = scalar_lea.vmem (!%p2173_p0), [#allocation2], %s2023_s24 }
 0x12f   : > { %1573 = dma.done.wait (%p2174_p6), %s432_s2, 128  }
 0x130   : > { %1575 = vsyncadd (%p2174_p6), %s432_s2, 4294967168  ;;  %s440_s30 = sand.u32 1, %s1711_s19   ;;  %s444_s5 = scalar_lea.vmem [#allocation5], %s2023_s24 }
 0x131   : > { %s441_s26 = scalar_lea.sflag [#allocation6], %s440_s30 }
 0x132   : > { %1577 = dma.done.wait (%p2174_p6), %s441_s26, 128  }
 0x133   : > { %1579 = vsyncadd (%p2174_p6), %s441_s26, 4294967168  ;;  %p2175_p11 = scmp.eq.s32.totalorder %s1711_s19, 0 }
 0x135   : > { %1581 = dma.done.wait (%p2175_p11), [#allocation6], 256   ;;  %p2176_p8 = pmov %p2175_p11 }
 0x137   : > { %1583 = vsyncadd (%p2176_p8), [#allocation6], 4294967040  ;;  %p2177_p9 = pmov %p2176_p8 }
 0x138   : > { %p2178_p12 = pmov %p2176_p8 }
 0x139   : > { %1585 = dma.done.wait (%p2177_p9), [#allocation9], 32  }
 0x13a   : > { %1587 = vsyncadd (%p2178_p12), [#allocation9], 4294967264  ;;  %p2179_p13 = pmov %p2176_p8 }
 0x13b   : > { %p2180_p1 = pmov %p2176_p8 }
 0x13c   : > { %1589 = dma.done.wait (%p2179_p13), [#allocation12], 272  }
 0x13d   : > { %1591 = vsyncadd (%p2180_p1), [#allocation12], 4294967024  ;;  %p2181_p3 = pmov %p2180_p1 }
 0x13e   : > { %p2182_p2 = pmov %p2180_p1 }
 0x13f   : > { %1593 = dma.done.wait (%p2181_p3), [#allocation15], 1040  }
 0x140   : > { %1595 = vsyncadd (%p2182_p2), [#allocation15], 4294966256  ;;  %p2183_p4 = pmov %p2180_p1 }
 0x141   : > { %p2184_p10 = pmov %p2180_p1 }
 0x142   : > { %1597 = dma.done.wait (%p2183_p4), [#allocation18], 16  }
 0x143   : > { %1599 = vsyncadd (%p2184_p10), [#allocation18], 4294967280  ;;  %v1632_v0 = vmov 0.0   ;;  %vm1633_vm0 = vmmov 0   ;;  %v1228_v1 = vld [vmem:[#allocation7] sm:$0xff]   ;;  %v1229_v2 = vld [vmem:[#allocation7 + $0x8] sm:$0xff]  }
 0x144   : > { %1056 = vmatprep.subr.bf16.mxu1 %v1632_v0  ;;  %1060 = vmatprep.mubr.msk.bf16.mxu1 %vm1633_vm0, %v1632_v0  ;;  %v520_v3 = vld [vmem:[%s435_s10] sm:$0xff]  ;;  %vm538_vm1 = vcmask 261120   ;;  %v519_v5 = vld [vmem:[%s444_s5] sm:$0xff]  ;;  %s1038_s18 = sshll.u32 %s1711_s19, 7  ;;  %s517_s27 = scalar_lea.vmem [#allocation19], %s2023_s24 }
 0x145   : > { %1072 = vmatprep.subr.bf16.mxu0 %v1632_v0  ;;  %1088 = vmatprep.mubr.msk.bf16.mxu0 %vm1633_vm0, %v1632_v0  ;;  %v521_v4 = vpack.c.bf16 %v520_v3, %v520_v3  ;;  %v1021_v7 = vld [vmem:[#allocation8] ss:$0 sm:$0xff]  ;;  %v1230_v19 = vld [vmem:[#allocation13] sm:$0xff]   ;;  %v1231_v20 = vld [vmem:[#allocation13 + $0x8] sm:$0xff]   ;;  %s822_s12 = sshll.u32 %s517_s27, 4  ;;  %s2185_s3 = sld [smem:[#allocation34_spill]]  ;;  %s2088_s12 = int_to_ptr.vmem [resolvable:$true] %s822_s12 }
 0x146   : > { %1057 = vmatpush3.bf16.msra.mxu1 %v1228_v1  ;;  %v1232_v21 = vld [vmem:[#allocation16] sm:$0xff]   ;;  %v1233_v22 = vld [vmem:[#allocation16 + $0x8] sm:$0xff]   ;;  %v1234_v23 = vld [vmem:[#allocation16 + $0x10] sm:$0xff]   ;;  %s809_s19 = scalar_lea.sflag [#allocation4], %s2020_s4  ;;  %s1528_s28 = scalar_lea.vmem %s2088_s12, 128 }
 0x147   : > { %1058 = vmatprep.subr.bf16.mxu1 %v1632_v0  ;;  %1073 = vmatpush3.bf16.msra.mxu0 %v1232_v21  ;;  %v1022_v28 = vld [vmem:[#allocation10] ss:$0 sm:$0xff]  ;;  %v1023_v30 = vld [vmem:[#allocation11] ss:$0 sm:$0xff]  ;;  %v1235_v34 = vld [vmem:[#allocation16 + $0x18] sm:$0xff]   ;;  %p1529_p5 = scmp.ne.s32.totalorder %s2088_s12, %s1528_s28  ;;  %p2186_p7 = scmp.ne.s32.totalorder %s2169_s25, 0 }
 0x148   : > { %1074 = vmatprep.subr.bf16.mxu0 %v1632_v0  ;;  %v1236_v35 = vld [vmem:[#allocation16 + $0x20] sm:$0xff]   ;;  %v1237_v36 = vld [vmem:[#allocation16 + $0x28] sm:$0xff]   ;;  %v1238_v37 = vld [vmem:[#allocation16 + $0x30] sm:$0xff]   ;;  %s1634_s11 = smov [#allocation19]  }
 0x149   : > { %v1239_v38 = vld [vmem:[#allocation16 + $0x38] sm:$0xff]   ;;  %v1036_v52 = vld [vmem:[#allocation17] ss:$0 sm:$0xff]  ;;  %p1530_p0 = pnand %p1529_p5, %p2186_p7  ;;  %s1532_s21 = sshll.u32 %s1634_s11, 4  ;;  %s1533_s21 = int_to_ptr.vmem [resolvable:$false] %s1532_s21 }
 0x14a   : > { %1059 = vmatpush3.bf16.msra.mxu1 %v1229_v2  ;;  %v1024_v39 = vld [vmem:[#allocation14] ss:$0 sm:$0xff]  ;;  %s1534_s24 = scalar_lea.vmem %s1533_s21, 256  ;;  %p1535_p11 = scmp.lt.s32.totalorder %s2088_s12, %s1533_s21 }
 0x14b   : > { %1064 = vmatprep.subr.bf16.mxu1 %v1632_v0  ;;  %1075 = vmatpush3.bf16.msra.mxu0 %v1233_v22  ;;  %s2086_s20 = scalar_lea.hbm %s2185_s3, %s1038_s18  ;;  %p1531_p6 = pneg %p1530_p0 }
 0x14c   : > { %1076 = vmatprep.subr.bf16.mxu0 %v1632_v0  ;;  %p1536_p8 = scmp.lt.s32.totalorder %s1534_s24, %s1528_s28 }
 0x14d   : > { %1061 = vmatmul.mubr.msk.bf16.vlgmr.msra.gmra.mrb[0].mxu1 %vm538_vm1, %v521_v4 }
 0x14e   : > { %1068 = vmatprep.mubr.msk.bf16.mxu1 %vm1633_vm0, %v1632_v0  ;;  %1065 = vmatpush3.bf16.msra.mxu1 %v1230_v19  ;;  %p1537_p9 = por %p1536_p8, %p1535_p11 }
 0x14f   : > { %1066 = vmatprep.subr.bf16.mxu1 %v1632_v0  ;;  %1077 = vmatpush3.bf16.msra.mxu0 %v1234_v23 }
 0x150   : > { %1078 = vmatprep.subr.bf16.mxu0 %v1632_v0  ;;  %p1538_p12 = pnand %p1537_p9, %p1531_p6 }
 0x152   : > { %1067 = vmatpush3.bf16.msra.mxu1 %v1231_v20 }
 0x153   : > { %1079 = vmatpush3.bf16.msra.mxu0 %v1235_v34 }
 0x154   : > { %1080 = vmatprep.subr.bf16.mxu0 %v1632_v0 }
 0x157   : > { %1081 = vmatpush3.bf16.msra.mxu0 %v1236_v35 }
 0x158   : > { %1082 = vmatprep.subr.bf16.mxu0 %v1632_v0 }
 0x15b   : > { %1083 = vmatpush3.bf16.msra.mxu0 %v1237_v36 }
 0x15c   : > { %1084 = vmatprep.subr.bf16.mxu0 %v1632_v0 }
 0x15f   : > { %1085 = vmatpush3.bf16.msra.mxu0 %v1238_v37 }
 0x160   : > { %1086 = vmatprep.subr.bf16.mxu0 %v1632_v0 }
 0x163   : > { %1087 = vmatpush3.bf16.msra.mxu0 %v1239_v38 }
 0x220   : > { %v576_v6 = vpop.f32.mrb[0].mxu1 }
 0x221   : > { %v582_v8 = vadd.f32 %v576_v6, %v519_v5  ;;  %v1062_v9 = vpop.f32.mrb[1].mxu1 }
 0x222   : > { %v579_v10 = vpop.f32.mrb[2].mxu1 }
 0x223   : > { %v2065_v11 = vadd.f32 %v1021_v7, %v582_v8  ;;  %v1063_v12 = vpop.f32.mrb[3].mxu1 }
 0x225   : > { %v593_v13 = vsel %vm538_vm1, %v2065_v11, 0.0 }
 0x226   : > { %594 = vadd.xlane.f32.xlu0 %v593_v13 }
 0x2b3   : > { %v595_v14 = vpop.xlane.xlu0 %594 }
 0x2b4   : > { %v597_v15 = vmul.f32 0.03125, %v595_v14 }
 0x2b6   : > { %v598_v16 = vsub.f32 %v2065_v11, %v597_v15 }
 0x2b8   : > { %v599_v17 = vmul.f32 %v598_v16, %v598_v16 }
 0x2ba   : > { %v600_v18 = vsel %vm538_vm1, %v599_v17, 0.0 }
 0x2bb   : > { %601 = vadd.xlane.f32.xlu0 %v600_v18 }
 0x348   : > { %v602_v24 = vpop.xlane.xlu0 %601 }
 0x349   : > { %v603_v25 = vmul.f32 0.03125, %v602_v24 }
 0x34b   : > { %v604_v26 = vadd.f32 1e-05, %v603_v25 }
 0x34d   : > { %1240 = vrsqrt.f32 %v604_v26 }
 0x357   : > { %v1241_v27 = vpop.eup %1240 }
 0x358   : > { %v606_v29 = vmul.f32 %v1241_v27, %v598_v16 }
 0x35a   : > { %v613_v31 = vmul.f32 %v1022_v28, %v606_v29 }
 0x35c   : > { %v620_v32 = vadd.f32 %v1023_v30, %v613_v31 }
 0x35e   : > { %v621_v33 = vpack.c.bf16 %v620_v32, %v620_v32 }
 0x360   : > { %1069 = vmatmul.mubr.msk.bf16.vlgmr.msra.gmra.mrb[4].mxu1 %vm538_vm1, %v621_v33 }
 0x433   : > { %v682_v40 = vpop.f32.mrb[4].mxu1 }
 0x434   : > { %v683_v41 = vadd.f32 %v1024_v39, %v682_v40  ;;  %v1070_v42 = vpop.f32.mrb[5].mxu1 }
 0x435   : > { %v685_v43 = vpop.f32.mrb[6].mxu1 }
 0x436   : > { %v689_v44 = vmul.f32 0.70710677, %v683_v41  ;;  %v1071_v45 = vpop.f32.mrb[7].mxu1  ;;  %v688_v47 = vmul.f32 0.5, %v683_v41 }
 0x438   : > { %1242 = verf.f32 %v689_v44 }
 0x442   : > { %v1243_v46 = vpop.eup %1242 }
 0x443   : > { %v691_v48 = vadd.f32 1.0, %v1243_v46 }
 0x445   : > { %v692_v49 = vmul.f32 %v691_v48, %v688_v47 }
 0x447   : > { %v693_v50 = vpack.c.bf16 %v692_v49, %v692_v49 }
 0x449   : > { %1089 = vmatmul.mubr.bf16.vlgmr.msra.gmra.mrb[0].mxu0 %v693_v50 }
 0x51c   : > { %v792_v51 = vpop.f32.mrb[0].mxu0 }
 0x51d   : > { %v798_v53 = vadd.f32 %v792_v51, %v2065_v11  ;;  %v1090_v54 = vpop.f32.mrb[1].mxu0 }
 0x51e   : > { %v795_v55 = vpop.f32.mrb[2].mxu0 }
 0x51f   : > { %v806_v56 = vadd.f32 %v1036_v52, %v798_v53  ;;  %v1091_v57 = vpop.f32.mrb[3].mxu0 }
 0x521   : > { %807 = vst.msk [vmem:[%s517_s27] sm:$0xff] %vm538_vm1, %v806_v56 }
 0x522   : > { %1541 = shalt.err (!%p1538_p12)
}
 0x523   : > { %s1542_s4 = scalar_lea.hbm %s2086_s20, 128  ;;  %s1546_s30 = scalar_lea.hbm %s2185_s3, 256 }
 0x524   : > { %p1543_p13 = scmp.ne.s32.totalorder %s2086_s20, %s1542_s4  ;;  %p1547_p2 = scmp.lt.u32.totalorder %s2086_s20, %s2185_s3 }
 0x525   : > { %p1548_p4 = scmp.lt.u32.totalorder %s1546_s30, %s1542_s4  ;;  %p1550_p5 = scmp.lt.u32.totalorder %s1542_s4, %s2086_s20 }
 0x526   : > { %p1544_p1 = pnand %p1543_p13, %p2186_p7 }
 0x527   : > { %p1549_p10 = por %p1548_p4, %p1547_p2 }
 0x528   : > { %p1545_p3 = pneg %p1544_p1 }
 0x529   : > { %p1551_p0 = por %p1550_p5, %p1549_p10 }
 0x52b   : > { %p1552_p6 = pnand %p1551_p0, %p1545_p3 }
 0x52d   : > { %1555 = shalt.err (!%p1552_p6)
}
 0x52e   : > { %1128 = dma.vmem_to_hbm [thread:$0]  (%p2186_p7), %s2088_s12, 128, %s2086_s20, %s809_s19  }
 0x52f PF: > { %s834_s18 = sand.u32 1, %s1606_s13   ;;  %p2187_p11 = scmp.ne.s32.totalorder %s2170_s29, 0 }
 0x530   : > { %p2188_p8 = scmp.ge.s32.totalorder %s1618_s16, 2  ;;  %s835_s27 = scalar_lea.sflag [#allocation4], %s834_s18 }
 0x532   : > { %p1163_p9 = pnand %p2188_p8, %p2187_p11 }
 0x534   : > { %1601 = dma.done.wait (!%p1163_p9), %s835_s27, 128  }
 0x535   : > { %1603 = vsyncadd (!%p1163_p9), %s835_s27, 4294967168  ;;  %p30_p12 = scmp.ge.s32.totalorder %s1913_s23, 4   ;;  %s2189_s13 = smov %s1610_s14 }
 0x536   : > { %s2190_s14 = smov %s1614_s15  ;;  %s2191_s15 = smov %s1924_s22 }
 0x537   : > { %s2192_s16 = smov %s1913_s23  ;;  %32 = sbr.rel (!%p30_p12) target bundleno = 18 (0x12), region = 150 }
 0x53e   :  { %840 = vsyncpa [#allocation3], 1 }
 0x53f   :  { %842 = vsyncpa [#allocation3 + $0x1], 1 }
 0x540   :  { %843 = vsyncpa [#allocation6], 1 }
 0x541   :  { %845 = vsyncpa [#allocation6 + $0x1], 1 }
 0x542   :  { %846 = vsyncpa [#allocation9], 1 }
 0x543   :  { %847 = vsyncpa [#allocation12], 1 }
 0x544   :  { %848 = vsyncpa [#allocation15], 1 }
 0x545   :  { %849 = vsyncpa [#allocation18], 1 }
 0x546   :  { %850 = vsyncpa [#allocation4], 1 }
 0x547   :  { %852 = vsyncpa [#allocation4 + $0x1], 1 }

// kernel: _lambda_.16
= control target key start
LH: loop header
LB: loop body
LE: loop exit
PB: predicated region body
PF: predicated region fallthrough
CT: control target
= control target key end

     0   :  { %s1977_s0 = inlined_call_operand.hbm [shape: f32[2,4,8,8], index: 0, kind: input, shape index: {}]   ;;  %s1978_s1 = inlined_call_operand.hbm [shape: f32[2,4,8,8], index: 1, kind: input, shape index: {}]   ;;  %s1979_s2 = inlined_call_operand.hbm [shape: f32[2,4,8,8], index: 2, kind: input, shape index: {}]   ;;  %s1980_s3 = inlined_call_operand.hbm [shape: f32[8,8], index: 3, kind: input, shape index: {}]   ;;  %s1981_s4 = inlined_call_operand.hbm [shape: f32[8,8], index: 4, kind: input, shape index: {}]   ;;  %s1982_s5 = inlined_call_operand.hbm [shape: f32[2,4,8,8], index: 5, kind: output, shape index: {}]  }
   0x1   :  { %1998 = sst [smem:[#allocation19_spill]] %s1978_s1 }
   0x2   :  { %1999 = sst [smem:[#allocation20_spill]] %s1980_s3 }
   0x3   :  { %10 = vsyncpa [#allocation3], 0 }
   0x4   :  { %12 = vsyncpa [#allocation3 + $0x1], 0 }
   0x5   :  { %13 = vsyncpa [#allocation6], 0 }
   0x6   :  { %15 = vsyncpa [#allocation6 + $0x1], 0 }
   0x7   :  { %16 = vsyncpa [#allocation9], 0 }
   0x8   :  { %17 = vsyncpa [#allocation4], 0 }
   0x9   :  { %19 = vsyncpa [#allocation4 + $0x1], 0  ;;  %s1534_s18 = smov 0   ;;  %s1536_s19 = smov 0  }
   0xa   :  { %s1538_s20 = smov 0   ;;  %s1540_s21 = smov 0  }
   0xb LB: > { %2000 = sst [smem:[#allocation16_spill]] %s1488_s21  ;;  %s1555_s22 = sadd.s32 4294967295, %s1488_s21   ;;  %s1488_s21 = sphi %s1540_s21, %s2031_s21   ;;  %s1484_s20 = sphi %s1538_s20, %s2035_s20   ;;  %s1480_s19 = sphi %s1536_s19, %s2034_s19   ;;  %s1476_s18 = sphi %s1534_s18, %s2033_s18  }
   0xc   : > { %s1065_s23 = sadd.s32 4294967294, %s1488_s21   ;;  %s1559_s24 = sadd.s32 1, %s1488_s21  }
   0xd   : > { %2001 = sst [smem:[#allocation17_spill]] %s1559_s24  ;;  %s32_s25 = sadd.s32 1, %s1484_s20 }
   0xe   : > { %s29_s26 = ssub.s32 %s1488_s21, %s1559_s24  ;;  %p39_p0 = scmp.ne.s32.totalorder %s1484_s20, %s1480_s19 }
   0xf   : > { %p30_p1 = scmp.eq.s32.totalorder %s29_s26, 0  ;;  %p40_p2 = scmp.eq.s32.totalorder %s1488_s21, 0 }
  0x10   : > { %p45_p3 = scmp.ne.s32.totalorder %s1480_s19, %s1476_s18  ;;  %p1983_p4 = scmp.eq.s32.totalorder %s1555_s22, 0 }
  0x11   : > { %s1571_s27 = scalar_select %p30_p1, %s1484_s20, %s32_s25  }
  0x12   : > { %p1573_p5 = por %p40_p2, %p39_p0  ;;  %p1579_p6 = por %p1983_p4, %p45_p3 }
  0x13   : > { %2002 = sst [smem:[#allocation18_spill]] %s1571_s27  ;;  %p163_p7 = scmp.eq.s32.totalorder %s1555_s22, 1 }
  0x14   : > { %s2004_s29 = scalar_select %p1579_p6, 1, 0 }
  0x15   : > { %p169_p8 = scmp.eq.s32.totalorder %s1065_s23, 1  ;;  %p1066_p9 = scmp.ge.s32.totalorder %s1488_s21, 1 }
  0x16   : > { %p176_p10 = scmp.lt.s32.totalorder %s1488_s21, 3  ;;  %p1586_p11 = por %p163_p7, %p39_p0 }
  0x17   : > { %p1590_p12 = por %p169_p8, %p45_p3  ;;  %s1490_s8 = smov [#allocation8]  }
  0x18   : > { %s2005_s30 = scalar_select %p1586_p11, 1, 0 }
  0x19   : > { %s2006_s6 = scalar_select %p1590_p12, 1, 0 }
  0x1a   : > { %p1594_p13 = pnand %p1066_p9, %p176_p10  ;;  %s189_s9 = sshll.u32 %s1490_s8, 4  ;;  %s190_s9 = int_to_ptr.vmem [resolvable:$true] %s189_s9 }
  0x1b   : > { %p1206_p4 = scmp.lt.s32.totalorder %s1488_s21, 2  ;;  %p2008_p0 = scmp.eq.s32.totalorder %s1555_s22, 0 }
  0x1c   : > { %s2007_s7 = scalar_select %p1594_p13, 1, 0 }
  0x1d   : > { %p1183_p2 = pneg %p1594_p13  ;;  %s1988_s11 = sand.u32 1, %s1484_s20  }
  0x1e   : > { %p1611_p3 = pnand %p1206_p4, %p1573_p5  ;;  %s1617_s13 = sshll.u32 %s1988_s11, 5 }
  0x1f   : > { %p1604_p7 = pnand %p1183_p2, %p2008_p0  ;;  %s1620_s14 = sshll.u32 %s1488_s21, 9 }
  0x20   : > { %s2010_s12 = scalar_select %p1611_p3, 1, 0 }
  0x21   : > { %s2009_s10 = scalar_select %p1604_p7, 1, 0 }
  0x22   : > { %s2011_s3 = sld [smem:[#allocation20_spill]]  ;;  %p1989_p9 = pneg %p1604_p7 }
  0x28   : > { %s1268_s17 = scalar_lea.hbm %s2011_s3, 128 }
  0x29   : > { %p1269_p8 = scmp.ne.s32.totalorder %s2011_s3, %s1268_s17  ;;  %p1275_p10 = scmp.lt.u32.totalorder %s1268_s17, %s2011_s3 }
  0x2b   : > { %p1271_p4 = pnand %p1989_p9, %p1269_p8 }
  0x2d   : > { %p1272_p5 = pneg %p1271_p4 }
  0x2f   : > { %p1277_p2 = pnand %p1275_p10, %p1272_p5 }
  0x31   : > { %1280 = shalt.err (!%p1277_p2)
}
  0x32   : > { %s1281_s8 = scalar_lea.vmem %s190_s9, 128  ;;  %p1289_p11 = scmp.lt.s32.totalorder %s190_s9, %s190_s9 }
  0x33   : > { %p1282_p0 = scmp.ne.s32.totalorder %s190_s9, %s1281_s8  ;;  %p1290_p6 = scmp.lt.s32.totalorder %s1281_s8, %s1281_s8 }
  0x35   : > { %p1284_p1 = pnand %p1282_p0, %p1989_p9  ;;  %p1291_p13 = por %p1290_p6, %p1289_p11 }
  0x37   : > { %p1285_p12 = pneg %p1284_p1 }
  0x39   : > { %p1292_p3 = pnand %p1291_p13, %p1285_p12 }
  0x3b   : > { %1295 = shalt.err (!%p1292_p3)
}
  0x3c   : > { %1186 = dma.hbm_to_vmem [thread:$0]  (!%p1604_p7), %s2011_s3, 128, %s190_s9, [#allocation9]  }
  0x3d   : > { %s232_s17 = sand.u32 1, %s1488_s21   ;;  %s2012_s1 = sld [smem:[#allocation19_spill]] }
  0x3e   : > { %s236_s28 = scalar_lea.vmem [#allocation5], %s1617_s13  ;;  %s1654_s15 = scalar_lea.sflag [#allocation6], %s232_s17 }
  0x3f   : > { %s243_s8 = sshll.u32 %s236_s28, 4  ;;  %p2013_p11 = scmp.ne.s32.totalorder %s2010_s12, 0  ;;  %s1652_s8 = int_to_ptr.vmem [resolvable:$true] %s243_s8 }
  0x41   : > { %p1660_p12 = pneg %p2013_p11 }
  0x43   : > { %s1649_s26 = scalar_lea.hbm %s2012_s1, %s1620_s14  ;;  %s1301_s11 = scalar_lea.hbm %s2012_s1, 1024 }
  0x44   : > { %s1296_s16 = scalar_lea.hbm %s1649_s26, 512  ;;  %p1302_p3 = scmp.lt.u32.totalorder %s1649_s26, %s2012_s1 }
  0x45   : > { %p1297_p6 = scmp.ne.s32.totalorder %s1649_s26, %s1296_s16  ;;  %p1303_p8 = scmp.lt.u32.totalorder %s1301_s11, %s1296_s16 }
  0x46   : > { %s2014_s9 = scalar_select %p1660_p12, 1, 0 }
  0x47   : > { %p1299_p13 = pnand %p1660_p12, %p1297_p6  ;;  %p1304_p4 = por %p1303_p8, %p1302_p3 }
  0x48   : > { %p1305_p5 = scmp.lt.u32.totalorder %s1296_s16, %s1649_s26 }
  0x49   : > { %p1300_p1 = pneg %p1299_p13 }
  0x4a   : > { %p1306_p10 = por %p1305_p5, %p1304_p4 }
  0x4c   : > { %p1307_p2 = pnand %p1306_p10, %p1300_p1 }
  0x4e   : > { %1310 = shalt.err (!%p1307_p2)
}
  0x4f   : > { %s1311_s17 = scalar_lea.vmem %s1652_s8, 512  ;;  %s1491_s23 = smov [#allocation5]  }
  0x50   : > { %p1312_p0 = scmp.ne.s32.totalorder %s1652_s8, %s1311_s17  ;;  %s1316_s25 = sshll.u32 %s1491_s23, 4  ;;  %s1317_s25 = int_to_ptr.vmem [resolvable:$false] %s1316_s25 }
  0x51   : > { %s1318_s3 = scalar_lea.vmem %s1317_s25, 1024  ;;  %p1319_p9 = scmp.lt.s32.totalorder %s1652_s8, %s1317_s25 }
  0x52   : > { %p1314_p6 = pnand %p1312_p0, %p1660_p12  ;;  %p1320_p7 = scmp.lt.s32.totalorder %s1318_s3, %s1311_s17 }
  0x54   : > { %p1315_p13 = pneg %p1314_p6  ;;  %p1321_p3 = por %p1320_p7, %p1319_p9 }
  0x56   : > { %p1322_p8 = pnand %p1321_p3, %p1315_p13 }
  0x58   : > { %1325 = shalt.err (!%p1322_p8)
}
  0x59   : > { %s1492_s11 = smov 128   ;;  %s1493_s16 = smov 8  }
  0x5a   : > { %1196 = dma.hbm_to_vmem [thread:$0]  (!%p2013_p11), %s1649_s26, 512, %s1652_s8, %s1654_s15, %s1492_s11, %s1492_s11, %s1493_s16  }
  0x5b   : > { %s1494_s28 = smov [#allocation10]   ;;  %s1326_s3 = scalar_lea.hbm %s1981_s4, 128 }
  0x5c   : > { %s200_s23 = sshll.u32 %s1494_s28, 4  ;;  %p1327_p7 = scmp.ne.s32.totalorder %s1981_s4, %s1326_s3  ;;  %s201_s23 = int_to_ptr.vmem [resolvable:$true] %s200_s23 }
  0x5d   : > { %p2015_p9 = scmp.ne.s32.totalorder %s2009_s10, 0  ;;  %p1333_p10 = scmp.lt.u32.totalorder %s1326_s3, %s1981_s4 }
  0x5f   : > { %p2016_p1 = pneg %p2015_p9 }
  0x61   : > { %p1329_p4 = pnand %p1327_p7, %p2016_p1 }
  0x63   : > { %p1330_p5 = pneg %p1329_p4 }
  0x65   : > { %p1335_p2 = pnand %p1333_p10, %p1330_p5 }
  0x67   : > { %1338 = shalt.err (!%p1335_p2)
}
  0x68   : > { %s1339_s26 = scalar_lea.vmem %s201_s23, 128  ;;  %p2017_p6 = pmov %p2016_p1 }
  0x69   : > { %p1340_p0 = scmp.ne.s32.totalorder %s201_s23, %s1339_s26  ;;  %p1347_p8 = scmp.lt.s32.totalorder %s201_s23, %s201_s23 }
  0x6a   : > { %p1348_p11 = scmp.lt.s32.totalorder %s1339_s26, %s1339_s26 }
  0x6b   : > { %p1342_p13 = pnand %p1340_p0, %p2017_p6 }
  0x6c   : > { %p1349_p12 = por %p1348_p11, %p1347_p8 }
  0x6d   : > { %p1343_p3 = pneg %p1342_p13 }
  0x6f   : > { %p1350_p1 = pnand %p1349_p12, %p1343_p3 }
  0x71   : > { %1353 = shalt.err (!%p1350_p1)
}
  0x72   : > { %1189 = dma.hbm_to_vmem [thread:$0]  (!%p2015_p9), %s1981_s4, 128, %s201_s23, [#allocation9]  }
  0x73   : > { %s1711_s8 = scalar_lea.hbm %s1977_s0, %s1620_s14  ;;  %s215_s28 = scalar_lea.vmem [#allocation2], %s1617_s13 }
  0x74   : > { %s222_s25 = sshll.u32 %s215_s28, 4  ;;  %s2018_s10 = sand.u32 1, %s1484_s20   ;;  %s1714_s25 = int_to_ptr.vmem [resolvable:$true] %s222_s25 }
  0x75   : > { %s1718_s17 = scalar_lea.sflag [#allocation3], %s2018_s10  ;;  %s1354_s3 = scalar_lea.hbm %s1711_s8, 512 }
  0x76   : > { %p1355_p11 = scmp.ne.s32.totalorder %s1711_s8, %s1354_s3  ;;  %p2019_p12 = scmp.ne.s32.totalorder %s2014_s9, 0 }
  0x77   : > { %s1359_s1 = scalar_lea.hbm %s1977_s0, 1024  ;;  %p1360_p4 = scmp.lt.u32.totalorder %s1711_s8, %s1977_s0 }
  0x78   : > { %p1357_p7 = pnand %p1355_p11, %p2019_p12  ;;  %p1361_p5 = scmp.lt.u32.totalorder %s1359_s1, %s1354_s3 }
  0x79   : > { %p1363_p2 = scmp.lt.u32.totalorder %s1354_s3, %s1711_s8 }
  0x7a   : > { %p1358_p9 = pneg %p1357_p7  ;;  %p1362_p10 = por %p1361_p5, %p1360_p4 }
  0x7c   : > { %p1364_p0 = por %p1363_p2, %p1362_p10 }
  0x7e   : > { %p1365_p6 = pnand %p1364_p0, %p1358_p9 }
  0x80   : > { %1368 = shalt.err (!%p1365_p6)
}
  0x81   : > { %s1369_s24 = scalar_lea.vmem %s1714_s25, 512  ;;  %s1495_s28 = smov [#allocation2]  }
  0x82   : > { %p1370_p13 = scmp.ne.s32.totalorder %s1714_s25, %s1369_s24  ;;  %s1374_s10 = sshll.u32 %s1495_s28, 4  ;;  %s1375_s10 = int_to_ptr.vmem [resolvable:$false] %s1374_s10 }
  0x83   : > { %s1376_s23 = scalar_lea.vmem %s1375_s10, 1024  ;;  %p1377_p1 = scmp.lt.s32.totalorder %s1714_s25, %s1375_s10 }
  0x84   : > { %p1372_p3 = pnand %p1370_p13, %p2019_p12  ;;  %p1378_p11 = scmp.lt.s32.totalorder %s1376_s23, %s1369_s24 }
  0x86   : > { %p1373_p8 = pneg %p1372_p3  ;;  %p1379_p7 = por %p1378_p11, %p1377_p1 }
  0x88   : > { %p1380_p4 = pnand %p1379_p7, %p1373_p8 }
  0x8a   : > { %1383 = shalt.err (!%p1380_p4)
}
  0x8b   : > { %p2020_p9 = scmp.ne.s32.totalorder %s2010_s12, 0  ;;  %s1749_s1 = scalar_lea.hbm %s1979_s2, %s1620_s14 }
  0x8c   : > { %s257_s27 = scalar_lea.vmem [#allocation7], %s1617_s13  ;;  %s1384_s24 = scalar_lea.hbm %s1749_s1, 512 }
  0x8d   : > { %1193 = dma.hbm_to_vmem [thread:$0]  (!%p2020_p9), %s1711_s8, 512, %s1714_s25, %s1718_s17, %s1492_s11, %s1492_s11, %s1493_s16  }
  0x8e   : > { %s264_s21 = sshll.u32 %s257_s27, 4  ;;  %p1385_p5 = scmp.ne.s32.totalorder %s1749_s1, %s1384_s24  ;;  %s1752_s21 = int_to_ptr.vmem [resolvable:$true] %s264_s21 }
  0x8f   : > { %s1389_s25 = scalar_lea.hbm %s1979_s2, 1024  ;;  %p1390_p0 = scmp.lt.u32.totalorder %s1749_s1, %s1979_s2 }
  0x90   : > { %p1387_p10 = pnand %p1385_p5, %p2019_p12  ;;  %p1391_p6 = scmp.lt.u32.totalorder %s1389_s25, %s1384_s24 }
  0x91   : > { %p1393_p3 = scmp.lt.u32.totalorder %s1384_s24, %s1749_s1 }
  0x92   : > { %p1388_p2 = pneg %p1387_p10  ;;  %p1392_p13 = por %p1391_p6, %p1390_p0 }
  0x94   : > { %p1394_p8 = por %p1393_p3, %p1392_p13 }
  0x96   : > { %p1395_p1 = pnand %p1394_p8, %p1388_p2 }
  0x98   : > { %1398 = shalt.err (!%p1395_p1)
}
  0x99   : > { %s1399_s13 = scalar_lea.vmem %s1752_s21, 512  ;;  %s1496_s10 = smov [#allocation7]  }
  0x9a   : > { %p1400_p11 = scmp.ne.s32.totalorder %s1752_s21, %s1399_s13  ;;  %s1404_s23 = sshll.u32 %s1496_s10, 4  ;;  %s1405_s23 = int_to_ptr.vmem [resolvable:$false] %s1404_s23 }
  0x9b   : > { %s1406_s3 = scalar_lea.vmem %s1405_s23, 1024  ;;  %p1407_p5 = scmp.lt.s32.totalorder %s1752_s21, %s1405_s23 }
  0x9c   : > { %p1402_p7 = pnand %p1400_p11, %p2019_p12  ;;  %p1408_p10 = scmp.lt.s32.totalorder %s1406_s3, %s1399_s13 }
  0x9e   : > { %p1403_p4 = pneg %p1402_p7  ;;  %p1409_p0 = por %p1408_p10, %p1407_p5 }
  0xa0   : > { %p1410_p6 = pnand %p1409_p0, %p1403_p4 }
  0xa2   : > { %1413 = shalt.err (!%p1410_p6)
}
  0xa3   : > { %1199 = dma.hbm_to_vmem [thread:$0]  (!%p2020_p9), %s1749_s1, 512, %s1752_s21, %s1654_s15, %s1492_s11, %s1492_s11, %s1493_s16  }
  0xa4   : > { %p2021_p12 = scmp.ne.s32.totalorder %s2007_s7, 0 }
  0xa5   : > { %s1782_s9 = sand.u32 (!%p2021_p12), 1, %s1480_s19   ;;  %p2022_p2 = scmp.ne.s32.totalorder (!%p2021_p12), %s2004_s29, 0 }
  0xa6   : > { %276 = sbr.rel (%p2021_p12) target bundleno = 1096 (0x448), region = 40  ;;  %s1785_s26 = sshll.u32 (!%p2021_p12), %s1782_s9, 5 }
  0xa7   : > { %s279_s12 = scalar_lea.sflag (!%p2021_p12), [#allocation3], %s1782_s9  ;;  %s1789_s27 = scalar_lea.vmem (!%p2021_p12), [#allocation2], %s1785_s26 }
  0xad   : > { %1459 = dma.done.wait (%p2022_p2), %s279_s12, 512  }
  0xae   : > { %1461 = vsyncadd (%p2022_p2), %s279_s12, 4294966784  ;;  %s287_s7 = sand.u32 1, %s1555_s22   ;;  %s291_s11 = scalar_lea.vmem [#allocation5], %s1785_s26 }
  0xaf   : > { %s288_s15 = scalar_lea.sflag [#allocation6], %s287_s7 }
  0xb0   : > { %1463 = dma.done.wait (%p2022_p2), %s288_s15, 1024  }
  0xb1   : > { %1465 = vsyncadd (%p2022_p2), %s288_s15, 4294966272  ;;  %s1802_s16 = scalar_lea.vmem [#allocation7], %s1785_s26  ;;  %p2023_p9 = scmp.eq.s32.totalorder %s1555_s22, 0 }
  0xb3   : > { %1467 = dma.done.wait (%p2023_p9), [#allocation9], 256   ;;  %p2024_p13 = pmov %p2023_p9 }
  0xb4   : > { %v1497_v0 = vmov 0.0   ;;  %v405_v1 = vld [vmem:[%s291_s11] sm:$0xff]  ;;  %v406_v2 = vld [vmem:[%s291_s11 + $0x8] sm:$0xff]  ;;  %s1498_s29 = smov 4   ;;  %s1499_s1 = smov 124   ;;  %vm1500_vm0 = vmmov 0  }
  0xb5   : > { %1469 = vsyncadd (%p2024_p13), [#allocation9], 4294967040  ;;  %1119 = vmatprep.subr.bf16.mxu0 %v1497_v0  ;;  %1125 = vmatprep.subr.bf16.mxu1 %v1497_v0  ;;  %v409_v3 = vsub.f32 0.0, %v405_v1  ;;  %v349_v4 = vld [vmem:[%s1789_s27 + $0x8] sm:$0xff]  ;;  %v410_v5 = vsub.f32 0.0, %v406_v2  ;;  %v348_v6 = vld [vmem:[%s1789_s27] sm:$0xff] }
  0xb6   : > { %433 = vrot.lane.b32.xlu1 %v405_v1, %s1498_s29  ;;  %v353_v7 = vsub.f32 0.0, %v349_v4  ;;  %v352_v8 = vsub.f32 0.0, %v348_v6  ;;  %1121 = vmatprep.mubr.msk.bf16.mxu0 %vm1500_vm0, %v1497_v0  ;;  %v408_v9 = vld [vmem:[%s291_s11 + $0x18] sm:$0xff]  ;;  %v407_v10 = vld [vmem:[%s291_s11 + $0x10] sm:$0xff]  ;;  %v1834_v17 = vld [vmem:[#allocation8] sm:$0xff]  ;;  %vm388_vm1 = vcmask 31744  }
  0xb7   : > { %417 = vrot.lane.b32.xlu0 %v409_v3, %s1499_s1  ;;  %1127 = vmatprep.mubr.msk.bf16.mxu1 %vm1500_vm0, %v1497_v0  ;;  %v412_v11 = vsub.f32 0.0, %v408_v9  ;;  %v411_v12 = vsub.f32 0.0, %v407_v10  ;;  %v1821_v13 = vld [vmem:[%s1789_s27 + $0x18] sm:$0xff]  ;;  %v1824_v14 = vld [vmem:[%s1789_s27 + $0x10] sm:$0xff]  ;;  %v1836_v19 = vld [vmem:[#allocation10] sm:$0xff]  ;;  %v449_v20 = vmul.f32 %v405_v1, %v1834_v17  ;;  %v450_v25 = vmul.f32 %v406_v2, %v1834_v17  ;;  %s344_s21 = scalar_lea.vmem [#allocation11], %s1785_s26 }
  0xb8   : > { %v355_v15 = vsub.f32 0.0, %v1821_v13  ;;  %v354_v16 = vsub.f32 0.0, %v1824_v14  ;;  %vm469_vm2 = vcmask 64512   ;;  %v394_v36 = vmul.f32 %v349_v4, %v1834_v17  ;;  %s930_s24 = sshll.u32 %s344_s21, 4  ;;  %s1102_s28 = sshll.u32 %s1555_s22, 9  ;;  %s1926_s24 = int_to_ptr.vmem [resolvable:$true] %s930_s24 }
  0xb9   : > { %v393_v41 = vmul.f32 %v348_v6, %v1834_v17  ;;  %v452_v52 = vmul.f32 %v408_v9, %v1834_v17  ;;  %v451_v56 = vmul.f32 %v407_v10, %v1834_v17  ;;  %v396_v3 = vmul.f32 %v1821_v13, %v1834_v17  ;;  %s1932_s17 = scalar_lea.hbm %s1982_s5, %s1102_s28  ;;  %s917_s22 = scalar_lea.sflag [#allocation4], %s1782_s9 }
  0xba   : > { %435 = vrot.lane.b32.xlu1 %v406_v2, %s1498_s29  ;;  %vm730_vm6 = vcmask 1043456   ;;  %s1414_s14 = scalar_lea.vmem %s1926_s24, 512  ;;  %p2027_p8 = scmp.ne.s32.totalorder %s2005_s30, 0 }
  0xbb   : > { %419 = vrot.lane.b32.xlu0 %v410_v5, %s1499_s1  ;;  %p1415_p3 = scmp.ne.s32.totalorder %s1926_s24, %s1414_s14  ;;  %s1501_s13 = smov [#allocation11]  }
  0xbc   : > { %s1418_s10 = sshll.u32 %s1501_s13, 4  ;;  %s1419_s10 = int_to_ptr.vmem [resolvable:$false] %s1418_s10 }
  0xbd   : > { %p1416_p1 = pnand %p1415_p3, %p2027_p8  ;;  %s1420_s23 = scalar_lea.vmem %s1419_s10, 1024 }
  0xbe   : > { %362 = vrot.lane.b32.xlu1 %v353_v7, %s1499_s1  ;;  %p1421_p7 = scmp.lt.s32.totalorder %s1926_s24, %s1419_s10  ;;  %p1422_p4 = scmp.lt.s32.totalorder %s1420_s23, %s1414_s14 }
  0xbf   : > { %360 = vrot.lane.b32.xlu0 %v352_v8, %s1499_s1  ;;  %v395_v8 = vmul.f32 %v1824_v14, %v1834_v17  ;;  %p1417_p11 = pneg %p1416_p1 }
  0xc0   : > { %p1423_p5 = por %p1422_p4, %p1421_p7 }
  0xc2   : > { %378 = vrot.lane.b32.xlu1 %v349_v4, %s1498_s29  ;;  %p1424_p10 = pnand %p1423_p5, %p1417_p11 }
  0xc3   : > { %376 = vrot.lane.b32.xlu0 %v348_v6, %s1498_s29 }
  0xc6   : > { %423 = vrot.lane.b32.xlu1 %v412_v11, %s1499_s1 }
  0xc7   : > { %421 = vrot.lane.b32.xlu0 %v411_v12, %s1499_s1 }
  0xca   : > { %439 = vrot.lane.b32.xlu1 %v408_v9, %s1498_s29 }
  0xcb   : > { %437 = vrot.lane.b32.xlu0 %v407_v10, %s1498_s29 }
  0xce   : > { %366 = vrot.lane.b32.xlu1 %v355_v15, %s1499_s1 }
  0xcf   : > { %364 = vrot.lane.b32.xlu0 %v354_v16, %s1499_s1 }
  0xd2   : > { %382 = vrot.lane.b32.xlu1 %v1821_v13, %s1498_s29 }
  0xd3   : > { %380 = vrot.lane.b32.xlu0 %v1824_v14, %s1498_s29  ;;  %v658_v14 = vlaneseq }
  0xd5   : > { %v659_v17 = vshrl.u32 %v658_v14, 7 }
 0x128   : > { %v434_v18 = vpop.permute.xlu1 %433 }
 0x129   : > { %v418_v21 = vpop.permute.xlu0 %417 }
 0x12a   : > { %v445_v22 = vsel %vm388_vm1, %v418_v21, %v434_v18  ;;  %v661_v18 = vand.u32 127, %v658_v14 }
 0x12b   : > { %v453_v23 = vmul.f32 %v445_v22, %v1836_v19 }
 0x12c   : > { %v436_v24 = vpop.permute.xlu1 %435  ;;  %vm662_vm3 = vcmp.gt.s32.totalorder %v659_v17, %v661_v18  ;;  %vm663_vm4 = vcmp.eq.s32.totalorder %v661_v18, 0 }
 0x12d   : > { %v420_v26 = vpop.permute.xlu0 %419  ;;  %v457_v27 = vadd.f32 %v453_v23, %v449_v20  ;;  %vm1884_vm5 = vmor %vm662_vm3, %vm663_vm4 }
 0x12e   : > { %v446_v28 = vsel %vm388_vm1, %v420_v26, %v436_v24 }
 0x12f   : > { %v454_v29 = vmul.f32 %v446_v28, %v1836_v19  ;;  %v465_v31 = vpack.c.bf16 %v457_v27, %v457_v27 }
 0x130   : > { %v363_v30 = vpop.permute.xlu1 %362 }
 0x131   : > { %v361_v32 = vpop.permute.xlu0 %360  ;;  %v474_v33 = vsel %vm469_vm2, %v465_v31, 0  ;;  %v458_v34 = vadd.f32 %v454_v29, %v450_v25 }
 0x132   : > { %1120 = vmatpush3.bf16.xpose.msra.mxu0 %v474_v33 }
 0x133   : > { %v466_v37 = vpack.c.bf16 %v458_v34, %v458_v34  ;;  %1131 = vmatprep.subr.bf16.mxu0 %v1497_v0 }
 0x134   : > { %v379_v35 = vpop.permute.xlu1 %378 }
 0x135   : > { %v390_v38 = vsel %vm388_vm1, %v363_v30, %v379_v35  ;;  %v377_v40 = vpop.permute.xlu0 %376  ;;  %v520_v42 = vsel %vm469_vm2, %v466_v37, 0 }
 0x136   : > { %v398_v39 = vmul.f32 %v390_v38, %v1836_v19  ;;  %v389_v43 = vsel %vm388_vm1, %v361_v32, %v377_v40  ;;  %1126 = vmatpush3.bf16.xpose.msra.mxu1 %v520_v42 }
 0x137   : > { %v397_v45 = vmul.f32 %v389_v43, %v1836_v19  ;;  %1137 = vmatprep.subr.bf16.mxu1 %v1497_v0 }
 0x138   : > { %v402_v44 = vadd.f32 %v398_v39, %v394_v36  ;;  %v424_v46 = vpop.permute.xlu1 %423 }
 0x139   : > { %v401_v48 = vadd.f32 %v397_v45, %v393_v41  ;;  %v422_v49 = vpop.permute.xlu0 %421 }
 0x13a   : > { %v462_v47 = vpack.c.bf16 %v402_v44, %v402_v44 }
 0x13b   : > { %v461_v50 = vpack.c.bf16 %v401_v48, %v401_v48 }
 0x13c   : > { %v440_v51 = vpop.permute.xlu1 %439 }
 0x13d   : > { %v448_v53 = vsel %vm388_vm1, %v424_v46, %v440_v51  ;;  %v438_v55 = vpop.permute.xlu0 %437  ;;  %1122 = vmatmul.mubr.msk.bf16.vlgmr.msra.gmra.mrb[0].mxu0 %vm469_vm2, %v461_v50  ;;  %1128 = vmatmul.mubr.msk.bf16.vlgmr.msra.gmra.mrb[0].mxu1 %vm469_vm2, %v462_v47 }
 0x13e   : > { %v456_v54 = vmul.f32 %v448_v53, %v1836_v19  ;;  %v447_v57 = vsel %vm388_vm1, %v422_v49, %v438_v55  ;;  %1139 = vmatprep.mubr.msk.bf16.mxu1 %vm1500_vm0, %v1497_v0  ;;  %1133 = vmatprep.mubr.msk.bf16.mxu0 %vm1500_vm0, %v1497_v0 }
 0x13f   : > { %v455_v59 = vmul.f32 %v447_v57, %v1836_v19 }
 0x140   : > { %v460_v58 = vadd.f32 %v456_v54, %v452_v52  ;;  %v367_v60 = vpop.permute.xlu1 %366 }
 0x141   : > { %v459_v62 = vadd.f32 %v455_v59, %v451_v56  ;;  %v365_v63 = vpop.permute.xlu0 %364 }
 0x142   : > { %v468_v61 = vpack.c.bf16 %v460_v58, %v460_v58 }
 0x143   : > { %v467_v1 = vpack.c.bf16 %v459_v62, %v459_v62 }
 0x144   : > { %v383_v2 = vpop.permute.xlu1 %382  ;;  %v612_v4 = vsel %vm469_vm2, %v468_v61, 0 }
 0x145   : > { %v392_v5 = vsel %vm388_vm1, %v367_v60, %v383_v2  ;;  %1138 = vmatpush3.bf16.xpose.msra.mxu1 %v612_v4  ;;  %v381_v7 = vpop.permute.xlu0 %380  ;;  %v566_v9 = vsel %vm469_vm2, %v467_v1, 0 }
 0x146   : > { %v400_v6 = vmul.f32 %v392_v5, %v1836_v19  ;;  %1149 = vmatprep.subr.bf16.mxu1 %v1497_v0  ;;  %v391_v10 = vsel %vm388_vm1, %v365_v63, %v381_v7  ;;  %1132 = vmatpush3.bf16.xpose.msra.mxu0 %v566_v9  ;;  %v719_v5 = vld [vmem:[%s1802_s16] sm:$0xff] }
 0x147   : > { %v399_v12 = vmul.f32 %v391_v10, %v1836_v19  ;;  %1143 = vmatprep.subr.bf16.mxu0 %v1497_v0  ;;  %v723_v7 = vpack.c.bf16 %v719_v5, %v719_v5 }
 0x148   : > { %v404_v11 = vadd.f32 %v400_v6, %v396_v3  ;;  %v720_v6 = vld [vmem:[%s1802_s16 + $0x8] sm:$0xff] }
 0x149   : > { %v403_v15 = vadd.f32 %v399_v12, %v395_v8  ;;  %v724_v8 = vpack.c.bf16 %v720_v6, %v720_v6  ;;  %v732_v9 = vsel %vm730_vm6, %v723_v7, 0 }
 0x14a   : > { %v464_v13 = vpack.c.bf16 %v404_v11, %v404_v11 }
 0x14b   : > { %v463_v16 = vpack.c.bf16 %v403_v15, %v403_v15  ;;  %v778_v10 = vsel %vm730_vm6, %v724_v8, 0  ;;  %v721_v15 = vld [vmem:[%s1802_s16 + $0x10] sm:$0xff] }
 0x14c   : > { %1140 = vmatmul.mubr.msk.bf16.vlgmr.msra.gmra.mrb[4].mxu1 %vm469_vm2, %v464_v13  ;;  %v722_v13 = vld [vmem:[%s1802_s16 + $0x18] sm:$0xff]  ;;  %v725_v17 = vpack.c.bf16 %v721_v15, %v721_v15 }
 0x14d   : > { %1151 = vmatprep.mubr.msk.bf16.mxu1 %vm1500_vm0, %v1497_v0  ;;  %1134 = vmatmul.mubr.msk.bf16.vlgmr.msra.gmra.mrb[4].mxu0 %vm469_vm2, %v463_v16  ;;  %v726_v16 = vpack.c.bf16 %v722_v13, %v722_v13 }
 0x14e   : > { %1145 = vmatprep.mubr.msk.bf16.mxu0 %vm1500_vm0, %v1497_v0  ;;  %1144 = vmatpush3.bf16.msra.mxu0 %v732_v9 }
 0x14f   : > { %1150 = vmatpush3.bf16.msra.mxu1 %v778_v10  ;;  %1155 = vmatprep.subr.bf16.mxu0 %v1497_v0 }
 0x150   : > { %1161 = vmatprep.subr.bf16.mxu1 %v1497_v0 }
 0x210   : > { %v510_v19 = vpop.f32.mrb[0].mxu0  ;;  %v556_v20 = vpop.f32.mrb[0].mxu1 }
 0x211   : > { %v654_v22 = vmul.f32 0.35355338, %v510_v19  ;;  %v655_v23 = vmul.f32 0.35355338, %v556_v20  ;;  %v1123_v24 = vpop.f32.mrb[1].mxu0  ;;  %v1129_v25 = vpop.f32.mrb[1].mxu1 }
 0x212   : > { %v513_v26 = vpop.f32.mrb[2].mxu0  ;;  %v559_v27 = vpop.f32.mrb[2].mxu1  ;;  %v824_v24 = vsel %vm730_vm6, %v725_v17, 0 }
 0x213   : > { %v1124_v28 = vpop.f32.mrb[3].mxu0  ;;  %v1130_v29 = vpop.f32.mrb[3].mxu1  ;;  %v668_v30 = vsel %vm1884_vm5, %v655_v23, -1e+30  ;;  %v667_v31 = vsel %vm1884_vm5, %v654_v22, -1e+30 }
 0x214   : > { %v674_v32 = vsel %vm469_vm2, %v668_v30, -inf  ;;  %v671_v33 = vsel %vm469_vm2, %v667_v31, -inf  ;;  %v870_v22 = vsel %vm730_vm6, %v726_v16, 0 }
 0x215   : > { %675 = vmax.xlane.f32.xlu1 %v674_v32  ;;  %672 = vmax.xlane.f32.xlu0 %v671_v33 }
 0x21f   : > { %v648_v34 = vpop.f32.mrb[4].mxu1 }
 0x220   : > { %v1141_v35 = vpop.f32.mrb[5].mxu1  ;;  %v602_v36 = vpop.f32.mrb[4].mxu0  ;;  %v657_v38 = vmul.f32 0.35355338, %v648_v34 }
 0x221   : > { %v651_v37 = vpop.f32.mrb[6].mxu1  ;;  %v656_v39 = vmul.f32 0.35355338, %v602_v36  ;;  %v1135_v40 = vpop.f32.mrb[5].mxu0 }
 0x222   : > { %v1142_v41 = vpop.f32.mrb[7].mxu1  ;;  %v605_v42 = vpop.f32.mrb[6].mxu0  ;;  %v670_v46 = vsel %vm1884_vm5, %v657_v38, -1e+30 }
 0x223   : > { %v1136_v43 = vpop.f32.mrb[7].mxu0  ;;  %v669_v44 = vsel %vm1884_vm5, %v656_v39, -1e+30  ;;  %v680_v47 = vsel %vm469_vm2, %v670_v46, -inf }
 0x224   : > { %v677_v45 = vsel %vm469_vm2, %v669_v44, -inf }
 0x225   : > { %678 = vmax.xlane.f32.xlu0 %v677_v45 }
 0x229   : > { %681 = vmax.xlane.f32.xlu0 %v680_v47 }
 0x2a2   : > { %v676_v48 = vpop.xlane.xlu1 %675  ;;  %v673_v49 = vpop.xlane.xlu0 %672 }
 0x2a3   : > { %v684_v50 = vsub.f32 %v668_v30, %v676_v48  ;;  %v683_v51 = vsub.f32 %v667_v31, %v673_v49 }
 0x2a5   : > { %v689_v52 = vmul.f32 1.442695, %v684_v50  ;;  %v687_v53 = vmul.f32 1.442695, %v683_v51 }
 0x2a7   : > { %1252 = vpow2.f32 %v689_v52 }
 0x2a8   : > { %1254 = vpow2.f32 %v687_v53 }
 0x2b1   : > { %v1253_v54 = vpop.eup %1252 }
 0x2b2   : > { %v1255_v55 = vpop.eup %1254  ;;  %v679_v56 = vpop.xlane.xlu0 %678  ;;  %v698_v57 = vsel %vm469_vm2, %v1253_v54, 0.0 }
 0x2b3   : > { %v685_v58 = vsub.f32 %v669_v44, %v679_v56  ;;  %v695_v59 = vsel %vm469_vm2, %v1255_v55, 0.0  ;;  %699 = vadd.xlane.f32.xlu0 %v698_v57 }
 0x2b4   : > { %696 = vadd.xlane.f32.xlu1 %v695_v59 }
 0x2b5   : > { %v691_v60 = vmul.f32 1.442695, %v685_v58 }
 0x2b6   : > { %v682_v61 = vpop.xlane.xlu0 %681 }
 0x2b7   : > { %1256 = vpow2.f32 %v691_v60  ;;  %v686_v62 = vsub.f32 %v670_v46, %v682_v61 }
 0x2b9   : > { %v693_v63 = vmul.f32 1.442695, %v686_v62 }
 0x2bb   : > { %1258 = vpow2.f32 %v693_v63 }
 0x2c1   : > { %v1257_v1 = vpop.eup %1256 }
 0x2c2   : > { %v701_v2 = vsel %vm469_vm2, %v1257_v1, 0.0 }
 0x2c3   : > { %702 = vadd.xlane.f32.xlu1 %v701_v2 }
 0x2c5   : > { %v1259_v3 = vpop.eup %1258 }
 0x2c6   : > { %v704_v4 = vsel %vm469_vm2, %v1259_v3, 0.0 }
 0x2c7   : > { %705 = vadd.xlane.f32.xlu0 %v704_v4 }
 0x340   : > { %v700_v11 = vpop.xlane.xlu0 %699 }
 0x341   : > { %v697_v12 = vpop.xlane.xlu1 %696  ;;  %1260 = vrcp.f32 %v700_v11 }
 0x342   : > { %1262 = vrcp.f32 %v697_v12 }
 0x34b   : > { %v1261_v14 = vpop.eup %1260 }
 0x34c   : > { %v1263_v18 = vpop.eup %1262  ;;  %v712_v19 = vmul.f32 %v1261_v14, %v1253_v54 }
 0x34d   : > { %v711_v20 = vmul.f32 %v1263_v18, %v1255_v55 }
 0x34e   : > { %v716_v21 = vpack.c.bf16 %v712_v19, %v712_v19 }
 0x34f   : > { %v715_v23 = vpack.c.bf16 %v711_v20, %v711_v20 }
 0x350   : > { %v703_v25 = vpop.xlane.xlu1 %702  ;;  %1152 = vmatmul.mubr.msk.bf16.vlgmr.msra.gmra.mrb[8].mxu1 %vm469_vm2, %v716_v21 }
 0x351   : > { %1146 = vmatmul.mubr.msk.bf16.vlgmr.msra.gmra.mrb[8].mxu0 %vm469_vm2, %v715_v23  ;;  %1264 = vrcp.f32 %v703_v25  ;;  %1162 = vmatpush3.bf16.msra.mxu1 %v870_v22 }
 0x352   : > { %1156 = vmatpush3.bf16.msra.mxu0 %v824_v24  ;;  %1157 = vmatprep.mubr.msk.bf16.mxu0 %vm1500_vm0, %v1497_v0 }
 0x353   : > { %1163 = vmatprep.mubr.msk.bf16.mxu1 %vm1500_vm0, %v1497_v0 }
 0x354   : > { %v706_v26 = vpop.xlane.xlu0 %705 }
 0x355   : > { %1266 = vrcp.f32 %v706_v26 }
 0x35b   : > { %v1265_v27 = vpop.eup %1264 }
 0x35c   : > { %v713_v28 = vmul.f32 %v1265_v27, %v1257_v1 }
 0x35e   : > { %v717_v29 = vpack.c.bf16 %v713_v28, %v713_v28 }
 0x35f   : > { %v1267_v30 = vpop.eup %1266 }
 0x360   : > { %v714_v31 = vmul.f32 %v1267_v30, %v1259_v3  ;;  %1158 = vmatmul.mubr.msk.bf16.vlgmr.msra.gmra.mrb[12].mxu0 %vm469_vm2, %v717_v29 }
 0x362   : > { %v718_v32 = vpack.c.bf16 %v714_v31, %v714_v31 }
 0x364   : > { %1164 = vmatmul.mubr.msk.bf16.vlgmr.msra.gmra.mrb[12].mxu1 %vm469_vm2, %v718_v32 }
 0x423   : > { %v814_v33 = vpop.f32.mrb[8].mxu1 }
 0x424   : > { %v768_v34 = vpop.f32.mrb[8].mxu0  ;;  %913 = vst.msk [vmem:[%s344_s21 + $0x8] sm:$0xff] %vm469_vm2, %v814_v33  ;;  %v1153_v35 = vpop.f32.mrb[9].mxu1 }
 0x425   : > { %912 = vst.msk [vmem:[%s344_s21] sm:$0xff] %vm469_vm2, %v768_v34  ;;  %v1147_v0 = vpop.f32.mrb[9].mxu0  ;;  %v817_v36 = vpop.f32.mrb[10].mxu1 }
 0x426   : > { %v771_v37 = vpop.f32.mrb[10].mxu0  ;;  %v1154_v38 = vpop.f32.mrb[11].mxu1 }
 0x427   : > { %v1148_v39 = vpop.f32.mrb[11].mxu0 }
 0x433   : > { %v860_v40 = vpop.f32.mrb[12].mxu0 }
 0x434   : > { %914 = vst.msk [vmem:[%s344_s21 + $0x10] sm:$0xff] %vm469_vm2, %v860_v40  ;;  %v1159_v41 = vpop.f32.mrb[13].mxu0 }
 0x435   : > { %v863_v42 = vpop.f32.mrb[14].mxu0 }
 0x436   : > { %v1160_v43 = vpop.f32.mrb[15].mxu0 }
 0x437   : > { %v906_v44 = vpop.f32.mrb[12].mxu1 }
 0x438   : > { %915 = vst.msk [vmem:[%s344_s21 + $0x18] sm:$0xff] %vm469_vm2, %v906_v44  ;;  %v1165_v45 = vpop.f32.mrb[13].mxu1 }
 0x439   : > { %v909_v46 = vpop.f32.mrb[14].mxu1 }
 0x43a   : > { %1427 = shalt.err (!%p1424_p10)
}
 0x43b   : > { %s1428_s3 = scalar_lea.hbm %s1932_s17, 512  ;;  %s1432_s27 = scalar_lea.hbm %s1982_s5, 1024 }
 0x43c   : > { %p1429_p0 = scmp.ne.s32.totalorder %s1932_s17, %s1428_s3  ;;  %p1433_p2 = scmp.lt.u32.totalorder %s1932_s17, %s1982_s5 }
 0x43d   : > { %p1434_p9 = scmp.lt.u32.totalorder %s1432_s27, %s1428_s3  ;;  %p1436_p3 = scmp.lt.u32.totalorder %s1428_s3, %s1932_s17 }
 0x43e   : > { %p1430_p6 = pnand %p1429_p0, %p2027_p8 }
 0x43f   : > { %p1435_p13 = por %p1434_p9, %p1433_p2 }
 0x440   : > { %p1431_p12 = pneg %p1430_p6 }
 0x441   : > { %p1437_p1 = por %p1436_p3, %p1435_p13 }
 0x443   : > { %p1438_p11 = pnand %p1437_p1, %p1431_p12 }
 0x445   : > { %1441 = shalt.err (!%p1438_p11)
}
 0x446   : > { %s1502_s11 = smov 128   ;;  %s1503_s16 = smov 8   ;;  %v1166_v47 = vpop.f32.mrb[15].mxu1 }
 0x447   : > { %1181 = dma.vmem_to_hbm [thread:$0]  (%p2027_p8), %s1926_s24, 512, %s1932_s17, %s917_s22, %s1502_s11, %s1502_s11, %s1503_s16  }
 0x448 PF: > { %s2028_s29 = sld [smem:[#allocation16_spill]]  ;;  %s945_s1 = sand.u32 1, %s1476_s18  }
 0x449   : > { %p2029_p7 = scmp.ne.s32.totalorder %s2006_s6, 0  ;;  %s946_s21 = scalar_lea.sflag [#allocation4], %s945_s1 }
 0x44e   : > { %p2030_p4 = scmp.ge.s32.totalorder %s2028_s29, 2 }
 0x450   : > { %p1201_p5 = pnand %p2030_p4, %p2029_p7 }
 0x452   : > { %1471 = dma.done.wait (!%p1201_p5), %s946_s21, 512  }
 0x453   : > { %1473 = vsyncadd (!%p1201_p5), %s946_s21, 4294966784  ;;  %s2031_s21 = sld [smem:[#allocation17_spill]]  ;;  %s2032_s28 = sld [smem:[#allocation18_spill]] }
 0x454   : > { %s2033_s18 = smov %s1480_s19  ;;  %s2034_s19 = smov %s1484_s20 }
 0x459   : > { %p22_p10 = scmp.ge.s32.totalorder %s2031_s21, 4   ;;  %s2035_s20 = smov %s2032_s28 }
 0x45b   :  { %24 = sbr.rel (!%p22_p10) target bundleno = 11 (0xb), region = 117 }
 0x462   :  { %951 = vsyncpa [#allocation3], 1 }
 0x463   :  { %953 = vsyncpa [#allocation3 + $0x1], 1 }
 0x464   :  { %954 = vsyncpa [#allocation6], 1 }
 0x465   :  { %956 = vsyncpa [#allocation6 + $0x1], 1 }
 0x466   :  { %957 = vsyncpa [#allocation9], 1 }
 0x467   :  { %958 = vsyncpa [#allocation4], 1 }
 0x468   :  { %960 = vsyncpa [#allocation4 + $0x1], 1 }

// kernel: _lambda_.21
= control target key start
LH: loop header
LB: loop body
LE: loop exit
PB: predicated region body
PF: predicated region fallthrough
CT: control target
= control target key end

     0   :  { %10 = vsyncpa [#allocation3], 0  ;;  %s1276_s0 = inlined_call_operand.hbm [shape: f32[16,32], index: 0, kind: input, shape index: {}]   ;;  %s1277_s1 = inlined_call_operand.hbm [shape: f32[1,32], index: 1, kind: input, shape index: {}]   ;;  %s1278_s2 = inlined_call_operand.hbm [shape: f32[1,32], index: 2, kind: input, shape index: {}]   ;;  %s1279_s3 = inlined_call_operand.hbm [shape: bf16[32,32], index: 3, kind: input, shape index: {}]   ;;  %s1280_s4 = inlined_call_operand.hbm [shape: f32[1,32], index: 4, kind: input, shape index: {}]   ;;  %s1281_s5 = inlined_call_operand.hbm [shape: f32[16,32], index: 5, kind: output, shape index: {}]  }
   0x1   :  { %12 = vsyncpa [#allocation3 + $0x1], 0 }
   0x2   :  { %13 = vsyncpa [#allocation6], 0 }
   0x3   :  { %14 = vsyncpa [#allocation9], 0 }
   0x4   :  { %15 = vsyncpa [#allocation4], 0 }
   0x5   :  { %17 = vsyncpa [#allocation4 + $0x1], 0  ;;  %s980_s18 = smov 0   ;;  %s982_s19 = smov 0  }
   0x6   :  { %s984_s20 = smov 0   ;;  %s986_s21 = smov 0  }
   0x7   :  { %s988_s22 = smov 0   ;;  %s990_s23 = smov 0  }
   0x8 LB: > { %s557_s24 = sadd.s32 4294967295, %s938_s23   ;;  %p559_p0 = scmp.ge.s32.totalorder %s938_s23, 1  ;;  %s938_s23 = sphi %s990_s23, %s23_s23   ;;  %s934_s22 = sphi %s988_s22, %s1305_s22   ;;  %s930_s21 = sphi %s986_s21, %s1304_s21   ;;  %s926_s20 = sphi %s984_s20, %s1303_s20   ;;  %s922_s19 = sphi %s982_s19, %s1302_s19   ;;  %s918_s18 = sphi %s980_s18, %s1301_s18  }
   0x9   : > { %p1014_p1 = scmp.eq.s32.totalorder %s557_s24, 0  ;;  %p188_p2 = scmp.lt.s32.totalorder %s938_s23, 3 }
   0xa   : > { %s940_s27 = smov [#allocation5]   ;;  %s941_s29 = smov [#allocation8]  }
   0xb   : > { %s1286_s25 = scalar_select %p1014_p1, 1, 0 }
   0xc   : > { %p1019_p3 = pnand %p559_p0, %p188_p2  ;;  %s201_s28 = sshll.u32 %s940_s27, 4  ;;  %s202_s28 = int_to_ptr.vmem [resolvable:$true] %s201_s28 }
   0xd   : > { %s224_s30 = sshll.u32 %s941_s29, 4  ;;  %s942_s7 = smov [#allocation7]   ;;  %s1032_s30 = int_to_ptr.vmem [resolvable:$true] %s224_s30 }
   0xe   : > { %s1287_s26 = scalar_select %p1019_p3, 1, 0 }
   0xf   : > { %p615_p5 = pneg %p1019_p3  ;;  %s1034_s8 = sshll.u32 %s942_s7, 4  ;;  %s213_s8 = int_to_ptr.vmem [resolvable:$true] %s1034_s8 }
  0x10   : > { %s706_s11 = scalar_lea.hbm %s1277_s1, 16 }
  0x11   : > { %p1028_p6 = pnand %p615_p5, %p1014_p1  ;;  %p707_p7 = scmp.ne.s32.totalorder %s1277_s1, %s706_s11 }
  0x12   : > { %p713_p11 = scmp.lt.u32.totalorder %s706_s11, %s1277_s1 }
  0x13   : > { %p1044_p8 = pneg %p1028_p6 }
  0x15   : > { %p709_p9 = pnand %p1044_p8, %p707_p7 }
  0x17   : > { %p710_p10 = pneg %p709_p9 }
  0x19   : > { %p715_p12 = pnand %p713_p11, %p710_p10 }
  0x1b   : > { %718 = shalt.err (!%p715_p12)
}
  0x1c   : > { %s719_s17 = scalar_lea.vmem %s202_s28, 16  ;;  %s726_s27 = scalar_lea.vmem %s202_s28, 32 }
  0x1d   : > { %p720_p13 = scmp.ne.s32.totalorder %s202_s28, %s719_s17  ;;  %p727_p5 = scmp.lt.s32.totalorder %s202_s28, %s202_s28 }
  0x1e   : > { %p728_p4 = scmp.lt.s32.totalorder %s726_s27, %s719_s17 }
  0x1f   : > { %p722_p0 = pnand %p720_p13, %p1044_p8 }
  0x20   : > { %p729_p3 = por %p728_p4, %p727_p5 }
  0x21   : > { %p723_p2 = pneg %p722_p0 }
  0x23   : > { %p730_p1 = pnand %p729_p3, %p723_p2 }
  0x25   : > { %733 = shalt.err (!%p730_p1)
}
  0x26   : > { %618 = dma.hbm_to_vmem [thread:$0]  (!%p1028_p6), %s1277_s1, 16, %s202_s28, [#allocation6]  }
  0x27   : > { %s734_s11 = scalar_lea.hbm %s1279_s3, 256 }
  0x28   : > { %p735_p7 = scmp.ne.s32.totalorder %s1279_s3, %s734_s11  ;;  %p741_p1 = scmp.lt.u32.totalorder %s734_s11, %s1279_s3 }
  0x2a   : > { %p737_p9 = pnand %p735_p7, %p1044_p8 }
  0x2c   : > { %p738_p4 = pneg %p737_p9 }
  0x2e   : > { %p743_p3 = pnand %p741_p1, %p738_p4 }
  0x30   : > { %746 = shalt.err (!%p743_p3)
}
  0x31   : > { %s747_s28 = scalar_lea.vmem %s1032_s30, 256  ;;  %p755_p13 = scmp.lt.s32.totalorder %s1032_s30, %s1032_s30 }
  0x32   : > { %p748_p10 = scmp.ne.s32.totalorder %s1032_s30, %s747_s28  ;;  %p756_p0 = scmp.lt.s32.totalorder %s747_s28, %s747_s28 }
  0x34   : > { %p750_p11 = pnand %p748_p10, %p1044_p8  ;;  %p757_p2 = por %p756_p0, %p755_p13 }
  0x36   : > { %p751_p12 = pneg %p750_p11 }
  0x38   : > { %p758_p5 = pnand %p757_p2, %p751_p12 }
  0x3a   : > { %761 = shalt.err (!%p758_p5)
}
  0x3b   : > { %s943_s17 = smov 64   ;;  %s944_s27 = smov 4  }
  0x3c   : > { %624 = dma.hbm_to_vmem [thread:$0]  (!%p1028_p6), %s1279_s3, 256, %s1032_s30, [#allocation9], %s943_s17, %s943_s17, %s944_s27  }
  0x3d   : > { %s762_s11 = scalar_lea.hbm %s1278_s2, 16 }
  0x3e   : > { %p763_p7 = scmp.ne.s32.totalorder %s1278_s2, %s762_s11  ;;  %p769_p1 = scmp.lt.u32.totalorder %s762_s11, %s1278_s2 }
  0x40   : > { %p765_p9 = pnand %p763_p7, %p1044_p8 }
  0x42   : > { %p766_p4 = pneg %p765_p9 }
  0x44   : > { %p771_p3 = pnand %p769_p1, %p766_p4 }
  0x46   : > { %774 = shalt.err (!%p771_p3)
}
  0x47   : > { %s775_s28 = scalar_lea.vmem %s213_s8, 16  ;;  %s782_s30 = scalar_lea.vmem %s213_s8, 32 }
  0x48   : > { %p776_p10 = scmp.ne.s32.totalorder %s213_s8, %s775_s28  ;;  %p783_p13 = scmp.lt.s32.totalorder %s213_s8, %s213_s8 }
  0x49   : > { %p784_p0 = scmp.lt.s32.totalorder %s782_s30, %s775_s28 }
  0x4a   : > { %p778_p11 = pnand %p776_p10, %p1044_p8 }
  0x4b   : > { %p785_p2 = por %p784_p0, %p783_p13 }
  0x4c   : > { %p779_p12 = pneg %p778_p11 }
  0x4e   : > { %p786_p5 = pnand %p785_p2, %p779_p12 }
  0x50   : > { %789 = shalt.err (!%p786_p5)
}
  0x51   : > { %621 = dma.hbm_to_vmem [thread:$0]  (!%p1028_p6), %s1278_s2, 16, %s213_s8, [#allocation6]  }
  0x52   : > { %s945_s29 = smov [#allocation10]   ;;  %s790_s11 = scalar_lea.hbm %s1280_s4, 16 }
  0x53   : > { %s240_s7 = sshll.u32 %s945_s29, 4  ;;  %p791_p7 = scmp.ne.s32.totalorder %s1280_s4, %s790_s11  ;;  %s241_s7 = int_to_ptr.vmem [resolvable:$true] %s240_s7 }
  0x54   : > { %p797_p1 = scmp.lt.u32.totalorder %s790_s11, %s1280_s4 }
  0x55   : > { %p793_p9 = pnand %p791_p7, %p1044_p8 }
  0x57   : > { %p794_p4 = pneg %p793_p9 }
  0x59   : > { %p799_p3 = pnand %p797_p1, %p794_p4 }
  0x5b   : > { %802 = shalt.err (!%p799_p3)
}
  0x5c   : > { %s803_s8 = scalar_lea.vmem %s241_s7, 16  ;;  %s810_s28 = scalar_lea.vmem %s241_s7, 32 }
  0x5d   : > { %p804_p10 = scmp.ne.s32.totalorder %s241_s7, %s803_s8  ;;  %p811_p13 = scmp.lt.s32.totalorder %s241_s7, %s241_s7 }
  0x5e   : > { %p812_p0 = scmp.lt.s32.totalorder %s810_s28, %s803_s8 }
  0x5f   : > { %p806_p11 = pnand %p804_p10, %p1044_p8 }
  0x60   : > { %p813_p2 = por %p812_p0, %p811_p13 }
  0x61   : > { %p807_p12 = pneg %p806_p11 }
  0x63   : > { %p814_p5 = pnand %p813_p2, %p807_p12 }
  0x65   : > { %817 = shalt.err (!%p814_p5)
}
  0x66   : > { %627 = dma.hbm_to_vmem [thread:$0]  (!%p1028_p6), %s1280_s4, 16, %s241_s7, [#allocation9]  }
  0x67   : > { %s558_s14 = sadd.s32 4294967294, %s938_s23   ;;  %s35_s27 = sadd.s32 1, %s934_s22 }
  0x68   : > { %p37_p8 = scmp.ge.s32.totalorder %s35_s27, 2  ;;  %s42_s6 = sadd.s32 1, %s926_s20 }
  0x69   : > { %p49_p7 = scmp.ne.s32.totalorder %s926_s20, %s922_s19  ;;  %p50_p9 = scmp.eq.s32.totalorder %s938_s23, 0 }
  0x6a   : > { %s1307_s27 = smov (%p37_p8, %s35_s27), 0  ;;  %p55_p1 = scmp.ne.s32.totalorder %s922_s19, %s918_s18 }
  0x6b   : > { %p1128_p4 = por %p50_p9, %p49_p7  ;;  %s39_s7 = ssub.s32 %s934_s22, %s1307_s27 }
  0x6c   : > { %p175_p6 = scmp.eq.s32.totalorder %s557_s24, 1  ;;  %p40_p3 = scmp.eq.s32.totalorder %s39_s7, 0 }
  0x6d   : > { %p1291_p10 = scmp.ne.s32.totalorder %s1286_s25, 0  ;;  %p181_p13 = scmp.eq.s32.totalorder %s558_s14, 1 }
  0x6e   : > { %p1144_p12 = por %p175_p6, %p49_p7  ;;  %p640_p2 = scmp.lt.s32.totalorder %s938_s23, 2 }
  0x6f   : > { %p1140_p11 = por %p1291_p10, %p55_p1  ;;  %p1151_p0 = por %p181_p13, %p55_p1 }
  0x70   : > { %s1293_s10 = scalar_select %p1144_p12, 1, 0 }
  0x71   : > { %s1149_s11 = scalar_select %p40_p3, %s926_s20, %s42_s6  }
  0x72   : > { %s1294_s12 = scalar_select %p1151_p0, 1, 0 }
  0x73   : > { %s251_s13 = sand.u32 1, %s926_s20   ;;  %s566_s24 = sshll.u32 %s934_s22, 7 }
  0x74   : > { %s565_s15 = sshll.u32 %s251_s13, 3  ;;  %s1161_s28 = scalar_lea.hbm %s1276_s0, %s566_s24 }
  0x75   : > { %s255_s30 = scalar_lea.vmem [#allocation2], %s565_s15  ;;  %p1165_p5 = pnand %p640_p2, %p1128_p4 }
  0x76   : > { %s262_s17 = sshll.u32 %s255_s30, 4  ;;  %s252_s6 = scalar_lea.sflag [#allocation3], %s251_s13  ;;  %s1169_s17 = int_to_ptr.vmem [resolvable:$true] %s262_s17 }
  0x77   : > { %s818_s7 = scalar_lea.hbm %s1161_s28, 128  ;;  %p820_p7 = pneg %p1165_p5 }
  0x78   : > { %p819_p8 = scmp.ne.s32.totalorder %s1161_s28, %s818_s7  ;;  %s823_s29 = scalar_lea.hbm %s1276_s0, 256 }
  0x79   : > { %p824_p4 = scmp.lt.u32.totalorder %s1161_s28, %s1276_s0  ;;  %p825_p6 = scmp.lt.u32.totalorder %s823_s29, %s818_s7 }
  0x7a   : > { %p821_p9 = pnand %p820_p7, %p819_p8  ;;  %p827_p10 = scmp.lt.u32.totalorder %s818_s7, %s1161_s28 }
  0x7b   : > { %p826_p3 = por %p825_p6, %p824_p4 }
  0x7c   : > { %p822_p1 = pneg %p821_p9 }
  0x7d   : > { %p828_p13 = por %p827_p10, %p826_p3 }
  0x7f   : > { %p829_p2 = pnand %p828_p13, %p822_p1 }
  0x81   : > { %832 = shalt.err (!%p829_p2)
}
  0x82   : > { %s833_s13 = scalar_lea.vmem %s1169_s17, 128  ;;  %s946_s30 = smov [#allocation2]  }
  0x83   : > { %p834_p8 = scmp.ne.s32.totalorder %s1169_s17, %s833_s13  ;;  %s838_s24 = sshll.u32 %s946_s30, 4  ;;  %s839_s24 = int_to_ptr.vmem [resolvable:$false] %s838_s24 }
  0x84   : > { %s840_s15 = scalar_lea.vmem %s839_s24, 256  ;;  %p841_p12 = scmp.lt.s32.totalorder %s1169_s17, %s839_s24 }
  0x85   : > { %p836_p9 = pnand %p834_p8, %p820_p7  ;;  %p842_p4 = scmp.lt.s32.totalorder %s840_s15, %s833_s13 }
  0x87   : > { %p837_p0 = pneg %p836_p9  ;;  %p843_p6 = por %p842_p4, %p841_p12 }
  0x89   : > { %p844_p3 = pnand %p843_p6, %p837_p0 }
  0x8b   : > { %847 = shalt.err (!%p844_p3)
}
  0x8c   : > { %631 = dma.hbm_to_vmem [thread:$0]  (!%p1165_p5), %s1161_s28, 128, %s1169_s17, %s252_s6  }
  0x8d   : > { %p1296_p1 = scmp.ne.s32.totalorder %s1287_s26, 0 }
  0x8e   : > { %s1199_s7 = sand.u32 (!%p1296_p1), 1, %s922_s19  }
  0x8f   : > { %271 = sbr.rel (%p1296_p1) target bundleno = 700 (0x2bc), region = 40  ;;  %s568_s29 = sshll.u32 (!%p1296_p1), %s1199_s7, 3 }
  0x90   : > { %s274_s16 = scalar_lea.sflag (!%p1296_p1), [#allocation3], %s1199_s7  ;;  %s277_s8 = scalar_lea.vmem (!%p1296_p1), [#allocation2], %s568_s29 }
  0x96   : > { %901 = dma.done.wait (%p1140_p11), %s274_s16, 128  }
  0x97   : > { %903 = vsyncadd (%p1140_p11), %s274_s16, 4294967168  ;;  %p1297_p12 = scmp.ne.s32.totalorder %s1286_s25, 0 }
  0x99   : > { %905 = dma.done.wait (%p1297_p12), [#allocation6], 32  }
  0x9a   : > { %907 = vsyncadd (%p1297_p12), [#allocation6], 4294967264 }
  0x9b   : > { %909 = dma.done.wait (%p1297_p12), [#allocation9], 272  }
  0x9c   : > { %911 = vsyncadd (%p1297_p12), [#allocation9], 4294967024  ;;  %vm324_vm0 = vcmask 261120   ;;  %v321_v0 = vld [vmem:[%s277_s8] sm:$0xff]  ;;  %v702_v7 = vld [vmem:[#allocation8] sm:$0xff]   ;;  %v947_v8 = vmov 0.0  }
  0x9d   : > { %v325_v1 = vsel %vm324_vm0, %v321_v0, 0.0  ;;  %587 = vmatprep.subr.bf16.mxu0 %v947_v8  ;;  %v703_v9 = vld [vmem:[#allocation8 + $0x8] sm:$0xff]   ;;  %vm948_vm1 = vmmov 0   ;;  %v574_v14 = vld [vmem:[#allocation5] ss:$0 sm:$0xff]  ;;  %s581_s25 = sshll.u32 %s930_s21, 7 }
  0x9e   : > { %326 = vadd.xlane.f32.xlu0 %v325_v1  ;;  %588 = vmatpush3.bf16.msra.mxu0 %v702_v7  ;;  %v575_v16 = vld [vmem:[#allocation7] ss:$0 sm:$0xff]  ;;  %v576_v20 = vld [vmem:[#allocation10] ss:$0 sm:$0xff]  ;;  %s319_s26 = scalar_lea.vmem [#allocation11], %s568_s29  ;;  %s1226_s14 = scalar_lea.hbm %s1281_s5, %s581_s25 }
  0x9f   : > { %591 = vmatprep.mubr.msk.bf16.mxu0 %vm948_vm1, %v947_v8  ;;  %589 = vmatprep.subr.bf16.mxu0 %v947_v8  ;;  %s436_s9 = sshll.u32 %s319_s26, 4  ;;  %s422_s21 = scalar_lea.sflag [#allocation4], %s1199_s7  ;;  %s1228_s9 = int_to_ptr.vmem [resolvable:$true] %s436_s9 }
  0xa0   : > { %s848_s6 = scalar_lea.vmem %s1228_s9, 128  ;;  %p1298_p0 = scmp.ne.s32.totalorder %s1293_s10, 0 }
  0xa1   : > { %p849_p11 = scmp.ne.s32.totalorder %s1228_s9, %s848_s6  ;;  %s949_s13 = smov [#allocation11]  }
  0xa2   : > { %590 = vmatpush3.bf16.msra.mxu0 %v703_v9  ;;  %s852_s30 = sshll.u32 %s949_s13, 4  ;;  %s853_s30 = int_to_ptr.vmem [resolvable:$false] %s852_s30 }
  0xa3   : > { %p850_p5 = pnand %p849_p11, %p1298_p0  ;;  %s854_s24 = scalar_lea.vmem %s853_s30, 256 }
  0xa4   : > { %p855_p10 = scmp.lt.s32.totalorder %s1228_s9, %s853_s30  ;;  %p856_p13 = scmp.lt.s32.totalorder %s854_s24, %s848_s6 }
  0xa5   : > { %p851_p7 = pneg %p850_p5 }
  0xa6   : > { %p857_p2 = por %p856_p13, %p855_p10 }
  0xa8   : > { %p858_p8 = pnand %p857_p2, %p851_p7 }
 0x12b   : > { %v327_v2 = vpop.xlane.xlu0 %326 }
 0x12c   : > { %v329_v3 = vmul.f32 0.03125, %v327_v2 }
 0x12e   : > { %v330_v4 = vsub.f32 %v321_v0, %v329_v3 }
 0x130   : > { %v331_v5 = vmul.f32 %v330_v4, %v330_v4 }
 0x132   : > { %v332_v6 = vsel %vm324_vm0, %v331_v5, 0.0 }
 0x133   : > { %333 = vadd.xlane.f32.xlu0 %v332_v6 }
 0x1c0   : > { %v334_v10 = vpop.xlane.xlu0 %333 }
 0x1c1   : > { %v335_v11 = vmul.f32 0.03125, %v334_v10 }
 0x1c3   : > { %v336_v12 = vadd.f32 1e-05, %v335_v11 }
 0x1c5   : > { %704 = vrsqrt.f32 %v336_v12 }
 0x1cf   : > { %v705_v13 = vpop.eup %704 }
 0x1d0   : > { %v338_v15 = vmul.f32 %v705_v13, %v330_v4 }
 0x1d2   : > { %v345_v17 = vmul.f32 %v574_v14, %v338_v15 }
 0x1d4   : > { %v352_v18 = vadd.f32 %v575_v16, %v345_v17 }
 0x1d6   : > { %v353_v19 = vpack.c.bf16 %v352_v18, %v352_v18 }
 0x1d8   : > { %592 = vmatmul.mubr.msk.bf16.vlgmr.msra.gmra.mrb[0].mxu0 %vm324_vm0, %v353_v19 }
 0x2ab   : > { %v414_v21 = vpop.f32.mrb[0].mxu0 }
 0x2ac   : > { %v415_v22 = vadd.f32 %v576_v20, %v414_v21  ;;  %v593_v23 = vpop.f32.mrb[1].mxu0 }
 0x2ad   : > { %v417_v24 = vpop.f32.mrb[2].mxu0 }
 0x2ae   : > { %v594_v25 = vpop.f32.mrb[3].mxu0  ;;  %420 = vst.msk [vmem:[%s319_s26] sm:$0xff] %vm324_vm0, %v415_v22 }
 0x2af   : > { %861 = shalt.err (!%p858_p8)
}
 0x2b0   : > { %s862_s15 = scalar_lea.hbm %s1226_s14, 128  ;;  %s866_s16 = scalar_lea.hbm %s1281_s5, 256 }
 0x2b1   : > { %p863_p9 = scmp.ne.s32.totalorder %s1226_s14, %s862_s15  ;;  %p867_p3 = scmp.lt.u32.totalorder %s1226_s14, %s1281_s5 }
 0x2b2   : > { %p868_p1 = scmp.lt.u32.totalorder %s866_s16, %s862_s15  ;;  %p870_p11 = scmp.lt.u32.totalorder %s862_s15, %s1226_s14 }
 0x2b3   : > { %p864_p4 = pnand %p863_p9, %p1298_p0 }
 0x2b4   : > { %p869_p12 = por %p868_p1, %p867_p3 }
 0x2b5   : > { %p865_p6 = pneg %p864_p4 }
 0x2b6   : > { %p871_p5 = por %p870_p11, %p869_p12 }
 0x2b8   : > { %p872_p7 = pnand %p871_p5, %p865_p6 }
 0x2ba   : > { %875 = shalt.err (!%p872_p7)
}
 0x2bb   : > { %613 = dma.vmem_to_hbm [thread:$0]  (%p1298_p0), %s1228_s9, 128, %s1226_s14, %s422_s21  }
 0x2bc PF: > { %s448_s26 = sand.u32 1, %s918_s18   ;;  %p1299_p10 = scmp.ne.s32.totalorder %s1294_s12, 0 }
 0x2bd   : > { %p1300_p13 = scmp.ge.s32.totalorder %s938_s23, 2  ;;  %s449_s28 = scalar_lea.sflag [#allocation4], %s448_s26 }
 0x2bf   : > { %p633_p2 = pnand %p1300_p13, %p1299_p10 }
 0x2c1   : > { %913 = dma.done.wait (!%p633_p2), %s449_s28, 128  }
 0x2c2   : > { %915 = vsyncadd (!%p633_p2), %s449_s28, 4294967168  ;;  %s23_s23 = sadd.s32 1, %s938_s23   ;;  %s1301_s18 = smov %s922_s19 }
 0x2c3   : > { %p20_p8 = scmp.ge.s32.totalorder %s23_s23, 4   ;;  %s1302_s19 = smov %s926_s20 }
 0x2c4   : > { %s1303_s20 = smov %s1149_s11  ;;  %s1304_s21 = smov %s934_s22 }
 0x2c5   : > { %s1305_s22 = smov %s1307_s27  ;;  %22 = sbr.rel (!%p20_p8) target bundleno = 8 (0x8), region = 103 }
 0x2cc   :  { %454 = vsyncpa [#allocation3], 1 }
 0x2cd   :  { %456 = vsyncpa [#allocation3 + $0x1], 1 }
 0x2ce   :  { %457 = vsyncpa [#allocation6], 1 }
 0x2cf   :  { %458 = vsyncpa [#allocation9], 1 }
 0x2d0   :  { %459 = vsyncpa [#allocation4], 1 }
 0x2d1   :  { %461 = vsyncpa [#allocation4 + $0x1], 1 }

// kernel: _lambda_.29
= control target key start
LH: loop header
LB: loop body
LE: loop exit
PB: predicated region body
PF: predicated region fallthrough
CT: control target
= control target key end

     0   :  { %s1704_s0 = inlined_call_operand.hbm [shape: f32[16,32], index: 0, kind: input, shape index: {}]   ;;  %s1705_s1 = inlined_call_operand.hbm [shape: f32[1,32], index: 1, kind: input, shape index: {}]   ;;  %s1706_s2 = inlined_call_operand.hbm [shape: f32[1,32], index: 2, kind: input, shape index: {}]   ;;  %s1707_s3 = inlined_call_operand.hbm [shape: bf16[32,64], index: 3, kind: input, shape index: {}]   ;;  %s1708_s4 = inlined_call_operand.hbm [shape: f32[1,64], index: 4, kind: input, shape index: {}]   ;;  %s1709_s5 = inlined_call_operand.hbm [shape: s32[16,1], index: 5, kind: input, shape index: {}]   ;;  %s1710_s6 = inlined_call_operand.hbm [shape: f32[16,64], index: 6, kind: output, shape index: {0}]   ;;  %s1711_s7 = inlined_call_operand.hbm [shape: f32[16,1], index: 7, kind: output, shape index: {1}]  }
   0x1   :  { %1720 = sst [smem:[#allocation26_spill]] %s1704_s0 }
   0x2   :  { %1721 = sst [smem:[#allocation27_spill]] %s1705_s1 }
   0x3   :  { %1722 = sst [smem:[#allocation28_spill]] %s1706_s2 }
   0x4   :  { %1723 = sst [smem:[#allocation29_spill]] %s1707_s3 }
   0x5   :  { %13 = vsyncpa [#allocation7], 0 }
   0x6   :  { %15 = vsyncpa [#allocation7 + $0x1], 0 }
   0x7   :  { %16 = vsyncpa [#allocation10], 0 }
   0x8   :  { %17 = vsyncpa [#allocation13], 0 }
   0x9   :  { %18 = vsyncpa [#allocation16], 0 }
   0xa   :  { %20 = vsyncpa [#allocation16 + $0x1], 0 }
   0xb   :  { %21 = vsyncpa [#allocation8], 0 }
   0xc   :  { %23 = vsyncpa [#allocation8 + $0x1], 0 }
   0xd   :  { %24 = vsyncpa [#allocation19], 0 }
   0xe   :  { %26 = vsyncpa [#allocation19 + $0x1], 0  ;;  %s1327_s24 = smov 0   ;;  %s1329_s25 = smov 0  }
   0xf   :  { %s1331_s26 = smov 0   ;;  %s1333_s27 = smov 0  }
  0x10   :  { %s1335_s28 = smov 0   ;;  %s1337_s29 = smov 0  }
  0x11 LB: > { %s1715_s30 = sadd.s32 4294967295, %s1271_s29   ;;  %p800_p0 = scmp.ge.s32.totalorder %s1271_s29, 1  ;;  %s1271_s29 = sphi %s1337_s29, %s32_s29   ;;  %s1267_s28 = sphi %s1335_s28, %s1751_s28   ;;  %s1263_s27 = sphi %s1333_s27, %s1750_s27   ;;  %s1259_s26 = sphi %s1331_s26, %s1749_s26   ;;  %s1255_s25 = sphi %s1329_s25, %s1748_s25   ;;  %s1251_s24 = sphi %s1327_s24, %s1747_s24  }
  0x12   : > { %p1361_p1 = scmp.eq.s32.totalorder %s1715_s30, 0  ;;  %p249_p2 = scmp.lt.s32.totalorder %s1271_s29, 3 }
  0x13   : > { %s1273_s10 = smov [#allocation9]   ;;  %s1274_s12 = smov [#allocation12]  }
  0x14   : > { %s1724_s8 = scalar_select %p1361_p1, 1, 0 }
  0x15   : > { %p1366_p3 = pnand %p800_p0, %p249_p2  ;;  %s262_s11 = sshll.u32 %s1273_s10, 4  ;;  %s263_s11 = int_to_ptr.vmem [resolvable:$true] %s262_s11 }
  0x16   : > { %s285_s13 = sshll.u32 %s1274_s12, 4  ;;  %s1275_s15 = smov [#allocation11]   ;;  %s1379_s13 = int_to_ptr.vmem [resolvable:$true] %s285_s13 }
  0x17   : > { %s1725_s9 = scalar_select %p1366_p3, 1, 0 }
  0x18   : > { %p866_p5 = pneg %p1366_p3  ;;  %s1381_s16 = sshll.u32 %s1275_s15, 4  ;;  %s274_s16 = int_to_ptr.vmem [resolvable:$true] %s1381_s16 }
  0x19   : > { %s1727_s1 = sld [smem:[#allocation27_spill]] }
  0x1a   : > { %p1375_p6 = pnand %p866_p5, %p1361_p1 }
  0x1c   : > { %p1391_p8 = pneg %p1375_p6 }
  0x1f   : > { %s973_s19 = scalar_lea.hbm %s1727_s1, 16 }
  0x20   : > { %p974_p7 = scmp.ne.s32.totalorder %s1727_s1, %s973_s19  ;;  %p980_p11 = scmp.lt.u32.totalorder %s973_s19, %s1727_s1 }
  0x22   : > { %p976_p9 = pnand %p1391_p8, %p974_p7 }
  0x24   : > { %p977_p10 = pneg %p976_p9 }
  0x26   : > { %p982_p12 = pnand %p980_p11, %p977_p10 }
  0x28   : > { %985 = shalt.err (!%p982_p12)
}
  0x29   : > { %s986_s12 = scalar_lea.vmem %s263_s11, 16  ;;  %s993_s15 = scalar_lea.vmem %s263_s11, 32 }
  0x2a   : > { %p987_p13 = scmp.ne.s32.totalorder %s263_s11, %s986_s12  ;;  %p994_p5 = scmp.lt.s32.totalorder %s263_s11, %s263_s11 }
  0x2b   : > { %p995_p4 = scmp.lt.s32.totalorder %s993_s15, %s986_s12 }
  0x2c   : > { %p989_p0 = pnand %p987_p13, %p1391_p8 }
  0x2d   : > { %p996_p3 = por %p995_p4, %p994_p5 }
  0x2e   : > { %p990_p2 = pneg %p989_p0 }
  0x30   : > { %p997_p1 = pnand %p996_p3, %p990_p2 }
  0x32   : > { %1000 = shalt.err (!%p997_p1)
}
  0x33   : > { %869 = dma.hbm_to_vmem [thread:$0]  (!%p1375_p6), %s1727_s1, 16, %s263_s11, [#allocation10]  }
  0x34   : > { %s1729_s3 = sld [smem:[#allocation29_spill]] }
  0x3a   : > { %s1001_s21 = scalar_lea.hbm %s1729_s3, 256 }
  0x3b   : > { %p1002_p7 = scmp.ne.s32.totalorder %s1729_s3, %s1001_s21  ;;  %p1008_p1 = scmp.lt.u32.totalorder %s1001_s21, %s1729_s3 }
  0x3d   : > { %p1004_p9 = pnand %p1002_p7, %p1391_p8 }
  0x3f   : > { %p1005_p4 = pneg %p1004_p9 }
  0x41   : > { %p1010_p3 = pnand %p1008_p1, %p1005_p4 }
  0x43   : > { %1013 = shalt.err (!%p1010_p3)
}
  0x44   : > { %s1014_s11 = scalar_lea.vmem %s1379_s13, 256  ;;  %p1022_p13 = scmp.lt.s32.totalorder %s1379_s13, %s1379_s13 }
  0x45   : > { %p1015_p10 = scmp.ne.s32.totalorder %s1379_s13, %s1014_s11  ;;  %p1023_p0 = scmp.lt.s32.totalorder %s1014_s11, %s1014_s11 }
  0x47   : > { %p1017_p11 = pnand %p1015_p10, %p1391_p8  ;;  %p1024_p2 = por %p1023_p0, %p1022_p13 }
  0x49   : > { %p1018_p12 = pneg %p1017_p11 }
  0x4b   : > { %p1025_p5 = pnand %p1024_p2, %p1018_p12 }
  0x4d   : > { %1028 = shalt.err (!%p1025_p5)
}
  0x4e   : > { %s1276_s17 = smov 64   ;;  %s1277_s18 = smov 4  }
  0x4f   : > { %875 = dma.hbm_to_vmem [thread:$0]  (!%p1375_p6), %s1729_s3, 256, %s1379_s13, [#allocation13], %s1276_s17, %s1276_s17, %s1277_s18  }
  0x50   : > { %s1730_s2 = sld [smem:[#allocation28_spill]] }
  0x56   : > { %s1029_s10 = scalar_lea.hbm %s1730_s2, 16 }
  0x57   : > { %p1030_p7 = scmp.ne.s32.totalorder %s1730_s2, %s1029_s10  ;;  %p1036_p1 = scmp.lt.u32.totalorder %s1029_s10, %s1730_s2 }
  0x59   : > { %p1032_p9 = pnand %p1030_p7, %p1391_p8 }
  0x5b   : > { %p1033_p4 = pneg %p1032_p9 }
  0x5d   : > { %p1038_p3 = pnand %p1036_p1, %p1033_p4 }
  0x5f   : > { %1041 = shalt.err (!%p1038_p3)
}
  0x60   : > { %s1042_s19 = scalar_lea.vmem %s274_s16, 16  ;;  %s1049_s13 = scalar_lea.vmem %s274_s16, 32 }
  0x61   : > { %p1043_p10 = scmp.ne.s32.totalorder %s274_s16, %s1042_s19  ;;  %p1050_p13 = scmp.lt.s32.totalorder %s274_s16, %s274_s16 }
  0x62   : > { %p1051_p0 = scmp.lt.s32.totalorder %s1049_s13, %s1042_s19 }
  0x63   : > { %p1045_p11 = pnand %p1043_p10, %p1391_p8 }
  0x64   : > { %p1052_p2 = por %p1051_p0, %p1050_p13 }
  0x65   : > { %p1046_p12 = pneg %p1045_p11 }
  0x67   : > { %p1053_p5 = pnand %p1052_p2, %p1046_p12 }
  0x69   : > { %1056 = shalt.err (!%p1053_p5)
}
  0x6a   : > { %872 = dma.hbm_to_vmem [thread:$0]  (!%p1375_p6), %s1730_s2, 16, %s274_s16, [#allocation10]  }
  0x6b   : > { %s1278_s30 = smov [#allocation14]   ;;  %s1057_s10 = scalar_lea.hbm %s1708_s4, 16 }
  0x6c   : > { %s301_s20 = sshll.u32 %s1278_s30, 4  ;;  %p1058_p7 = scmp.ne.s32.totalorder %s1708_s4, %s1057_s10  ;;  %s302_s20 = int_to_ptr.vmem [resolvable:$true] %s301_s20 }
  0x6d   : > { %p1064_p1 = scmp.lt.u32.totalorder %s1057_s10, %s1708_s4 }
  0x6e   : > { %p1060_p9 = pnand %p1058_p7, %p1391_p8 }
  0x70   : > { %p1061_p4 = pneg %p1060_p9 }
  0x72   : > { %p1066_p3 = pnand %p1064_p1, %p1061_p4 }
  0x74   : > { %1069 = shalt.err (!%p1066_p3)
}
  0x75   : > { %s1070_s16 = scalar_lea.vmem %s302_s20, 16  ;;  %s1077_s13 = scalar_lea.vmem %s302_s20, 32 }
  0x76   : > { %p1071_p10 = scmp.ne.s32.totalorder %s302_s20, %s1070_s16  ;;  %p1078_p13 = scmp.lt.s32.totalorder %s302_s20, %s302_s20 }
  0x77   : > { %p1079_p0 = scmp.lt.s32.totalorder %s1077_s13, %s1070_s16 }
  0x78   : > { %p1073_p11 = pnand %p1071_p10, %p1391_p8 }
  0x79   : > { %p1080_p2 = por %p1079_p0, %p1078_p13 }
  0x7a   : > { %p1074_p12 = pneg %p1073_p11 }
  0x7c   : > { %p1081_p5 = pnand %p1080_p2, %p1074_p12 }
  0x7e   : > { %1084 = shalt.err (!%p1081_p5)
}
  0x7f   : > { %878 = dma.hbm_to_vmem [thread:$0]  (!%p1375_p6), %s1708_s4, 16, %s302_s20, [#allocation13]  }
  0x80   : > { %s799_s22 = sadd.s32 4294967294, %s1271_s29   ;;  %s44_s30 = sadd.s32 1, %s1267_s28 }
  0x81   : > { %p46_p8 = scmp.ge.s32.totalorder %s44_s30, 2  ;;  %s51_s14 = sadd.s32 1, %s1259_s26 }
  0x82   : > { %p58_p7 = scmp.ne.s32.totalorder %s1259_s26, %s1255_s25  ;;  %p59_p9 = scmp.eq.s32.totalorder %s1271_s29, 0 }
  0x83   : > { %s1753_s30 = smov (%p46_p8, %s44_s30), 0  ;;  %p64_p1 = scmp.ne.s32.totalorder %s1255_s25, %s1251_s24 }
  0x84   : > { %p1475_p4 = por %p59_p9, %p58_p7  ;;  %s48_s20 = ssub.s32 %s1267_s28, %s1753_s30 }
  0x85   : > { %s1732_s23 = sadd.s32 4294967295, %s1271_s29   ;;  %p49_p3 = scmp.eq.s32.totalorder %s48_s20, 0 }
  0x86   : > { %p210_p6 = scmp.eq.s32.totalorder %s1732_s23, 1  ;;  %p1733_p10 = scmp.ne.s32.totalorder %s1724_s8, 0 }
  0x87   : > { %p216_p13 = scmp.eq.s32.totalorder %s799_s22, 1  ;;  %p897_p2 = scmp.lt.s32.totalorder %s1271_s29, 2 }
  0x88   : > { %p1487_p11 = por %p1733_p10, %p64_p1  ;;  %p1491_p12 = por %p210_p6, %p58_p7 }
  0x89   : > { %s1496_s15 = scalar_select %p49_p3, %s1259_s26, %s51_s14  }
  0x8a   : > { %s1734_s10 = scalar_select %p1487_p11, 1, 0 }
  0x8b   : > { %s1735_s12 = scalar_select %p1491_p12, 1, 0 }
  0x8c   : > { %p1498_p0 = por %p216_p13, %p64_p1  ;;  %s1504_s19 = sand.u32 1, %s1259_s26  }
  0x8d   : > { %s1717_s16 = sshll.u32 %s1267_s28, 7  ;;  %s1716_s13 = sshll.u32 %s1504_s19, 3 }
  0x8e   : > { %s1736_s11 = scalar_select %p1498_p0, 1, 0 }
  0x8f   : > { %s1737_s0 = sld [smem:[#allocation26_spill]]  ;;  %s316_s22 = scalar_lea.vmem [#allocation6], %s1716_s13 }
  0x90   : > { %s323_s14 = sshll.u32 %s316_s22, 4  ;;  %p1519_p5 = pnand %p897_p2, %p1475_p4  ;;  %s1523_s14 = int_to_ptr.vmem [resolvable:$true] %s323_s14 }
  0x91   : > { %s313_s1 = scalar_lea.sflag [#allocation7], %s1504_s19 }
  0x92   : > { %p1087_p7 = pneg %p1519_p5 }
  0x95   : > { %s1513_s20 = scalar_lea.hbm %s1737_s0, %s1717_s16  ;;  %s1090_s21 = scalar_lea.hbm %s1737_s0, 256 }
  0x96   : > { %s1085_s17 = scalar_lea.hbm %s1513_s20, 128  ;;  %p1091_p4 = scmp.lt.u32.totalorder %s1513_s20, %s1737_s0 }
  0x97   : > { %p1086_p8 = scmp.ne.s32.totalorder %s1513_s20, %s1085_s17  ;;  %p1092_p6 = scmp.lt.u32.totalorder %s1090_s21, %s1085_s17 }
  0x98   : > { %p1094_p10 = scmp.lt.u32.totalorder %s1085_s17, %s1513_s20 }
  0x99   : > { %p1088_p9 = pnand %p1087_p7, %p1086_p8  ;;  %p1093_p3 = por %p1092_p6, %p1091_p4 }
  0x9b   : > { %p1089_p1 = pneg %p1088_p9  ;;  %p1095_p13 = por %p1094_p10, %p1093_p3 }
  0x9d   : > { %p1096_p2 = pnand %p1095_p13, %p1089_p1 }
  0x9f   : > { %1099 = shalt.err (!%p1096_p2)
}
  0xa0   : > { %s1100_s2 = scalar_lea.vmem %s1523_s14, 128  ;;  %s1279_s18 = smov [#allocation6]  }
  0xa1   : > { %p1101_p8 = scmp.ne.s32.totalorder %s1523_s14, %s1100_s2  ;;  %s1105_s22 = sshll.u32 %s1279_s18, 4  ;;  %s1106_s22 = int_to_ptr.vmem [resolvable:$false] %s1105_s22 }
  0xa2   : > { %s1107_s16 = scalar_lea.vmem %s1106_s22, 256  ;;  %p1108_p12 = scmp.lt.s32.totalorder %s1523_s14, %s1106_s22 }
  0xa3   : > { %p1103_p9 = pnand %p1101_p8, %p1087_p7  ;;  %p1109_p4 = scmp.lt.s32.totalorder %s1107_s16, %s1100_s2 }
  0xa5   : > { %p1104_p0 = pneg %p1103_p9  ;;  %p1110_p6 = por %p1109_p4, %p1108_p12 }
  0xa7   : > { %p1111_p3 = pnand %p1110_p6, %p1104_p0 }
  0xa9   : > { %1114 = shalt.err (!%p1111_p3)
}
  0xaa   : > { %882 = dma.hbm_to_vmem [thread:$0]  (!%p1519_p5), %s1513_s20, 128, %s1523_s14, %s313_s1  }
  0xab   : > { %s1739_s13 = sshll.u32 %s1267_s28, 7  ;;  %s1740_s22 = sshll.u32 %s1504_s19, 3 }
  0xac   : > { %s1556_s18 = scalar_lea.hbm %s1709_s5, %s1739_s13  ;;  %s334_s2 = scalar_lea.vmem [#allocation15], %s1740_s22 }
  0xad   : > { %s341_s16 = sshll.u32 %s334_s2, 4  ;;  %s331_s0 = scalar_lea.sflag [#allocation16], %s1504_s19  ;;  %s342_s16 = int_to_ptr.vmem [resolvable:$true] %s341_s16 }
  0xae   : > { %s1115_s3 = scalar_lea.hbm %s1556_s18, 128  ;;  %s1120_s14 = scalar_lea.hbm %s1709_s5, 256 }
  0xaf   : > { %p1116_p12 = scmp.ne.s32.totalorder %s1556_s18, %s1115_s3  ;;  %p1121_p10 = scmp.lt.u32.totalorder %s1556_s18, %s1709_s5 }
  0xb0   : > { %p1122_p13 = scmp.lt.u32.totalorder %s1120_s14, %s1115_s3  ;;  %p1124_p8 = scmp.lt.u32.totalorder %s1115_s3, %s1556_s18 }
  0xb1   : > { %p1118_p0 = pnand %p1116_p12, %p1087_p7 }
  0xb2   : > { %p1123_p2 = por %p1122_p13, %p1121_p10 }
  0xb3   : > { %p1119_p1 = pneg %p1118_p0 }
  0xb4   : > { %p1125_p9 = por %p1124_p8, %p1123_p2 }
  0xb6   : > { %p1126_p4 = pnand %p1125_p9, %p1119_p1 }
  0xb8   : > { %1129 = shalt.err (!%p1126_p4)
}
  0xb9   : > { %s1130_s19 = scalar_lea.vmem %s342_s16, 128  ;;  %s1280_s21 = smov [#allocation15]  }
  0xba   : > { %p1131_p6 = scmp.ne.s32.totalorder %s342_s16, %s1130_s19  ;;  %s1135_s22 = sshll.u32 %s1280_s21, 4  ;;  %s1136_s22 = int_to_ptr.vmem [resolvable:$false] %s1135_s22 }
  0xbb   : > { %s1137_s2 = scalar_lea.vmem %s1136_s22, 256  ;;  %p1138_p0 = scmp.lt.s32.totalorder %s342_s16, %s1136_s22 }
  0xbc   : > { %p1133_p3 = pnand %p1131_p6, %p1087_p7  ;;  %p1139_p11 = scmp.lt.s32.totalorder %s1137_s2, %s1130_s19 }
  0xbe   : > { %p1134_p12 = pneg %p1133_p3  ;;  %p1140_p10 = por %p1139_p11, %p1138_p0 }
  0xc0   : > { %p1141_p13 = pnand %p1140_p10, %p1134_p12 }
  0xc2   : > { %1144 = shalt.err (!%p1141_p13)
}
  0xc3   : > { %885 = dma.hbm_to_vmem [thread:$0]  (!%p1519_p5), %s1556_s18, 128, %s342_s16, %s331_s0  }
  0xc4   : > { %p1741_p1 = scmp.ne.s32.totalorder %s1725_s9, 0 }
  0xc5   : > { %s1583_s3 = sand.u32 (!%p1741_p1), 1, %s1255_s25   ;;  %p1742_p11 = scmp.ne.s32.totalorder (!%p1741_p1), %s1734_s10, 0 }
  0xc6   : > { %350 = sbr.rel (%p1741_p1) target bundleno = 1223 (0x4c7), region = 44  ;;  %s1586_s1 = sshll.u32 (!%p1741_p1), %s1583_s3, 3 }
  0xc7   : > { %s353_s20 = scalar_lea.sflag (!%p1741_p1), [#allocation7], %s1583_s3  ;;  %s356_s14 = scalar_lea.vmem (!%p1741_p1), [#allocation6], %s1586_s1 }
  0xcd   : > { %1226 = dma.done.wait (%p1742_p11), %s353_s20, 128  }
  0xce   : > { %1228 = vsyncadd (%p1742_p11), %s353_s20, 4294967168  ;;  %p1743_p5 = scmp.ne.s32.totalorder %s1724_s8, 0 }
  0xd0   : > { %1230 = dma.done.wait (%p1743_p5), [#allocation10], 32  }
  0xd1   : > { %1232 = vsyncadd (%p1743_p5), [#allocation10], 4294967264 }
  0xd2   : > { %1234 = dma.done.wait (%p1743_p5), [#allocation13], 272  }
  0xd3   : > { %1236 = vsyncadd (%p1743_p5), [#allocation13], 4294967024  ;;  %s378_s0 = scalar_lea.sflag [#allocation16], %s1583_s3  ;;  %s381_s9 = scalar_lea.vmem [#allocation15], %s1586_s1 }
  0xd4   : > { %1238 = dma.done.wait (%p1742_p11), %s378_s0, 128  }
  0xd5   : > { %1240 = vsyncadd (%p1742_p11), %s378_s0, 4294967168  ;;  %vm430_vm0 = vcmask 261120   ;;  %v427_v0 = vld [vmem:[%s356_s14] sm:$0xff]  ;;  %v963_v7 = vld [vmem:[#allocation12] sm:$0xff]   ;;  %vm462_vm1 = vcmask 7168   ;;  %v1281_v8 = vmov 0.0   ;;  %v562_v24 = vlaneseq }
  0xd6   : > { %v431_v1 = vsel %vm430_vm0, %v427_v0, 0.0  ;;  %834 = vmatprep.subr.bf16.mxu0 %v1281_v8  ;;  %464 = vst.msk [vmem:[#allocation4] sm:$0xff] %vm462_vm1, %v1281_v8  ;;  %465 = vst.msk [vmem:[#allocation5] sm:$0xff] %vm462_vm1, %v1281_v8  ;;  %v964_v9 = vld [vmem:[#allocation12 + $0x8] sm:$0xff]   ;;  %vm1282_vm2 = vmmov 0   ;;  %v567_v10 = vld [vmem:[%s381_s9] sm:$0xff] }
  0xd7   : > { %432 = vadd.xlane.f32.xlu0 %v431_v1  ;;  %835 = vmatpush3.bf16.msra.mxu0 %v963_v7  ;;  %v1283_v11 = vmov 0   ;;  %v819_v16 = vld [vmem:[#allocation9] ss:$0 sm:$0xff]  ;;  %v820_v18 = vld [vmem:[#allocation11] ss:$0 sm:$0xff]  ;;  %vm460_vm3 = vcmask 257024  }
  0xd8   : > { %838 = vmatprep.mubr.msk.bf16.mxu0 %vm1282_vm2, %v1281_v8  ;;  %836 = vmatprep.subr.bf16.mxu0 %v1281_v8  ;;  %v1284_v23 = vmov -inf   ;;  %v563_v25 = vand.u32 127, %v562_v24  ;;  %v821_v27 = vld [vmem:[#allocation14] ss:$0 sm:$0xff]  ;;  %vm534_vm5 = vcmask 523264   ;;  %s414_s8 = scalar_lea.vmem [#allocation17], %s1586_s1 }
  0xd9   : > { %962 = vset.pattern.permute.xlu0 %v1283_v11  ;;  %961 = vset.pattern.permute.xlu1 %v1283_v11  ;;  %463 = vst.msk [vmem:[#allocation3] sm:$0xff] %vm462_vm1, %v1284_v23  ;;  %s827_s10 = sshll.u32 %s1263_s27, 7  ;;  %s609_s13 = sshll.u32 %s414_s8, 4  ;;  %s610_s13 = int_to_ptr.vmem [resolvable:$true] %s609_s13 }
  0xda   : > { %s1627_s16 = scalar_lea.hbm %s1710_s6, %s827_s10  ;;  %s590_s17 = scalar_lea.sflag [#allocation8], %s1583_s3 }
  0xdb   : > { %837 = vmatpush3.bf16.msra.mxu0 %v964_v9  ;;  %s1145_s19 = scalar_lea.vmem %s610_s13, 128  ;;  %p1744_p2 = scmp.ne.s32.totalorder %s1735_s12, 0 }
  0xdc   : > { %p1146_p7 = scmp.ne.s32.totalorder %s610_s13, %s1145_s19  ;;  %s1285_s21 = smov [#allocation17]  }
  0xdd   : > { %v566_v37 = vld [vmem:[#allocation5] sm:$0xff]  ;;  %s1149_s22 = sshll.u32 %s1285_s21, 4  ;;  %s1150_s22 = int_to_ptr.vmem [resolvable:$false] %s1149_s22 }
  0xde   : > { %p1147_p8 = pnand %p1146_p7, %p1744_p2  ;;  %s1151_s2 = scalar_lea.vmem %s1150_s22, 256 }
  0xdf   : > { %p1152_p4 = scmp.lt.s32.totalorder %s610_s13, %s1150_s22  ;;  %p1153_p6 = scmp.lt.s32.totalorder %s1151_s2, %s1145_s19 }
  0xe0   : > { %v536_v36 = vld [vmem:[#allocation3] sm:$0xff]  ;;  %p1148_p9 = pneg %p1147_p8 }
  0xe1   : > { %p1154_p3 = por %p1153_p6, %p1152_p4 }
  0xe3   : > { %p1155_p12 = pnand %p1154_p3, %p1148_p9 }
 0x164   : > { %v433_v2 = vpop.xlane.xlu0 %432 }
 0x165   : > { %v435_v3 = vmul.f32 0.03125, %v433_v2 }
 0x167   : > { %v436_v4 = vsub.f32 %v427_v0, %v435_v3 }
 0x169   : > { %v437_v5 = vmul.f32 %v436_v4, %v436_v4 }
 0x16b   : > { %v438_v6 = vsel %vm430_vm0, %v437_v5, 0.0 }
 0x16c   : > { %439 = vadd.xlane.f32.xlu0 %v438_v6 }
 0x182   : > { %569 = vperm.xlu0 %962, %v567_v10  }
 0x1f9   : > { %v440_v12 = vpop.xlane.xlu0 %439 }
 0x1fa   : > { %v441_v13 = vmul.f32 0.03125, %v440_v12 }
 0x1fc   : > { %v442_v14 = vadd.f32 1e-05, %v441_v13 }
 0x1fe   : > { %965 = vrsqrt.f32 %v442_v14 }
 0x201   : > { %v570_v26 = vpop.permute.xlu0 %569 }
 0x202   : > { %vm571_vm4 = vcmp.eq.s32.totalorder %v563_v25, %v570_v26 }
 0x208   : > { %v966_v15 = vpop.eup %965 }
 0x209   : > { %v444_v17 = vmul.f32 %v966_v15, %v436_v4 }
 0x20b   : > { %v451_v19 = vmul.f32 %v819_v16, %v444_v17 }
 0x20d   : > { %v458_v20 = vadd.f32 %v820_v18, %v451_v19 }
 0x20f   : > { %v459_v21 = vpack.c.bf16 %v458_v20, %v458_v20 }
 0x211   : > { %461 = vst.msk [vmem:[#allocation2] sm:$0xf] %vm460_vm3, %v459_v21 }
 0x218   : > { %v466_v22 = vld [vmem:[#allocation2] sm:$0xf] }
 0x219   : > { %839 = vmatmul.mubr.msk.bf16.vlgmr.msra.gmra.mrb[0].mxu0 %vm430_vm0, %v466_v22 }
 0x2ec   : > { %v528_v28 = vpop.f32.mrb[0].mxu0 }
 0x2ed   : > { %v529_v29 = vadd.f32 %v821_v27, %v528_v28  ;;  %v840_v30 = vpop.f32.mrb[1].mxu0 }
 0x2ee   : > { %v531_v31 = vpop.f32.mrb[2].mxu0 }
 0x2ef   : > { %v841_v32 = vpop.f32.mrb[3].mxu0  ;;  %v537_v33 = vsel %vm534_vm5, %v529_v29, -inf  ;;  %v572_v34 = vsel %vm571_vm4, %v529_v29, 0.0  ;;  %535 = vst.msk [vmem:[%s414_s8] sm:$0xff] %vm534_vm5, %v529_v29 }
 0x2f0   : > { %538 = vmax.xlane.f32.xlu1 %v537_v33  ;;  %v573_v35 = vsel %vm534_vm5, %v572_v34, 0.0 }
 0x2f1   : > { %574 = vadd.xlane.f32.xlu0 %v573_v35 }
 0x37d   : > { %v539_v38 = vpop.xlane.xlu1 %538 }
 0x37e   : > { %v540_v39 = vmax.f32 %v536_v36, %v539_v38  ;;  %v575_v40 = vpop.xlane.xlu0 %574 }
 0x37f   : > { %v576_v41 = vadd.f32 %v575_v40, %v566_v37 }
 0x380   : > { %v542_v42 = vsub.f32 %v536_v36, %v540_v39  ;;  %560 = vst.msk [vmem:[#allocation3] sm:$0xff] %vm462_vm1, %v540_v39  ;;  %548 = vperm.xlu1 %961, %v540_v39  }
 0x381   : > { %577 = vst.msk [vmem:[#allocation5] sm:$0xff] %vm462_vm1, %v576_v41 }
 0x3ff   : > { %v549_v43 = vpop.permute.xlu1 %548 }
 0x400   : > { %v551_v44 = vsub.f32 %v529_v29, %v549_v43 }
 0x402   : > { %v552_v45 = vmul.f32 1.442695, %v551_v44 }
 0x404   : > { %967 = vpow2.f32 %v552_v45 }
 0x40e   : > { %v968_v46 = vpop.eup %967 }
 0x40f   : > { %v554_v47 = vsel %vm534_vm5, %v968_v46, 0.0 }
 0x410   : > { %555 = vadd.xlane.f32.xlu1 %v554_v47 }
 0x411   : > { %1158 = shalt.err (!%p1155_p12)
}
 0x412   : > { %s1159_s20 = scalar_lea.hbm %s1627_s16, 128  ;;  %s1163_s9 = scalar_lea.hbm %s1710_s6, 256 }
 0x413   : > { %p1160_p0 = scmp.ne.s32.totalorder %s1627_s16, %s1159_s20  ;;  %p1164_p1 = scmp.lt.u32.totalorder %s1627_s16, %s1710_s6 }
 0x414   : > { %p1165_p11 = scmp.lt.u32.totalorder %s1163_s9, %s1159_s20  ;;  %p1167_p7 = scmp.lt.u32.totalorder %s1159_s20, %s1627_s16 }
 0x415   : > { %p1161_p10 = pnand %p1160_p0, %p1744_p2 }
 0x416   : > { %p1166_p5 = por %p1165_p11, %p1164_p1 }
 0x417   : > { %p1162_p13 = pneg %p1161_p10 }
 0x418   : > { %p1168_p8 = por %p1167_p7, %p1166_p5 }
 0x41a   : > { %p1169_p9 = pnand %p1168_p8, %p1162_p13 }
 0x41c   : > { %1172 = shalt.err (!%p1169_p9)
}
 0x41d   : > { %862 = dma.vmem_to_hbm [thread:$0]  (%p1744_p2), %s610_s13, 128, %s1627_s16, %s590_s17   ;;  %v543_v48 = vmul.f32 1.442695, %v542_v42  ;;  %v541_v50 = vld [vmem:[#allocation4] sm:$0xff]  ;;  %v581_v57 = vld [vmem:[#allocation3] sm:$0xff]  ;;  %v586_v59 = vld [vmem:[#allocation5] sm:$0xff] }
 0x41e   : > { %s421_s18 = scalar_lea.vmem [#allocation18], %s1586_s1  ;;  %s1654_s17 = scalar_lea.hbm %s1711_s7, %s827_s10 }
 0x41f   : > { %969 = vpow2.f32 %v543_v48  ;;  %s622_s19 = sshll.u32 %s421_s18, 4  ;;  %s595_s21 = scalar_lea.sflag [#allocation19], %s1583_s3  ;;  %s1656_s19 = int_to_ptr.vmem [resolvable:$true] %s622_s19 }
 0x420   : > { %s1173_s22 = scalar_lea.vmem %s1656_s19, 128  ;;  %s1286_s1 = smov [#allocation18]  }
 0x421   : > { %p1174_p4 = scmp.ne.s32.totalorder %s1656_s19, %s1173_s22  ;;  %s1177_s27 = sshll.u32 %s1286_s1, 4  ;;  %s1178_s27 = int_to_ptr.vmem [resolvable:$false] %s1177_s27 }
 0x422   : > { %s1179_s2 = scalar_lea.vmem %s1178_s27, 256  ;;  %p1180_p12 = scmp.lt.s32.totalorder %s1656_s19, %s1178_s27 }
 0x423   : > { %p1175_p6 = pnand %p1174_p4, %p1744_p2  ;;  %p1181_p0 = scmp.lt.s32.totalorder %s1179_s2, %s1173_s22 }
 0x425   : > { %p1176_p3 = pneg %p1175_p6  ;;  %p1182_p10 = por %p1181_p0, %p1180_p12 }
 0x427   : > { %p1183_p13 = pnand %p1182_p10, %p1176_p3 }
 0x429   : > { %v970_v49 = vpop.eup %969 }
 0x42a   : > { %v545_v51 = vmul.f32 %v970_v49, %v541_v50 }
 0x49d   : > { %v556_v52 = vpop.xlane.xlu1 %555 }
 0x49e   : > { %v557_v53 = vadd.f32 %v556_v52, %v545_v51 }
 0x4a0   : > { %559 = vst.msk [vmem:[#allocation4] sm:$0xff] %vm462_vm1, %v557_v53 }
 0x4a7   : > { %v582_v54 = vld [vmem:[#allocation4] sm:$0xff] }
 0x4a8   : > { %971 = vlog2.f32 %v582_v54 }
 0x4b2   : > { %v972_v55 = vpop.eup %971 }
 0x4b3   : > { %v584_v56 = vmul.f32 0.6931472, %v972_v55 }
 0x4b5   : > { %v585_v58 = vadd.f32 %v584_v56, %v581_v57 }
 0x4b7   : > { %v587_v60 = vsub.f32 %v585_v58, %v586_v59 }
 0x4b9   : > { %588 = vst.msk [vmem:[%s421_s18] sm:$0xff] %vm462_vm1, %v587_v60 }
 0x4ba   : > { %1186 = shalt.err (!%p1183_p13)
}
 0x4bb   : > { %s1187_s3 = scalar_lea.hbm %s1654_s17, 128  ;;  %s1191_s14 = scalar_lea.hbm %s1711_s7, 256 }
 0x4bc   : > { %p1188_p1 = scmp.ne.s32.totalorder %s1654_s17, %s1187_s3  ;;  %p1192_p7 = scmp.lt.u32.totalorder %s1654_s17, %s1711_s7 }
 0x4bd   : > { %p1193_p8 = scmp.lt.u32.totalorder %s1191_s14, %s1187_s3  ;;  %p1195_p4 = scmp.lt.u32.totalorder %s1187_s3, %s1654_s17 }
 0x4be   : > { %p1189_p11 = pnand %p1188_p1, %p1744_p2 }
 0x4bf   : > { %p1194_p9 = por %p1193_p8, %p1192_p7 }
 0x4c0   : > { %p1190_p5 = pneg %p1189_p11 }
 0x4c1   : > { %p1196_p6 = por %p1195_p4, %p1194_p9 }
 0x4c3   : > { %p1197_p3 = pnand %p1196_p6, %p1190_p5 }
 0x4c5   : > { %1200 = shalt.err (!%p1197_p3)
}
 0x4c6   : > { %863 = dma.vmem_to_hbm [thread:$0]  (%p1744_p2), %s1656_s19, 128, %s1654_s17, %s595_s21  }
 0x4c7 PF: > { %s634_s8 = sand.u32 1, %s1251_s24   ;;  %p1745_p12 = scmp.ne.s32.totalorder %s1736_s11, 0 }
 0x4c8   : > { %p1746_p0 = scmp.ge.s32.totalorder %s1271_s29, 2  ;;  %s635_s23 = scalar_lea.sflag [#allocation8], %s634_s8 }
 0x4ca   : > { %p887_p10 = pnand %p1746_p0, %p1745_p12 }
 0x4cc   : > { %1242 = dma.done.wait (!%p887_p10), %s635_s23, 128  }
 0x4cd   : > { %1244 = vsyncadd (!%p887_p10), %s635_s23, 4294967168  ;;  %s644_s18 = scalar_lea.sflag [#allocation19], %s634_s8 }
 0x4ce   : > { %1246 = dma.done.wait (!%p887_p10), %s644_s18, 128  }
 0x4cf   : > { %1248 = vsyncadd (!%p887_p10), %s644_s18, 4294967168  ;;  %s32_s29 = sadd.s32 1, %s1271_s29   ;;  %s1747_s24 = smov %s1255_s25 }
 0x4d0   : > { %p29_p13 = scmp.ge.s32.totalorder %s32_s29, 4   ;;  %s1748_s25 = smov %s1259_s26 }
 0x4d1   : > { %s1749_s26 = smov %s1496_s15  ;;  %s1750_s27 = smov %s1267_s28 }
 0x4d2   : > { %s1751_s28 = smov %s1753_s30  ;;  %31 = sbr.rel (!%p29_p13) target bundleno = 17 (0x11), region = 145 }
 0x4d9   :  { %649 = vsyncpa [#allocation7], 1 }
 0x4da   :  { %651 = vsyncpa [#allocation7 + $0x1], 1 }
 0x4db   :  { %652 = vsyncpa [#allocation10], 1 }
 0x4dc   :  { %653 = vsyncpa [#allocation13], 1 }
 0x4dd   :  { %654 = vsyncpa [#allocation16], 1 }
 0x4de   :  { %656 = vsyncpa [#allocation16 + $0x1], 1 }
 0x4df   :  { %657 = vsyncpa [#allocation8], 1 }
 0x4e0   :  { %659 = vsyncpa [#allocation8 + $0x1], 1 }
 0x4e1   :  { %660 = vsyncpa [#allocation19], 1 }
 0x4e2   :  { %662 = vsyncpa [#allocation19 + $0x1], 1 }

</bundles_post_ra>
